<compile_context>
chip_gen: v7x
topology: tpu7x:2x2x1
jax: 0.10.0
libtpu: 0.0.40
codegen_flags: <defaults>
</compile_context>

<pallas_src>
import jax
import jax.numpy as jnp
from jax.experimental import pallas as pl
from jax.experimental.pallas import tpu as pltpu


# ----------------------------------------------------------------------------
# Kernel 1: fused encoder projection + masked mean pooling + L2 normalization
# ----------------------------------------------------------------------------
def encoder_pool_kernel(x_ref, m_ref, w_ref, b_ref, o_ref, acc_ref, den_ref):
    si = pl.program_id(1)

    @pl.when(si == 0)
    def _():
        acc_ref[...] = jnp.zeros_like(acc_ref)
        den_ref[...] = jnp.zeros_like(den_ref)

    x = x_ref[...]                                   # [TB, TS, H] bf16
    TB, TS, H = x.shape
    # MXU matmul: bf16 operands, f32 accumulation.  Bias-add / tanh stay f32
    # (v5e has no bf16 VPU/EUP).
    h = jnp.dot(x.reshape(TB * TS, H), w_ref[...],
                preferred_element_type=jnp.float32)  # [TB*TS, H] f32
    h = jnp.tanh(h + b_ref[...])                     # bias (1, H) f32 broadcast
    h = h.reshape(TB, TS, H)

    m = m_ref[...]                                   # [TB, TS, 1] f32
    # Masked-mean partial sums (f32), accumulated across the seq-tile axis.
    acc_ref[...] += jnp.sum(h * m, axis=1)           # [TB, H]
    den_ref[...] += jnp.sum(m, axis=1)               # [TB, 1]

    @pl.when(si == pl.num_programs(1) - 1)
    def _():
        pooled = acc_ref[...] / jnp.maximum(den_ref[...], 1e-9)
        norm = jnp.sqrt(jnp.sum(pooled * pooled, axis=1, keepdims=True))
        o_ref[...] = (pooled / jnp.maximum(norm, 1e-12)).astype(o_ref.dtype)


def _pick_tile(n, target, align=8):
    """Largest multiple of `align` that divides n and is <= target, else n."""
    t = min(target, n)
    t -= t % align
    while t >= align:
        if n % t == 0:
            return t
        t -= align
    return n


def encode_pool_normalize(x_emb, mask_f32, w, b, *, tb_target=8, ts_target=128):
    """x_emb: [B, S, H] (cast to bf16 for the MXU), mask_f32: [B, S, 1] f32."""
    B, S, H = x_emb.shape
    TB = _pick_tile(B, tb_target)
    TS = _pick_tile(S, ts_target)

    return pl.pallas_call(
        encoder_pool_kernel,
        out_shape=jax.ShapeDtypeStruct((B, H), jnp.float32),
        grid_spec=pltpu.PrefetchScalarGridSpec(
            num_scalar_prefetch=0,
            grid=(B // TB, S // TS),
            in_specs=[
                pl.BlockSpec((TB, TS, H), lambda bi, si: (bi, si, 0)),  # x
                pl.BlockSpec((TB, TS, 1), lambda bi, si: (bi, si, 0)),  # mask
                pl.BlockSpec((H, H), lambda bi, si: (0, 0)),            # W (resident)
                pl.BlockSpec((1, H), lambda bi, si: (0, 0)),            # bias
            ],
            out_specs=pl.BlockSpec((TB, H), lambda bi, si: (bi, 0)),
            scratch_shapes=[
                pltpu.VMEM((TB, H), jnp.float32),   # masked-sum accumulator
                pltpu.VMEM((TB, 1), jnp.float32),   # mask-count accumulator
            ],
        ),
        compiler_params=pltpu.CompilerParams(
            dimension_semantics=("parallel", "arbitrary"),
            vmem_limit_bytes=32 * 1024 * 1024,
        ),
    )(x_emb.astype(jnp.bfloat16), mask_f32, w.astype(jnp.bfloat16), b)


# ----------------------------------------------------------------------------
# Kernel 2: similarity score matrix + scaled cross-entropy loss
#   scores[i, j] = cos_sim(a_i, p_j)  (== <a_i, p_j> since both are unit-norm)
#   loss = mean_i CE(20 * scores[i], label=i)
# ----------------------------------------------------------------------------
def similarity_loss_kernel(a_ref, p_ref, scores_ref, loss_ref):
    a = a_ref[...]                                   # [B, H] f32, unit-norm
    p = p_ref[...]                                   # [B, H] f32, unit-norm
    B = a.shape[0]

    # Embeddings are already L2-normalized in kernel 1, so cosine similarity
    # is the plain dot product; the norm outer-product / clamp is redundant
    # (differs only by rounding noise) and is dropped to keep the MXU free.
    scores = jax.lax.dot_general(
        a, p, (((1,), (1,)), ((), ())),
        preferred_element_type=jnp.float32)          # [B, B]
    scores_ref[...] = scores

    logits = scores * 20.0
    mx = jnp.max(logits, axis=1, keepdims=True)
    lse = mx + jnp.log(jnp.sum(jnp.exp(logits - mx), axis=1, keepdims=True))  # [B,1]
    # Diagonal logits read directly from a*p row-sums (no [B,B] iota masks).
    diag = 20.0 * jnp.sum(a * p, axis=1, keepdims=True)                       # [B,1]
    per_row = lse - diag                                                      # [B,1]
    loss_ref[...] = jnp.sum(per_row, axis=0, keepdims=True) / float(B)        # [1,1]


def similarity_and_loss(anchor_emb, pos_emb):
    B, H = anchor_emb.shape
    scores, loss = pl.pallas_call(
        similarity_loss_kernel,
        out_shape=(
            jax.ShapeDtypeStruct((B, B), jnp.float32),
            jax.ShapeDtypeStruct((1, 1), jnp.float32),
        ),
        grid=(1,),
        in_specs=[
            pl.BlockSpec((B, H), lambda i: (0, 0)),
            pl.BlockSpec((B, H), lambda i: (0, 0)),
        ],
        out_specs=(
            pl.BlockSpec((B, B), lambda i: (0, 0)),
            pl.BlockSpec((1, 1), lambda i: (0, 0)),
        ),
    )(anchor_emb, pos_emb)
    return scores, loss[0, 0]


# ----------------------------------------------------------------------------
# Model wrapper (glue in plain JAX: embedding lookup / param setup)
# ----------------------------------------------------------------------------
def init_params(key, vocab_size, seq_len, hidden):
    k1, k2, k3 = jax.random.split(key, 3)
    return {
        "tok_emb": jax.random.normal(k1, (vocab_size, hidden), jnp.float32) * 0.02,
        "pos_emb": jax.random.normal(k2, (seq_len, hidden), jnp.float32) * 0.02,
        "w": jax.random.normal(k3, (hidden, hidden), jnp.float32) * (1.0 / jnp.sqrt(hidden)),
        "b": jnp.zeros((1, hidden), jnp.float32),
    }


def get_embedding(params, input_ids, attention_mask):
    S = input_ids.shape[1]
    x = params["tok_emb"][input_ids] + params["pos_emb"][None, :S, :]   # [B,S,H] f32
    mask = attention_mask.astype(jnp.float32)[:, :, None]               # [B,S,1] f32
    return encode_pool_normalize(x, mask, params["w"], params["b"])


def forward(params, question_input_ids, question_attention_mask,
            context_input_ids, context_attention_mask):
    anchor_emb = get_embedding(params, question_input_ids, question_attention_mask)
    pos_emb = get_embedding(params, context_input_ids, context_attention_mask)
    scores, loss = similarity_and_loss(anchor_emb, pos_emb)
    # EncoderOutput(loss=..., scores=..., anchor_emb=..., pos_emb=...)
    return {"loss": loss, "scores": scores, "anchor_emb": anchor_emb, "pos_emb": pos_emb}


if __name__ == "__main__":
    # Small but lane-dense shapes (H multiple of 128); grid actually tiles:
    # batch grid = B/8 = 2 (parallel), seq grid = S/128 = 2 (reduction).
    B, S, H, V = 16, 256, 128, 512
    key = jax.random.PRNGKey(0)
    kp, kq, kc = jax.random.split(key, 3)

    params = init_params(kp, V, S, H)

    question_input_ids = jax.random.randint(kq, (B, S), 0, V, dtype=jnp.int32)
    context_input_ids = jax.random.randint(kc, (B, S), 0, V, dtype=jnp.int32)

    # Deterministic attention masks with varying amounts of right padding.
    q_lens = (S - (jnp.arange(B) % 5) * 7).astype(jnp.int32)
    c_lens = (S - (jnp.arange(B) % 3) * 11).astype(jnp.int32)
    question_attention_mask = (jnp.arange(S)[None, :] < q_lens[:, None]).astype(jnp.int32)
    context_attention_mask = (jnp.arange(S)[None, :] < c_lens[:, None]).astype(jnp.int32)

    out = forward(params, question_input_ids, question_attention_mask,
                  context_input_ids, context_attention_mask)
    jax.block_until_ready(out)

    assert out["anchor_emb"].shape == (B, H)
    assert out["pos_emb"].shape == (B, H)
    assert out["scores"].shape == (B, B)
    assert out["loss"].shape == ()
    # Embeddings must be unit-norm (F.normalize semantics).
    norms = jnp.linalg.norm(out["anchor_emb"], axis=1)
    assert bool(jnp.all(jnp.abs(norms - 1.0) < 1e-3))
    assert bool(jnp.isfinite(out["loss"]))
    print("KERNEL_OK")
</pallas_src>

<mosaic_0001>
module attributes {stable_mosaic.version = 11 : i64} {
  func.func @encoder_pool_kernel(%arg0: i32, %arg1: i32, %arg2: memref<8x128x128xbf16, #tpu.memory_space<vmem>>, %arg3: memref<8x128x1xf32, #tpu.memory_space<vmem>>, %arg4: memref<128x128xbf16, #tpu.memory_space<vmem>>, %arg5: memref<1x128xf32, #tpu.memory_space<vmem>>, %arg6: memref<8x128xf32, #tpu.memory_space<vmem>>, %arg7: memref<8x128xf32, #tpu.memory_space<vmem>>, %arg8: memref<8x1xf32, #tpu.memory_space<vmem>>) attributes {dimension_semantics = [#tpu.dimension_semantics<parallel>, #tpu.dimension_semantics<arbitrary>], iteration_bounds = array<i64: 2, 2>, scalar_prefetch = 0 : i64, scratch_operands = 2 : i64, tpu.core_type = #tpu.core_type<tc>, window_params = [{transform_indices = @transform_0, window_bounds = array<i64: 8, 128, 128>}, {transform_indices = @transform_1, window_bounds = array<i64: 8, 128, 1>}, {pipeline_mode = #tpu.pipeline_mode<synchronous>, transform_indices = @transform_2, window_bounds = array<i64: 128, 128>}, {pipeline_mode = #tpu.pipeline_mode<synchronous>, transform_indices = @transform_3, window_bounds = array<i64: 1, 128>}, {transform_indices = @transform_4, window_bounds = array<i64: 8, 128>}]} {
    %c0_i32 = arith.constant 0 : i32
    %0 = arith.cmpi eq, %arg1, %c0_i32 : i32
    %1 = arith.extui %0 : i1 to i32
    %c0_i32_0 = arith.constant 0 : i32
    %2 = arith.cmpi ne, %1, %c0_i32_0 : i32
    scf.if %2 {
      %cst_21 = arith.constant 0.000000e+00 : f32
      %26 = vector.broadcast %cst_21 : f32 to vector<8x128xf32>
      %c0_22 = arith.constant 0 : index
      %c0_23 = arith.constant 0 : index
      %27 = vector.load %arg7[%c0_22, %c0_23] : memref<8x128xf32, #tpu.memory_space<vmem>>, vector<8x128xf32>
      tpu.vector_store %arg7[%c0_22, %c0_23], %26 {strides = array<i32>} : memref<8x128xf32, #tpu.memory_space<vmem>>, vector<8x128xf32>,
      %cst_24 = arith.constant 0.000000e+00 : f32
      %28 = vector.broadcast %cst_24 : f32 to vector<8x1xf32>
      %c0_25 = arith.constant 0 : index
      %c0_26 = arith.constant 0 : index
      %29 = vector.load %arg8[%c0_25, %c0_26] : memref<8x1xf32, #tpu.memory_space<vmem>>, vector<8x1xf32>
      tpu.vector_store %arg8[%c0_25, %c0_26], %28 {strides = array<i32>} : memref<8x1xf32, #tpu.memory_space<vmem>>, vector<8x1xf32>,
    } else {
    }
    %c0 = arith.constant 0 : index
    %c0_1 = arith.constant 0 : index
    %c0_2 = arith.constant 0 : index
    %3 = vector.load %arg2[%c0, %c0_1, %c0_2] : memref<8x128x128xbf16, #tpu.memory_space<vmem>>, vector<8x128x128xbf16>
    %4 = vector.shape_cast %3 : vector<8x128x128xbf16> to vector<1024x128xbf16>
    %c0_3 = arith.constant 0 : index
    %c0_4 = arith.constant 0 : index
    %5 = vector.load %arg4[%c0_3, %c0_4] : memref<128x128xbf16, #tpu.memory_space<vmem>>, vector<128x128xbf16>
    %cst = arith.constant dense<0.000000e+00> : vector<1024x128xf32>
    %6 = tpu.matmul %4, %5, %cst {dimension_numbers = #tpu.dot_dimension_numbers<[1], [0], [0], [1], [0, 0, 1, 1], [], []>} : vector<1024x128xbf16>, vector<128x128xbf16>, vector<1024x128xf32> -> vector<1024x128xf32>
    %c0_5 = arith.constant 0 : index
    %c0_6 = arith.constant 0 : index
    %7 = vector.load %arg5[%c0_5, %c0_6] : memref<1x128xf32, #tpu.memory_space<vmem>>, vector<1x128xf32>
    %8 = vector.broadcast %7 : vector<1x128xf32> to vector<1024x128xf32>
    %9 = arith.addf %6, %8 : vector<1024x128xf32>
    %10 = math.tanh %9 : vector<1024x128xf32>
    %11 = vector.shape_cast %10 : vector<1024x128xf32> to vector<8x128x128xf32>
    %c0_7 = arith.constant 0 : index
    %c0_8 = arith.constant 0 : index
    %c0_9 = arith.constant 0 : index
    %12 = vector.load %arg3[%c0_7, %c0_8, %c0_9] : memref<8x128x1xf32, #tpu.memory_space<vmem>>, vector<8x128x1xf32>
    %c0_10 = arith.constant 0 : index
    %c0_11 = arith.constant 0 : index
    %13 = vector.load %arg7[%c0_10, %c0_11] : memref<8x128xf32, #tpu.memory_space<vmem>>, vector<8x128xf32>
    %14 = vector.broadcast %12 : vector<8x128x1xf32> to vector<8x128x128xf32>
    %15 = arith.mulf %11, %14 : vector<8x128x128xf32>
    %cst_12 = arith.constant dense<0.000000e+00> : vector<8x128xf32>
    %16 = vector.multi_reduction <add>, %15, %cst_12 [1] : vector<8x128x128xf32> to vector<8x128xf32>
    %17 = arith.addf %13, %16 : vector<8x128xf32>
    %c0_13 = arith.constant 0 : index
    %c0_14 = arith.constant 0 : index
    %18 = vector.load %arg7[%c0_13, %c0_14] : memref<8x128xf32, #tpu.memory_space<vmem>>, vector<8x128xf32>
    tpu.vector_store %arg7[%c0_13, %c0_14], %17 {strides = array<i32>} : memref<8x128xf32, #tpu.memory_space<vmem>>, vector<8x128xf32>,
    %c0_15 = arith.constant 0 : index
    %c0_16 = arith.constant 0 : index
    %19 = vector.load %arg8[%c0_15, %c0_16] : memref<8x1xf32, #tpu.memory_space<vmem>>, vector<8x1xf32>
    %cst_17 = arith.constant dense<0.000000e+00> : vector<8x1xf32>
    %20 = vector.multi_reduction <add>, %12, %cst_17 [1] : vector<8x128x1xf32> to vector<8x1xf32>
    %21 = arith.addf %19, %20 : vector<8x1xf32>
    %c0_18 = arith.constant 0 : index
    %c0_19 = arith.constant 0 : index
    %22 = vector.load %arg8[%c0_18, %c0_19] : memref<8x1xf32, #tpu.memory_space<vmem>>, vector<8x1xf32>
    tpu.vector_store %arg8[%c0_18, %c0_19], %21 {strides = array<i32>} : memref<8x1xf32, #tpu.memory_space<vmem>>, vector<8x1xf32>,
    %c1_i32 = arith.constant 1 : i32
    %23 = arith.cmpi eq, %arg1, %c1_i32 : i32
    %24 = arith.extui %23 : i1 to i32
    %c0_i32_20 = arith.constant 0 : i32
    %25 = arith.cmpi ne, %24, %c0_i32_20 : i32
    scf.if %25 {
      %c0_21 = arith.constant 0 : index
      %c0_22 = arith.constant 0 : index
      %26 = vector.load %arg7[%c0_21, %c0_22] : memref<8x128xf32, #tpu.memory_space<vmem>>, vector<8x128xf32>
      %c0_23 = arith.constant 0 : index
      %c0_24 = arith.constant 0 : index
      %27 = vector.load %arg8[%c0_23, %c0_24] : memref<8x1xf32, #tpu.memory_space<vmem>>, vector<8x1xf32>
      %cst_25 = arith.constant 9.99999971E-10 : f32
      %28 = vector.broadcast %cst_25 : f32 to vector<8x1xf32>
      %29 = arith.maximumf %27, %28 : vector<8x1xf32>
      %30 = vector.broadcast %29 : vector<8x1xf32> to vector<8x128xf32>
      %31 = arith.divf %26, %30 : vector<8x128xf32>
      %32 = arith.mulf %31, %31 : vector<8x128xf32>
      %cst_26 = arith.constant dense<0.000000e+00> : vector<8xf32>
      %33 = vector.multi_reduction <add>, %32, %cst_26 [1] : vector<8x128xf32> to vector<8xf32>
      %34 = vector.shape_cast %33 : vector<8xf32> to vector<8x1xf32>
      %35 = math.sqrt %34 : vector<8x1xf32>
      %cst_27 = arith.constant 9.99999996E-13 : f32
      %36 = vector.broadcast %cst_27 : f32 to vector<8x1xf32>
      %37 = arith.maximumf %35, %36 : vector<8x1xf32>
      %38 = vector.broadcast %37 : vector<8x1xf32> to vector<8x128xf32>
      %39 = arith.divf %31, %38 : vector<8x128xf32>
      %c0_28 = arith.constant 0 : index
      %c0_29 = arith.constant 0 : index
      %40 = vector.load %arg6[%c0_28, %c0_29] : memref<8x128xf32, #tpu.memory_space<vmem>>, vector<8x128xf32>
      tpu.vector_store %arg6[%c0_28, %c0_29], %39 {strides = array<i32>} : memref<8x128xf32, #tpu.memory_space<vmem>>, vector<8x128xf32>,
    } else {
    }
    return
  }
  func.func @transform_0(%arg0: i32, %arg1: i32) -> (i32, i32, i32) {
    %c0_i32 = arith.constant 0 : i32
    %c0_i32_0 = arith.constant 0 : i32
    return %arg0, %arg1, %c0_i32 : i32, i32, i32
  }
  func.func @transform_1(%arg0: i32, %arg1: i32) -> (i32, i32, i32) {
    %c0_i32 = arith.constant 0 : i32
    %c0_i32_0 = arith.constant 0 : i32
    return %arg0, %arg1, %c0_i32 : i32, i32, i32
  }
  func.func @transform_2(%arg0: i32, %arg1: i32) -> (i32, i32) {
    %c0_i32 = arith.constant 0 : i32
    %c0_i32_0 = arith.constant 0 : i32
    %c0_i32_1 = arith.constant 0 : i32
    return %c0_i32, %c0_i32_0 : i32, i32
  }
  func.func @transform_3(%arg0: i32, %arg1: i32) -> (i32, i32) {
    %c0_i32 = arith.constant 0 : i32
    %c0_i32_0 = arith.constant 0 : i32
    %c0_i32_1 = arith.constant 0 : i32
    return %c0_i32, %c0_i32_0 : i32, i32
  }
  func.func @transform_4(%arg0: i32, %arg1: i32) -> (i32, i32) {
    %c0_i32 = arith.constant 0 : i32
    %c0_i32_0 = arith.constant 0 : i32
    return %arg0, %c0_i32 : i32, i32
  }
}

</mosaic_0001>

<bundles_post_ra>
// kernel: tpu_custom_call.1
= control target key start
LH: loop header
LB: loop body
LE: loop exit
PB: predicated region body
PF: predicated region fallthrough
CT: control target
= control target key end

     0   :  { %s6806_s0 = inlined_call_operand.vmem [shape: bf16[16,256,128], index: 0, kind: input, shape index: {}]   ;;  %s6807_s1 = inlined_call_operand.vmem [shape: f32[16,256,1], index: 1, kind: input, shape index: {}]   ;;  %s6808_s2 = inlined_call_operand.vmem [shape: bf16[128,128], index: 2, kind: input, shape index: {}]   ;;  %s6809_s3 = inlined_call_operand.vmem [shape: f32[1,128], index: 3, kind: input, shape index: {}]   ;;  %s6810_s4 = inlined_call_operand.hbm [shape: f32[16,128], index: 4, kind: output, shape index: {}]  }
   0x1   :  { %6812 = sst [smem:[#allocation43_spill]] %s6806_s0 }
   0x2   :  { %9 = vsyncpa [#allocation7], 0 }
   0x3   :  { %11 = vsyncpa [#allocation7 + $0x1], 0  ;;  %s5047_s15 = smov 0   ;;  %s5049_s16 = smov 0  }
   0x4   :  { %s5051_s17 = smov 0   ;;  %s5053_s18 = smov 0  }
   0x5   :  { %s5055_s19 = smov 0   ;;  %s5057_s20 = smov 0  }
   0x6   :  { %s5059_s21 = smov 0   ;;  %s5061_s22 = smov 0  }
   0x7   :  { %s5063_s23 = smov 0   ;;  %s5065_s24 = smov 0  }
   0x8 LB: > { %s4147_s25 = sadd.s32 4294967295, %s5016_s24   ;;  %s4148_s26 = sadd.s32 4294967294, %s5016_s24   ;;  %s5016_s24 = sphi %s5065_s24, %s17_s24   ;;  %s5012_s23 = sphi %s5063_s23, %s6894_s23   ;;  %s5008_s22 = sphi %s5061_s22, %s6893_s22   ;;  %s5004_s21 = sphi %s5059_s21, %s6892_s21   ;;  %s5000_s20 = sphi %s5057_s20, %s6891_s20   ;;  %s4996_s19 = sphi %s5055_s19, %s6890_s19   ;;  %s4992_s18 = sphi %s5053_s18, %s6889_s18   ;;  %s4988_s17 = sphi %s5051_s17, %s6888_s17   ;;  %s4984_s16 = sphi %s5049_s16, %s6887_s16   ;;  %s4980_s15 = sphi %s5047_s15, %s6886_s15  }
   0x9   : > { %s26_s27 = sadd.s32 1, %s5008_s22  ;;  %s29_s28 = sadd.s32 1, %s5012_s23 }
   0xa   : > { %p27_p0 = scmp.ge.s32.totalorder %s26_s27, 2  ;;  %s38_s29 = sadd.s32 1, %s4996_s19 }
   0xb   : > { %p45_p1 = scmp.ne.s32.totalorder %s4996_s19, %s4992_s18  ;;  %p46_p2 = scmp.eq.s32.totalorder %s5016_s24, 0 }
   0xc   : > { %s6896_s27 = smov (%p27_p0, %s26_s27), 0  ;;  %s6898_s28 = smov (!%p27_p0, %s29_s28), %s5012_s23 }
   0xd   : > { %s34_s30 = ssub.s32 %s5008_s22, %s6896_s27  ;;  %p5110_p3 = por %p46_p2, %p45_p1 }
   0xe   : > { %p31_p4 = scmp.ge.s32.totalorder %s6898_s28, 2  ;;  %s134_s6 = sadd.s32 1, %s4988_s17 }
   0xf   : > { %p144_p5 = scmp.ne.s32.totalorder %s4988_s17, %s4984_s16  ;;  %p145_p6 = scmp.eq.s32.totalorder %s4147_s25, 3 }
  0x10   : > { %s6900_s28 = smov (%p31_p4, %s6898_s28), 0  ;;  %p150_p8 = scmp.ne.s32.totalorder %s4984_s16, %s4980_s15 }
  0x11   : > { %6814 = sst [smem:[#allocation9_spill]] %s6900_s28  ;;  %p5119_p7 = por %p145_p6, %p144_p5 }
  0x12   : > { %s33_s8 = ssub.s32 %s5012_s23, %s6900_s28  ;;  %p151_p9 = scmp.eq.s32.totalorder %s4148_s26, 3 }
  0x13   : > { %s35_s9 = sor.u32 %s34_s30, %s33_s8  ;;  %p132_p10 = scmp.eq.s32.totalorder %s33_s8, 0 }
  0x14   : > { %p36_p11 = scmp.eq.s32.totalorder %s35_s9, 0  ;;  %p5127_p12 = por %p151_p9, %p150_p8 }
  0x15   : > { %s5132_s11 = scalar_select %p132_p10, %s4988_s17, %s134_s6  }
  0x16   : > { %s5135_s12 = scalar_select %p36_p11, %s4996_s19, %s38_s29  }
  0x17   : > { %p4150_p13 = scmp.ge.s32.totalorder %s5016_s24, 4 }
  0x19   : > { %173 = sbr.rel (%p4150_p13) target bundleno = 145 (0x91), region = 24 }
  0x20   : > { %176 = sbr.rel (!%p5110_p3) target bundleno = 74 (0x4a), region = 28  ;;  %s178_s13 = sand.u32 (%p5110_p3), 1, %s4996_s19  }
  0x21   : > { %s4153_s14 = sshll.u32 (%p5110_p3), %s5008_s22, 4  ;;  %s4151_s25 = sshll.u32 (%p5110_p3), %s178_s13, 9 }
  0x22   : > { %s4244_s26 = sshll.u32 (%p5110_p3), %s5012_s23, 8  ;;  %s6817_s0 = sld [smem:[#allocation43_spill]] (%p5110_p3) }
  0x23   : > { %s184_s30 = sadd.s32 (%p5110_p3), %s4244_s26, %s4153_s14  ;;  %s5151_s13 = scalar_lea.vmem (%p5110_p3), [#allocation4], %s4151_s25 }
  0x24   : > { %s4155_s8 = sshll.u32 (%p5110_p3), %s184_s30, 2 }
  0x28   : > { %s5146_s29 = scalar_lea.vmem %s6817_s0, %s4155_s8 }
  0x29   : > { %v202_v0 = vld [vmem:[%s5146_s29] sm:$0xff]   ;;  %v206_v1 = vld [vmem:[%s5146_s29 + $0x8] sm:$0xff]   ;;  %v210_v2 = vld [vmem:[%s5146_s29 + $0x10] sm:$0xff]  }
  0x2a   : > { %203 = vst [vmem:[%s5151_s13] sm:$0xff] %v202_v0   ;;  %207 = vst [vmem:[%s5151_s13 + $0x8] sm:$0xff] %v206_v1   ;;  %v214_v3 = vld [vmem:[%s5146_s29 + $0x18] sm:$0xff]   ;;  %v218_v4 = vld [vmem:[%s5146_s29 + $0x20] sm:$0xff]  }
  0x2b   : > { %211 = vst [vmem:[%s5151_s13 + $0x10] sm:$0xff] %v210_v2   ;;  %v222_v5 = vld [vmem:[%s5146_s29 + $0x28] sm:$0xff]   ;;  %215 = vst [vmem:[%s5151_s13 + $0x18] sm:$0xff] %v214_v3   ;;  %v226_v6 = vld [vmem:[%s5146_s29 + $0x30] sm:$0xff]  }
  0x2c   : > { %219 = vst [vmem:[%s5151_s13 + $0x20] sm:$0xff] %v218_v4   ;;  %223 = vst [vmem:[%s5151_s13 + $0x28] sm:$0xff] %v222_v5   ;;  %v230_v7 = vld [vmem:[%s5146_s29 + $0x38] sm:$0xff]   ;;  %v234_v8 = vld [vmem:[%s5146_s29 + $0x80] sm:$0xff]  }
  0x2d   : > { %227 = vst [vmem:[%s5151_s13 + $0x30] sm:$0xff] %v226_v6   ;;  %231 = vst [vmem:[%s5151_s13 + $0x38] sm:$0xff] %v230_v7   ;;  %v238_v9 = vld [vmem:[%s5146_s29 + $0x88] sm:$0xff]   ;;  %v242_v10 = vld [vmem:[%s5146_s29 + $0x90] sm:$0xff]  }
  0x2e   : > { %235 = vst [vmem:[%s5151_s13 + $0x40] sm:$0xff] %v234_v8   ;;  %v246_v11 = vld [vmem:[%s5146_s29 + $0x98] sm:$0xff]   ;;  %239 = vst [vmem:[%s5151_s13 + $0x48] sm:$0xff] %v238_v9   ;;  %v250_v12 = vld [vmem:[%s5146_s29 + $0xa0] sm:$0xff]  }
  0x2f   : > { %243 = vst [vmem:[%s5151_s13 + $0x50] sm:$0xff] %v242_v10   ;;  %247 = vst [vmem:[%s5151_s13 + $0x58] sm:$0xff] %v246_v11   ;;  %v254_v13 = vld [vmem:[%s5146_s29 + $0xa8] sm:$0xff]   ;;  %v258_v14 = vld [vmem:[%s5146_s29 + $0xb0] sm:$0xff]  }
  0x30   : > { %251 = vst [vmem:[%s5151_s13 + $0x60] sm:$0xff] %v250_v12   ;;  %255 = vst [vmem:[%s5151_s13 + $0x68] sm:$0xff] %v254_v13   ;;  %v262_v15 = vld [vmem:[%s5146_s29 + $0xb8] sm:$0xff]   ;;  %v266_v16 = vld [vmem:[%s5146_s29 + $0x100] sm:$0xff]  }
  0x31   : > { %259 = vst [vmem:[%s5151_s13 + $0x70] sm:$0xff] %v258_v14   ;;  %v270_v17 = vld [vmem:[%s5146_s29 + $0x108] sm:$0xff]   ;;  %263 = vst [vmem:[%s5151_s13 + $0x78] sm:$0xff] %v262_v15   ;;  %v274_v18 = vld [vmem:[%s5146_s29 + $0x110] sm:$0xff]  }
  0x32   : > { %267 = vst [vmem:[%s5151_s13 + $0x80] sm:$0xff] %v266_v16   ;;  %271 = vst [vmem:[%s5151_s13 + $0x88] sm:$0xff] %v270_v17   ;;  %v278_v19 = vld [vmem:[%s5146_s29 + $0x118] sm:$0xff]   ;;  %v282_v20 = vld [vmem:[%s5146_s29 + $0x120] sm:$0xff]  }
  0x33   : > { %275 = vst [vmem:[%s5151_s13 + $0x90] sm:$0xff] %v274_v18   ;;  %279 = vst [vmem:[%s5151_s13 + $0x98] sm:$0xff] %v278_v19   ;;  %v286_v21 = vld [vmem:[%s5146_s29 + $0x128] sm:$0xff]   ;;  %v290_v22 = vld [vmem:[%s5146_s29 + $0x130] sm:$0xff]  }
  0x34   : > { %283 = vst [vmem:[%s5151_s13 + $0xa0] sm:$0xff] %v282_v20   ;;  %v294_v23 = vld [vmem:[%s5146_s29 + $0x138] sm:$0xff]   ;;  %287 = vst [vmem:[%s5151_s13 + $0xa8] sm:$0xff] %v286_v21   ;;  %v298_v24 = vld [vmem:[%s5146_s29 + $0x180] sm:$0xff]  }
  0x35   : > { %291 = vst [vmem:[%s5151_s13 + $0xb0] sm:$0xff] %v290_v22   ;;  %295 = vst [vmem:[%s5151_s13 + $0xb8] sm:$0xff] %v294_v23   ;;  %v302_v25 = vld [vmem:[%s5146_s29 + $0x188] sm:$0xff]   ;;  %v306_v26 = vld [vmem:[%s5146_s29 + $0x190] sm:$0xff]  }
  0x36   : > { %299 = vst [vmem:[%s5151_s13 + $0xc0] sm:$0xff] %v298_v24   ;;  %303 = vst [vmem:[%s5151_s13 + $0xc8] sm:$0xff] %v302_v25   ;;  %v310_v27 = vld [vmem:[%s5146_s29 + $0x198] sm:$0xff]   ;;  %v314_v28 = vld [vmem:[%s5146_s29 + $0x1a0] sm:$0xff]  }
  0x37   : > { %307 = vst [vmem:[%s5151_s13 + $0xd0] sm:$0xff] %v306_v26   ;;  %v318_v29 = vld [vmem:[%s5146_s29 + $0x1a8] sm:$0xff]   ;;  %311 = vst [vmem:[%s5151_s13 + $0xd8] sm:$0xff] %v310_v27   ;;  %v322_v30 = vld [vmem:[%s5146_s29 + $0x1b0] sm:$0xff]  }
  0x38   : > { %315 = vst [vmem:[%s5151_s13 + $0xe0] sm:$0xff] %v314_v28   ;;  %319 = vst [vmem:[%s5151_s13 + $0xe8] sm:$0xff] %v318_v29   ;;  %v326_v31 = vld [vmem:[%s5146_s29 + $0x1b8] sm:$0xff]   ;;  %v330_v32 = vld [vmem:[%s5146_s29 + $0x200] sm:$0xff]  }
  0x39   : > { %323 = vst [vmem:[%s5151_s13 + $0xf0] sm:$0xff] %v322_v30   ;;  %327 = vst [vmem:[%s5151_s13 + $0xf8] sm:$0xff] %v326_v31   ;;  %v334_v33 = vld [vmem:[%s5146_s29 + $0x208] sm:$0xff]   ;;  %v338_v34 = vld [vmem:[%s5146_s29 + $0x210] sm:$0xff]  }
  0x3a   : > { %331 = vst [vmem:[%s5151_s13 + $0x100] sm:$0xff] %v330_v32   ;;  %v342_v35 = vld [vmem:[%s5146_s29 + $0x218] sm:$0xff]   ;;  %335 = vst [vmem:[%s5151_s13 + $0x108] sm:$0xff] %v334_v33   ;;  %v346_v36 = vld [vmem:[%s5146_s29 + $0x220] sm:$0xff]  }
  0x3b   : > { %339 = vst [vmem:[%s5151_s13 + $0x110] sm:$0xff] %v338_v34   ;;  %343 = vst [vmem:[%s5151_s13 + $0x118] sm:$0xff] %v342_v35   ;;  %v350_v37 = vld [vmem:[%s5146_s29 + $0x228] sm:$0xff]   ;;  %v354_v38 = vld [vmem:[%s5146_s29 + $0x230] sm:$0xff]  }
  0x3c   : > { %347 = vst [vmem:[%s5151_s13 + $0x120] sm:$0xff] %v346_v36   ;;  %351 = vst [vmem:[%s5151_s13 + $0x128] sm:$0xff] %v350_v37   ;;  %v358_v39 = vld [vmem:[%s5146_s29 + $0x238] sm:$0xff]   ;;  %v362_v40 = vld [vmem:[%s5146_s29 + $0x280] sm:$0xff]  }
  0x3d   : > { %355 = vst [vmem:[%s5151_s13 + $0x130] sm:$0xff] %v354_v38   ;;  %v366_v41 = vld [vmem:[%s5146_s29 + $0x288] sm:$0xff]   ;;  %359 = vst [vmem:[%s5151_s13 + $0x138] sm:$0xff] %v358_v39   ;;  %v370_v42 = vld [vmem:[%s5146_s29 + $0x290] sm:$0xff]  }
  0x3e   : > { %363 = vst [vmem:[%s5151_s13 + $0x140] sm:$0xff] %v362_v40   ;;  %367 = vst [vmem:[%s5151_s13 + $0x148] sm:$0xff] %v366_v41   ;;  %v374_v43 = vld [vmem:[%s5146_s29 + $0x298] sm:$0xff]   ;;  %v378_v44 = vld [vmem:[%s5146_s29 + $0x2a0] sm:$0xff]  }
  0x3f   : > { %371 = vst [vmem:[%s5151_s13 + $0x150] sm:$0xff] %v370_v42   ;;  %375 = vst [vmem:[%s5151_s13 + $0x158] sm:$0xff] %v374_v43   ;;  %v382_v45 = vld [vmem:[%s5146_s29 + $0x2a8] sm:$0xff]   ;;  %v386_v46 = vld [vmem:[%s5146_s29 + $0x2b0] sm:$0xff]  }
  0x40   : > { %379 = vst [vmem:[%s5151_s13 + $0x160] sm:$0xff] %v378_v44   ;;  %v390_v47 = vld [vmem:[%s5146_s29 + $0x2b8] sm:$0xff]   ;;  %383 = vst [vmem:[%s5151_s13 + $0x168] sm:$0xff] %v382_v45   ;;  %v394_v48 = vld [vmem:[%s5146_s29 + $0x300] sm:$0xff]  }
  0x41   : > { %387 = vst [vmem:[%s5151_s13 + $0x170] sm:$0xff] %v386_v46   ;;  %391 = vst [vmem:[%s5151_s13 + $0x178] sm:$0xff] %v390_v47   ;;  %v398_v49 = vld [vmem:[%s5146_s29 + $0x308] sm:$0xff]   ;;  %v402_v50 = vld [vmem:[%s5146_s29 + $0x310] sm:$0xff]  }
  0x42   : > { %395 = vst [vmem:[%s5151_s13 + $0x180] sm:$0xff] %v394_v48   ;;  %399 = vst [vmem:[%s5151_s13 + $0x188] sm:$0xff] %v398_v49   ;;  %v406_v51 = vld [vmem:[%s5146_s29 + $0x318] sm:$0xff]   ;;  %v410_v52 = vld [vmem:[%s5146_s29 + $0x320] sm:$0xff]  }
  0x43   : > { %403 = vst [vmem:[%s5151_s13 + $0x190] sm:$0xff] %v402_v50   ;;  %v414_v53 = vld [vmem:[%s5146_s29 + $0x328] sm:$0xff]   ;;  %407 = vst [vmem:[%s5151_s13 + $0x198] sm:$0xff] %v406_v51   ;;  %v418_v54 = vld [vmem:[%s5146_s29 + $0x330] sm:$0xff]  }
  0x44   : > { %411 = vst [vmem:[%s5151_s13 + $0x1a0] sm:$0xff] %v410_v52   ;;  %415 = vst [vmem:[%s5151_s13 + $0x1a8] sm:$0xff] %v414_v53   ;;  %v422_v55 = vld [vmem:[%s5146_s29 + $0x338] sm:$0xff]   ;;  %v426_v56 = vld [vmem:[%s5146_s29 + $0x380] sm:$0xff]  }
  0x45   : > { %419 = vst [vmem:[%s5151_s13 + $0x1b0] sm:$0xff] %v418_v54   ;;  %423 = vst [vmem:[%s5151_s13 + $0x1b8] sm:$0xff] %v422_v55   ;;  %v430_v57 = vld [vmem:[%s5146_s29 + $0x388] sm:$0xff]   ;;  %v434_v58 = vld [vmem:[%s5146_s29 + $0x390] sm:$0xff]  }
  0x46   : > { %427 = vst [vmem:[%s5151_s13 + $0x1c0] sm:$0xff] %v426_v56   ;;  %v438_v59 = vld [vmem:[%s5146_s29 + $0x398] sm:$0xff]   ;;  %431 = vst [vmem:[%s5151_s13 + $0x1c8] sm:$0xff] %v430_v57   ;;  %v442_v60 = vld [vmem:[%s5146_s29 + $0x3a0] sm:$0xff]  }
  0x47   : > { %435 = vst [vmem:[%s5151_s13 + $0x1d0] sm:$0xff] %v434_v58   ;;  %439 = vst [vmem:[%s5151_s13 + $0x1d8] sm:$0xff] %v438_v59   ;;  %v446_v61 = vld [vmem:[%s5146_s29 + $0x3a8] sm:$0xff]   ;;  %v450_v62 = vld [vmem:[%s5146_s29 + $0x3b0] sm:$0xff]  }
  0x48   : > { %443 = vst [vmem:[%s5151_s13 + $0x1e0] sm:$0xff] %v442_v60   ;;  %447 = vst [vmem:[%s5151_s13 + $0x1e8] sm:$0xff] %v446_v61   ;;  %v454_v63 = vld [vmem:[%s5146_s29 + $0x3b8] sm:$0xff]  }
  0x49   : > { %451 = vst [vmem:[%s5151_s13 + $0x1f0] sm:$0xff] %v450_v62   ;;  %455 = vst [vmem:[%s5151_s13 + $0x1f8] sm:$0xff] %v454_v63  }
  0x4a PF: > { %736 = sbr.rel (!%p5110_p3) target bundleno = 145 (0x91), region = 69  ;;  %s738_s14 = sand.u32 (%p5110_p3), 1, %s4996_s19  }
  0x4b   : > { %s4158_s25 = sshll.u32 (%p5110_p3), %s5008_s22, 4  ;;  %s4156_s26 = sshll.u32 (%p5110_p3), %s738_s14, 10 }
  0x4c   : > { %s4245_s30 = sshll.u32 (%p5110_p3), %s5012_s23, 8  ;;  %s5291_s5 = scalar_lea.vmem (%p5110_p3), [#allocation5], %s4156_s26 }
  0x4d   : > { %s744_s8 = sadd.s32 (%p5110_p3), %s4245_s30, %s4158_s25 }
  0x4e   : > { %s4160_s9 = sshll.u32 (%p5110_p3), %s744_s8, 3 }
  0x4f   : > { %s5286_s28 = scalar_lea.vmem (%p5110_p3), %s6807_s1, %s4160_s9 }
  0x50   : > { %v1028_v0 = vld [vmem:[%s5286_s28] sm:$0xff] (%p5110_p3)  ;;  %v1030_v1 = vld [vmem:[%s5286_s28 + $0x8] sm:$0xff] (%p5110_p3)  ;;  %v1032_v2 = vld [vmem:[%s5286_s28 + $0x10] sm:$0xff] (%p5110_p3) }
  0x51   : > { %1029 = vst [vmem:[%s5291_s5] sm:$0xff] %v1028_v0  ;;  %1031 = vst [vmem:[%s5291_s5 + $0x8] sm:$0xff] %v1030_v1  ;;  %v1034_v3 = vld [vmem:[%s5286_s28 + $0x18] sm:$0xff]  ;;  %v1036_v4 = vld [vmem:[%s5286_s28 + $0x20] sm:$0xff] }
  0x52   : > { %1033 = vst [vmem:[%s5291_s5 + $0x10] sm:$0xff] %v1032_v2  ;;  %v1038_v5 = vld [vmem:[%s5286_s28 + $0x28] sm:$0xff]  ;;  %1035 = vst [vmem:[%s5291_s5 + $0x18] sm:$0xff] %v1034_v3  ;;  %v1040_v6 = vld [vmem:[%s5286_s28 + $0x30] sm:$0xff] }
  0x53   : > { %1037 = vst [vmem:[%s5291_s5 + $0x20] sm:$0xff] %v1036_v4  ;;  %1039 = vst [vmem:[%s5291_s5 + $0x28] sm:$0xff] %v1038_v5  ;;  %v1042_v7 = vld [vmem:[%s5286_s28 + $0x38] sm:$0xff]  ;;  %v1044_v8 = vld [vmem:[%s5286_s28 + $0x40] sm:$0xff] }
  0x54   : > { %1041 = vst [vmem:[%s5291_s5 + $0x30] sm:$0xff] %v1040_v6  ;;  %1043 = vst [vmem:[%s5291_s5 + $0x38] sm:$0xff] %v1042_v7  ;;  %v1046_v9 = vld [vmem:[%s5286_s28 + $0x48] sm:$0xff]  ;;  %v1048_v10 = vld [vmem:[%s5286_s28 + $0x50] sm:$0xff] }
  0x55   : > { %1045 = vst [vmem:[%s5291_s5 + $0x40] sm:$0xff] %v1044_v8  ;;  %v1050_v11 = vld [vmem:[%s5286_s28 + $0x58] sm:$0xff]  ;;  %1047 = vst [vmem:[%s5291_s5 + $0x48] sm:$0xff] %v1046_v9  ;;  %v1052_v12 = vld [vmem:[%s5286_s28 + $0x60] sm:$0xff] }
  0x56   : > { %1049 = vst [vmem:[%s5291_s5 + $0x50] sm:$0xff] %v1048_v10  ;;  %1051 = vst [vmem:[%s5291_s5 + $0x58] sm:$0xff] %v1050_v11  ;;  %v1054_v13 = vld [vmem:[%s5286_s28 + $0x68] sm:$0xff]  ;;  %v1056_v14 = vld [vmem:[%s5286_s28 + $0x70] sm:$0xff] }
  0x57   : > { %1053 = vst [vmem:[%s5291_s5 + $0x60] sm:$0xff] %v1052_v12  ;;  %1055 = vst [vmem:[%s5291_s5 + $0x68] sm:$0xff] %v1054_v13  ;;  %v1058_v15 = vld [vmem:[%s5286_s28 + $0x78] sm:$0xff]  ;;  %v1060_v16 = vld [vmem:[%s5286_s28 + $0x100] sm:$0xff] }
  0x58   : > { %1057 = vst [vmem:[%s5291_s5 + $0x70] sm:$0xff] %v1056_v14  ;;  %v1062_v17 = vld [vmem:[%s5286_s28 + $0x108] sm:$0xff]  ;;  %1059 = vst [vmem:[%s5291_s5 + $0x78] sm:$0xff] %v1058_v15  ;;  %v1064_v18 = vld [vmem:[%s5286_s28 + $0x110] sm:$0xff] }
  0x59   : > { %1061 = vst [vmem:[%s5291_s5 + $0x80] sm:$0xff] %v1060_v16  ;;  %1063 = vst [vmem:[%s5291_s5 + $0x88] sm:$0xff] %v1062_v17  ;;  %v1066_v19 = vld [vmem:[%s5286_s28 + $0x118] sm:$0xff]  ;;  %v1068_v20 = vld [vmem:[%s5286_s28 + $0x120] sm:$0xff] }
  0x5a   : > { %1065 = vst [vmem:[%s5291_s5 + $0x90] sm:$0xff] %v1064_v18  ;;  %1067 = vst [vmem:[%s5291_s5 + $0x98] sm:$0xff] %v1066_v19  ;;  %v1070_v21 = vld [vmem:[%s5286_s28 + $0x128] sm:$0xff]  ;;  %v1072_v22 = vld [vmem:[%s5286_s28 + $0x130] sm:$0xff] }
  0x5b   : > { %1069 = vst [vmem:[%s5291_s5 + $0xa0] sm:$0xff] %v1068_v20  ;;  %v1074_v23 = vld [vmem:[%s5286_s28 + $0x138] sm:$0xff]  ;;  %1071 = vst [vmem:[%s5291_s5 + $0xa8] sm:$0xff] %v1070_v21  ;;  %v1076_v24 = vld [vmem:[%s5286_s28 + $0x140] sm:$0xff] }
  0x5c   : > { %1073 = vst [vmem:[%s5291_s5 + $0xb0] sm:$0xff] %v1072_v22  ;;  %1075 = vst [vmem:[%s5291_s5 + $0xb8] sm:$0xff] %v1074_v23  ;;  %v1078_v25 = vld [vmem:[%s5286_s28 + $0x148] sm:$0xff]  ;;  %v1080_v26 = vld [vmem:[%s5286_s28 + $0x150] sm:$0xff] }
  0x5d   : > { %1077 = vst [vmem:[%s5291_s5 + $0xc0] sm:$0xff] %v1076_v24  ;;  %1079 = vst [vmem:[%s5291_s5 + $0xc8] sm:$0xff] %v1078_v25  ;;  %v1082_v27 = vld [vmem:[%s5286_s28 + $0x158] sm:$0xff]  ;;  %v1084_v28 = vld [vmem:[%s5286_s28 + $0x160] sm:$0xff] }
  0x5e   : > { %1081 = vst [vmem:[%s5291_s5 + $0xd0] sm:$0xff] %v1080_v26  ;;  %v1086_v29 = vld [vmem:[%s5286_s28 + $0x168] sm:$0xff]  ;;  %1083 = vst [vmem:[%s5291_s5 + $0xd8] sm:$0xff] %v1082_v27  ;;  %v1088_v30 = vld [vmem:[%s5286_s28 + $0x170] sm:$0xff] }
  0x5f   : > { %1085 = vst [vmem:[%s5291_s5 + $0xe0] sm:$0xff] %v1084_v28  ;;  %1087 = vst [vmem:[%s5291_s5 + $0xe8] sm:$0xff] %v1086_v29  ;;  %v1090_v31 = vld [vmem:[%s5286_s28 + $0x178] sm:$0xff]  ;;  %v1092_v32 = vld [vmem:[%s5286_s28 + $0x200] sm:$0xff] }
  0x60   : > { %1089 = vst [vmem:[%s5291_s5 + $0xf0] sm:$0xff] %v1088_v30  ;;  %1091 = vst [vmem:[%s5291_s5 + $0xf8] sm:$0xff] %v1090_v31  ;;  %v1094_v33 = vld [vmem:[%s5286_s28 + $0x208] sm:$0xff]  ;;  %v1096_v34 = vld [vmem:[%s5286_s28 + $0x210] sm:$0xff] }
  0x61   : > { %1093 = vst [vmem:[%s5291_s5 + $0x100] sm:$0xff] %v1092_v32  ;;  %v1098_v35 = vld [vmem:[%s5286_s28 + $0x218] sm:$0xff]  ;;  %1095 = vst [vmem:[%s5291_s5 + $0x108] sm:$0xff] %v1094_v33  ;;  %v1100_v36 = vld [vmem:[%s5286_s28 + $0x220] sm:$0xff] }
  0x62   : > { %1097 = vst [vmem:[%s5291_s5 + $0x110] sm:$0xff] %v1096_v34  ;;  %1099 = vst [vmem:[%s5291_s5 + $0x118] sm:$0xff] %v1098_v35  ;;  %v1102_v37 = vld [vmem:[%s5286_s28 + $0x228] sm:$0xff]  ;;  %v1104_v38 = vld [vmem:[%s5286_s28 + $0x230] sm:$0xff] }
  0x63   : > { %1101 = vst [vmem:[%s5291_s5 + $0x120] sm:$0xff] %v1100_v36  ;;  %1103 = vst [vmem:[%s5291_s5 + $0x128] sm:$0xff] %v1102_v37  ;;  %v1106_v39 = vld [vmem:[%s5286_s28 + $0x238] sm:$0xff]  ;;  %v1108_v40 = vld [vmem:[%s5286_s28 + $0x240] sm:$0xff] }
  0x64   : > { %1105 = vst [vmem:[%s5291_s5 + $0x130] sm:$0xff] %v1104_v38  ;;  %v1110_v41 = vld [vmem:[%s5286_s28 + $0x248] sm:$0xff]  ;;  %1107 = vst [vmem:[%s5291_s5 + $0x138] sm:$0xff] %v1106_v39  ;;  %v1112_v42 = vld [vmem:[%s5286_s28 + $0x250] sm:$0xff] }
  0x65   : > { %1109 = vst [vmem:[%s5291_s5 + $0x140] sm:$0xff] %v1108_v40  ;;  %1111 = vst [vmem:[%s5291_s5 + $0x148] sm:$0xff] %v1110_v41  ;;  %v1114_v43 = vld [vmem:[%s5286_s28 + $0x258] sm:$0xff]  ;;  %v1116_v44 = vld [vmem:[%s5286_s28 + $0x260] sm:$0xff] }
  0x66   : > { %1113 = vst [vmem:[%s5291_s5 + $0x150] sm:$0xff] %v1112_v42  ;;  %1115 = vst [vmem:[%s5291_s5 + $0x158] sm:$0xff] %v1114_v43  ;;  %v1118_v45 = vld [vmem:[%s5286_s28 + $0x268] sm:$0xff]  ;;  %v1120_v46 = vld [vmem:[%s5286_s28 + $0x270] sm:$0xff] }
  0x67   : > { %1117 = vst [vmem:[%s5291_s5 + $0x160] sm:$0xff] %v1116_v44  ;;  %v1122_v47 = vld [vmem:[%s5286_s28 + $0x278] sm:$0xff]  ;;  %1119 = vst [vmem:[%s5291_s5 + $0x168] sm:$0xff] %v1118_v45  ;;  %v1124_v48 = vld [vmem:[%s5286_s28 + $0x300] sm:$0xff] }
  0x68   : > { %1121 = vst [vmem:[%s5291_s5 + $0x170] sm:$0xff] %v1120_v46  ;;  %1123 = vst [vmem:[%s5291_s5 + $0x178] sm:$0xff] %v1122_v47  ;;  %v1126_v49 = vld [vmem:[%s5286_s28 + $0x308] sm:$0xff]  ;;  %v1128_v50 = vld [vmem:[%s5286_s28 + $0x310] sm:$0xff] }
  0x69   : > { %1125 = vst [vmem:[%s5291_s5 + $0x180] sm:$0xff] %v1124_v48  ;;  %1127 = vst [vmem:[%s5291_s5 + $0x188] sm:$0xff] %v1126_v49  ;;  %v1130_v51 = vld [vmem:[%s5286_s28 + $0x318] sm:$0xff]  ;;  %v1132_v52 = vld [vmem:[%s5286_s28 + $0x320] sm:$0xff] }
  0x6a   : > { %1129 = vst [vmem:[%s5291_s5 + $0x190] sm:$0xff] %v1128_v50  ;;  %v1134_v53 = vld [vmem:[%s5286_s28 + $0x328] sm:$0xff]  ;;  %1131 = vst [vmem:[%s5291_s5 + $0x198] sm:$0xff] %v1130_v51  ;;  %v1136_v54 = vld [vmem:[%s5286_s28 + $0x330] sm:$0xff] }
  0x6b   : > { %1133 = vst [vmem:[%s5291_s5 + $0x1a0] sm:$0xff] %v1132_v52  ;;  %1135 = vst [vmem:[%s5291_s5 + $0x1a8] sm:$0xff] %v1134_v53  ;;  %v1138_v55 = vld [vmem:[%s5286_s28 + $0x338] sm:$0xff]  ;;  %v1140_v56 = vld [vmem:[%s5286_s28 + $0x340] sm:$0xff] }
  0x6c   : > { %1137 = vst [vmem:[%s5291_s5 + $0x1b0] sm:$0xff] %v1136_v54  ;;  %1139 = vst [vmem:[%s5291_s5 + $0x1b8] sm:$0xff] %v1138_v55  ;;  %v1142_v57 = vld [vmem:[%s5286_s28 + $0x348] sm:$0xff]  ;;  %v1144_v58 = vld [vmem:[%s5286_s28 + $0x350] sm:$0xff] }
  0x6d   : > { %1141 = vst [vmem:[%s5291_s5 + $0x1c0] sm:$0xff] %v1140_v56  ;;  %v1146_v59 = vld [vmem:[%s5286_s28 + $0x358] sm:$0xff]  ;;  %1143 = vst [vmem:[%s5291_s5 + $0x1c8] sm:$0xff] %v1142_v57  ;;  %v1148_v60 = vld [vmem:[%s5286_s28 + $0x360] sm:$0xff] }
  0x6e   : > { %1145 = vst [vmem:[%s5291_s5 + $0x1d0] sm:$0xff] %v1144_v58  ;;  %1147 = vst [vmem:[%s5291_s5 + $0x1d8] sm:$0xff] %v1146_v59  ;;  %v1150_v61 = vld [vmem:[%s5286_s28 + $0x368] sm:$0xff]  ;;  %v1152_v62 = vld [vmem:[%s5286_s28 + $0x370] sm:$0xff] }
  0x6f   : > { %1149 = vst [vmem:[%s5291_s5 + $0x1e0] sm:$0xff] %v1148_v60  ;;  %1151 = vst [vmem:[%s5291_s5 + $0x1e8] sm:$0xff] %v1150_v61  ;;  %v1154_v63 = vld [vmem:[%s5286_s28 + $0x378] sm:$0xff]  ;;  %v1156_v0 = vld [vmem:[%s5286_s28 + $0x400] sm:$0xff] }
  0x70   : > { %1153 = vst [vmem:[%s5291_s5 + $0x1f0] sm:$0xff] %v1152_v62  ;;  %v1158_v1 = vld [vmem:[%s5286_s28 + $0x408] sm:$0xff]  ;;  %1155 = vst [vmem:[%s5291_s5 + $0x1f8] sm:$0xff] %v1154_v63  ;;  %v1160_v2 = vld [vmem:[%s5286_s28 + $0x410] sm:$0xff] }
  0x71   : > { %1157 = vst [vmem:[%s5291_s5 + $0x200] sm:$0xff] %v1156_v0  ;;  %1159 = vst [vmem:[%s5291_s5 + $0x208] sm:$0xff] %v1158_v1  ;;  %v1162_v3 = vld [vmem:[%s5286_s28 + $0x418] sm:$0xff]  ;;  %v1164_v4 = vld [vmem:[%s5286_s28 + $0x420] sm:$0xff] }
  0x72   : > { %1161 = vst [vmem:[%s5291_s5 + $0x210] sm:$0xff] %v1160_v2  ;;  %1163 = vst [vmem:[%s5291_s5 + $0x218] sm:$0xff] %v1162_v3  ;;  %v1166_v5 = vld [vmem:[%s5286_s28 + $0x428] sm:$0xff]  ;;  %v1168_v6 = vld [vmem:[%s5286_s28 + $0x430] sm:$0xff] }
  0x73   : > { %1165 = vst [vmem:[%s5291_s5 + $0x220] sm:$0xff] %v1164_v4  ;;  %v1170_v7 = vld [vmem:[%s5286_s28 + $0x438] sm:$0xff]  ;;  %1167 = vst [vmem:[%s5291_s5 + $0x228] sm:$0xff] %v1166_v5  ;;  %v1172_v8 = vld [vmem:[%s5286_s28 + $0x440] sm:$0xff] }
  0x74   : > { %1169 = vst [vmem:[%s5291_s5 + $0x230] sm:$0xff] %v1168_v6  ;;  %1171 = vst [vmem:[%s5291_s5 + $0x238] sm:$0xff] %v1170_v7  ;;  %v1174_v9 = vld [vmem:[%s5286_s28 + $0x448] sm:$0xff]  ;;  %v1176_v10 = vld [vmem:[%s5286_s28 + $0x450] sm:$0xff] }
  0x75   : > { %1173 = vst [vmem:[%s5291_s5 + $0x240] sm:$0xff] %v1172_v8  ;;  %1175 = vst [vmem:[%s5291_s5 + $0x248] sm:$0xff] %v1174_v9  ;;  %v1178_v11 = vld [vmem:[%s5286_s28 + $0x458] sm:$0xff]  ;;  %v1180_v12 = vld [vmem:[%s5286_s28 + $0x460] sm:$0xff] }
  0x76   : > { %1177 = vst [vmem:[%s5291_s5 + $0x250] sm:$0xff] %v1176_v10  ;;  %v1182_v13 = vld [vmem:[%s5286_s28 + $0x468] sm:$0xff]  ;;  %1179 = vst [vmem:[%s5291_s5 + $0x258] sm:$0xff] %v1178_v11  ;;  %v1184_v14 = vld [vmem:[%s5286_s28 + $0x470] sm:$0xff] }
  0x77   : > { %1181 = vst [vmem:[%s5291_s5 + $0x260] sm:$0xff] %v1180_v12  ;;  %1183 = vst [vmem:[%s5291_s5 + $0x268] sm:$0xff] %v1182_v13  ;;  %v1186_v15 = vld [vmem:[%s5286_s28 + $0x478] sm:$0xff]  ;;  %v1188_v16 = vld [vmem:[%s5286_s28 + $0x500] sm:$0xff] }
  0x78   : > { %1185 = vst [vmem:[%s5291_s5 + $0x270] sm:$0xff] %v1184_v14  ;;  %1187 = vst [vmem:[%s5291_s5 + $0x278] sm:$0xff] %v1186_v15  ;;  %v1190_v17 = vld [vmem:[%s5286_s28 + $0x508] sm:$0xff]  ;;  %v1192_v18 = vld [vmem:[%s5286_s28 + $0x510] sm:$0xff] }
  0x79   : > { %1189 = vst [vmem:[%s5291_s5 + $0x280] sm:$0xff] %v1188_v16  ;;  %v1194_v19 = vld [vmem:[%s5286_s28 + $0x518] sm:$0xff]  ;;  %1191 = vst [vmem:[%s5291_s5 + $0x288] sm:$0xff] %v1190_v17  ;;  %v1196_v20 = vld [vmem:[%s5286_s28 + $0x520] sm:$0xff] }
  0x7a   : > { %1193 = vst [vmem:[%s5291_s5 + $0x290] sm:$0xff] %v1192_v18  ;;  %1195 = vst [vmem:[%s5291_s5 + $0x298] sm:$0xff] %v1194_v19  ;;  %v1198_v21 = vld [vmem:[%s5286_s28 + $0x528] sm:$0xff]  ;;  %v1200_v22 = vld [vmem:[%s5286_s28 + $0x530] sm:$0xff] }
  0x7b   : > { %1197 = vst [vmem:[%s5291_s5 + $0x2a0] sm:$0xff] %v1196_v20  ;;  %1199 = vst [vmem:[%s5291_s5 + $0x2a8] sm:$0xff] %v1198_v21  ;;  %v1202_v23 = vld [vmem:[%s5286_s28 + $0x538] sm:$0xff]  ;;  %v1204_v24 = vld [vmem:[%s5286_s28 + $0x540] sm:$0xff] }
  0x7c   : > { %1201 = vst [vmem:[%s5291_s5 + $0x2b0] sm:$0xff] %v1200_v22  ;;  %v1206_v25 = vld [vmem:[%s5286_s28 + $0x548] sm:$0xff]  ;;  %1203 = vst [vmem:[%s5291_s5 + $0x2b8] sm:$0xff] %v1202_v23  ;;  %v1208_v26 = vld [vmem:[%s5286_s28 + $0x550] sm:$0xff] }
  0x7d   : > { %1205 = vst [vmem:[%s5291_s5 + $0x2c0] sm:$0xff] %v1204_v24  ;;  %1207 = vst [vmem:[%s5291_s5 + $0x2c8] sm:$0xff] %v1206_v25  ;;  %v1210_v27 = vld [vmem:[%s5286_s28 + $0x558] sm:$0xff]  ;;  %v1212_v28 = vld [vmem:[%s5286_s28 + $0x560] sm:$0xff] }
  0x7e   : > { %1209 = vst [vmem:[%s5291_s5 + $0x2d0] sm:$0xff] %v1208_v26  ;;  %1211 = vst [vmem:[%s5291_s5 + $0x2d8] sm:$0xff] %v1210_v27  ;;  %v1214_v29 = vld [vmem:[%s5286_s28 + $0x568] sm:$0xff]  ;;  %v1216_v30 = vld [vmem:[%s5286_s28 + $0x570] sm:$0xff] }
  0x7f   : > { %1213 = vst [vmem:[%s5291_s5 + $0x2e0] sm:$0xff] %v1212_v28  ;;  %v1218_v31 = vld [vmem:[%s5286_s28 + $0x578] sm:$0xff]  ;;  %1215 = vst [vmem:[%s5291_s5 + $0x2e8] sm:$0xff] %v1214_v29  ;;  %v1220_v32 = vld [vmem:[%s5286_s28 + $0x600] sm:$0xff] }
  0x80   : > { %1217 = vst [vmem:[%s5291_s5 + $0x2f0] sm:$0xff] %v1216_v30  ;;  %1219 = vst [vmem:[%s5291_s5 + $0x2f8] sm:$0xff] %v1218_v31  ;;  %v1222_v33 = vld [vmem:[%s5286_s28 + $0x608] sm:$0xff]  ;;  %v1224_v34 = vld [vmem:[%s5286_s28 + $0x610] sm:$0xff] }
  0x81   : > { %1221 = vst [vmem:[%s5291_s5 + $0x300] sm:$0xff] %v1220_v32  ;;  %1223 = vst [vmem:[%s5291_s5 + $0x308] sm:$0xff] %v1222_v33  ;;  %v1226_v35 = vld [vmem:[%s5286_s28 + $0x618] sm:$0xff]  ;;  %v1228_v36 = vld [vmem:[%s5286_s28 + $0x620] sm:$0xff] }
  0x82   : > { %1225 = vst [vmem:[%s5291_s5 + $0x310] sm:$0xff] %v1224_v34  ;;  %v1230_v37 = vld [vmem:[%s5286_s28 + $0x628] sm:$0xff]  ;;  %1227 = vst [vmem:[%s5291_s5 + $0x318] sm:$0xff] %v1226_v35  ;;  %v1232_v38 = vld [vmem:[%s5286_s28 + $0x630] sm:$0xff] }
  0x83   : > { %1229 = vst [vmem:[%s5291_s5 + $0x320] sm:$0xff] %v1228_v36  ;;  %1231 = vst [vmem:[%s5291_s5 + $0x328] sm:$0xff] %v1230_v37  ;;  %v1234_v39 = vld [vmem:[%s5286_s28 + $0x638] sm:$0xff]  ;;  %v1236_v40 = vld [vmem:[%s5286_s28 + $0x640] sm:$0xff] }
  0x84   : > { %1233 = vst [vmem:[%s5291_s5 + $0x330] sm:$0xff] %v1232_v38  ;;  %1235 = vst [vmem:[%s5291_s5 + $0x338] sm:$0xff] %v1234_v39  ;;  %v1238_v41 = vld [vmem:[%s5286_s28 + $0x648] sm:$0xff]  ;;  %v1240_v42 = vld [vmem:[%s5286_s28 + $0x650] sm:$0xff] }
  0x85   : > { %1237 = vst [vmem:[%s5291_s5 + $0x340] sm:$0xff] %v1236_v40  ;;  %v1242_v43 = vld [vmem:[%s5286_s28 + $0x658] sm:$0xff]  ;;  %1239 = vst [vmem:[%s5291_s5 + $0x348] sm:$0xff] %v1238_v41  ;;  %v1244_v44 = vld [vmem:[%s5286_s28 + $0x660] sm:$0xff] }
  0x86   : > { %1241 = vst [vmem:[%s5291_s5 + $0x350] sm:$0xff] %v1240_v42  ;;  %1243 = vst [vmem:[%s5291_s5 + $0x358] sm:$0xff] %v1242_v43  ;;  %v1246_v45 = vld [vmem:[%s5286_s28 + $0x668] sm:$0xff]  ;;  %v1248_v46 = vld [vmem:[%s5286_s28 + $0x670] sm:$0xff] }
  0x87   : > { %1245 = vst [vmem:[%s5291_s5 + $0x360] sm:$0xff] %v1244_v44  ;;  %1247 = vst [vmem:[%s5291_s5 + $0x368] sm:$0xff] %v1246_v45  ;;  %v1250_v47 = vld [vmem:[%s5286_s28 + $0x678] sm:$0xff]  ;;  %v1252_v48 = vld [vmem:[%s5286_s28 + $0x700] sm:$0xff] }
  0x88   : > { %1249 = vst [vmem:[%s5291_s5 + $0x370] sm:$0xff] %v1248_v46  ;;  %v1254_v49 = vld [vmem:[%s5286_s28 + $0x708] sm:$0xff]  ;;  %1251 = vst [vmem:[%s5291_s5 + $0x378] sm:$0xff] %v1250_v47  ;;  %v1256_v50 = vld [vmem:[%s5286_s28 + $0x710] sm:$0xff] }
  0x89   : > { %1253 = vst [vmem:[%s5291_s5 + $0x380] sm:$0xff] %v1252_v48  ;;  %1255 = vst [vmem:[%s5291_s5 + $0x388] sm:$0xff] %v1254_v49  ;;  %v1258_v51 = vld [vmem:[%s5286_s28 + $0x718] sm:$0xff]  ;;  %v1260_v52 = vld [vmem:[%s5286_s28 + $0x720] sm:$0xff] }
  0x8a   : > { %1257 = vst [vmem:[%s5291_s5 + $0x390] sm:$0xff] %v1256_v50  ;;  %1259 = vst [vmem:[%s5291_s5 + $0x398] sm:$0xff] %v1258_v51  ;;  %v1262_v53 = vld [vmem:[%s5286_s28 + $0x728] sm:$0xff]  ;;  %v1264_v54 = vld [vmem:[%s5286_s28 + $0x730] sm:$0xff] }
  0x8b   : > { %1261 = vst [vmem:[%s5291_s5 + $0x3a0] sm:$0xff] %v1260_v52  ;;  %v1266_v55 = vld [vmem:[%s5286_s28 + $0x738] sm:$0xff]  ;;  %1263 = vst [vmem:[%s5291_s5 + $0x3a8] sm:$0xff] %v1262_v53  ;;  %v1268_v56 = vld [vmem:[%s5286_s28 + $0x740] sm:$0xff] }
  0x8c   : > { %1265 = vst [vmem:[%s5291_s5 + $0x3b0] sm:$0xff] %v1264_v54  ;;  %1267 = vst [vmem:[%s5291_s5 + $0x3b8] sm:$0xff] %v1266_v55  ;;  %v1270_v57 = vld [vmem:[%s5286_s28 + $0x748] sm:$0xff]  ;;  %v1272_v58 = vld [vmem:[%s5286_s28 + $0x750] sm:$0xff] }
  0x8d   : > { %1269 = vst [vmem:[%s5291_s5 + $0x3c0] sm:$0xff] %v1268_v56  ;;  %1271 = vst [vmem:[%s5291_s5 + $0x3c8] sm:$0xff] %v1270_v57  ;;  %v1274_v59 = vld [vmem:[%s5286_s28 + $0x758] sm:$0xff]  ;;  %v1276_v60 = vld [vmem:[%s5286_s28 + $0x760] sm:$0xff] }
  0x8e   : > { %1273 = vst [vmem:[%s5291_s5 + $0x3d0] sm:$0xff] %v1272_v58  ;;  %v1278_v61 = vld [vmem:[%s5286_s28 + $0x768] sm:$0xff]  ;;  %1275 = vst [vmem:[%s5291_s5 + $0x3d8] sm:$0xff] %v1274_v59  ;;  %v1280_v62 = vld [vmem:[%s5286_s28 + $0x770] sm:$0xff] }
  0x8f   : > { %1277 = vst [vmem:[%s5291_s5 + $0x3e0] sm:$0xff] %v1276_v60  ;;  %1279 = vst [vmem:[%s5291_s5 + $0x3e8] sm:$0xff] %v1278_v61  ;;  %v1282_v63 = vld [vmem:[%s5286_s28 + $0x778] sm:$0xff] }
  0x90   : > { %1281 = vst [vmem:[%s5291_s5 + $0x3f0] sm:$0xff] %v1280_v62  ;;  %1283 = vst [vmem:[%s5291_s5 + $0x3f8] sm:$0xff] %v1282_v63 }
  0x91 PF: > { %p4161_p0 = scmp.ge.s32.totalorder %s5016_s24, 1  ;;  %p1288_p1 = scmp.lt.s32.totalorder %s5016_s24, 5 }
  0x93   : > { %p1289_p2 = pnand %p4161_p0, %p1288_p1 }
  0x95   : > { %1292 = sbr.rel (%p1289_p2) target bundleno = 948 (0x3b4), region = 107 }
  0x9c   : > { %s1295_s0 = sand.u32 1, %s4992_s18   ;;  %s1328_s29 = sand.u32 1, %s4984_s16  }
  0x9d   : > { %s4162_s13 = sshll.u32 %s1295_s0, 9  ;;  %s4163_s14 = sshll.u32 %s1295_s0, 10 }
  0x9e   : > { %s5552_s25 = sshll.u32 %s1328_s29, 3  ;;  %s5554_s28 = scalar_lea.vmem [#allocation4], %s4162_s13 }
  0x9f   : > { %s5556_s26 = scalar_lea.vmem [#allocation5], %s4163_s14  ;;  %s1330_s30 = scalar_lea.vmem [#allocation6], %s5552_s25 }
  0xa0   : > { %p4165_p3 = scmp.ne.s32.totalorder %s5000_s20, 0 }
  0xa1   : > { %vm1341_vm0 = vcmask (!%p4165_p3), 7168   ;;  %v5018_v0 = vmov (!%p4165_p3), 0.0  }
  0xa2   : > { %1339 = sbr.rel (%p4165_p3) target bundleno = 169 (0xa9), region = 119  ;;  %1340 = vst [vmem:[#allocation2] sm:$0xff] (!%p4165_p3), %v5018_v0  ;;  %1342 = vst.msk [vmem:[#allocation3] sm:$0xff] (!%p4165_p3), %vm1341_vm0, %v5018_v0 }
  0xa9 PF: > { %v2601_v1 = vld [vmem:[%s5556_s26 + $0x10] sm:$0xff]  ;;  %vm3690_vm1 = vcmask 7168   ;;  %v2599_v2 = vld [vmem:[%s5556_s26] sm:$0xff]  ;;  %v5019_v3 = vmov 0   ;;  %v2600_v6 = vld [vmem:[%s5556_s26 + $0x8] sm:$0xff]  ;;  %vm3672_vm2 = vcmask 1041409  }
  0xaa   : > { %4569 = vset.pattern.permute.xlu1 %v5019_v3  ;;  %4568 = vset.pattern.permute.xlu0 %v5019_v3  ;;  %v3691_v4 = vsel %vm3690_vm1, %v2599_v2, 0.0  ;;  %v4570_v5 = vld [vmem:[%s6808_s2] sm:$0xff]   ;;  %v3694_v7 = vsel %vm3690_vm1, %v2601_v1, 0.0  ;;  %v2602_v8 = vld [vmem:[%s5556_s26 + $0x18] sm:$0xff]  ;;  %v3692_v9 = vsel %vm3690_vm1, %v2600_v6, 0.0  ;;  %v4572_v13 = vld [vmem:[%s6808_s2 + $0x10] sm:$0xff]  }
  0xab   : > { %2740 = vperm.xlu1 %4569, %v2601_v1   ;;  %2730 = vperm.xlu0 %4568, %v2599_v2   ;;  %v4571_v10 = vld [vmem:[%s6808_s2 + $0x8] sm:$0xff]   ;;  %v3693_v11 = vadd.f32 %v3692_v9, %v3691_v4  ;;  %v3696_v12 = vsel %vm3690_vm1, %v2602_v8, 0.0  ;;  %v2603_v15 = vld [vmem:[%s5556_s26 + $0x20] sm:$0xff]  ;;  %v2604_v16 = vld [vmem:[%s5556_s26 + $0x28] sm:$0xff]  ;;  %vm3674_vm3 = vcmask 1042434   ;;  %vm3676_vm4 = vcmask 1043459  }
  0xac   : > { %4318 = vmatprep.subr.bf16.mxu0 %v4570_v5  ;;  %4462 = vmatprep.subr.bf16.mxu1 %v4570_v5  ;;  %v3698_v17 = vsel %vm3690_vm1, %v2603_v15, 0.0  ;;  %v3700_v19 = vsel %vm3690_vm1, %v2604_v16, 0.0  ;;  %v4573_v20 = vld [vmem:[%s6808_s2 + $0x18] sm:$0xff]   ;;  %v2605_v22 = vld [vmem:[%s5556_s26 + $0x30] sm:$0xff]  ;;  %v2606_v23 = vld [vmem:[%s5556_s26 + $0x38] sm:$0xff]  ;;  %vm3678_vm5 = vcmask 1044484  }
  0xad   : > { %4319 = vmatpush3.bf16.msra.mxu0 %v4570_v5  ;;  %4470 = vmatpush3.bf16.msra.mxu1 %v4570_v5  ;;  %v3695_v14 = vadd.f32 %v3694_v7, %v3693_v11  ;;  %v3702_v24 = vsel %vm3690_vm1, %v2605_v22, 0.0  ;;  %v3704_v26 = vsel %vm3690_vm1, %v2606_v23, 0.0  ;;  %v2608_v27 = vld [vmem:[%s5556_s26 + $0x48] sm:$0xff]  ;;  %v4574_v28 = vld [vmem:[%s6808_s2 + $0x20] sm:$0xff]   ;;  %v2607_v30 = vld [vmem:[%s5556_s26 + $0x40] sm:$0xff]  ;;  %vm3680_vm6 = vcmask 1045509  }
  0xae   : > { %4320 = vmatprep.subr.bf16.mxu0 %v4571_v10  ;;  %4463 = vmatprep.subr.bf16.mxu1 %v4571_v10  ;;  %v3706_v31 = vsel %vm3690_vm1, %v2607_v30, 0.0  ;;  %v4575_v32 = vld [vmem:[%s6808_s2 + $0x28] sm:$0xff]   ;;  %v5598_v33 = vld [vmem:[%s5556_s26 + $0x88] sm:$0xff]  ;;  %v5601_v34 = vld [vmem:[%s5556_s26 + $0x80] sm:$0xff]  ;;  %v3708_v38 = vsel %vm3690_vm1, %v2608_v27, 0.0  ;;  %vm3682_vm7 = vcmask 1046534  }
  0xaf   : > { %2745 = vperm.xlu1 %4569, %v2602_v8   ;;  %2735 = vperm.xlu0 %4568, %v2600_v6   ;;  %v3697_v18 = vadd.f32 %v3696_v12, %v3695_v14  ;;  %v3729_v36 = vsel %vm3690_vm1, %v5598_v33, 0.0  ;;  %v3728_v37 = vsel %vm3690_vm1, %v5601_v34, 0.0  ;;  %v2610_v39 = vld [vmem:[%s5556_s26 + $0x58] sm:$0xff]  ;;  %v4578_v41 = vld [vmem:[%s5554_s28] sm:$0xff]   ;;  %v2609_v43 = vld [vmem:[%s5556_s26 + $0x50] sm:$0xff]  ;;  %vm3684_vm8 = vcmask 1047559  }
  0xb0   : > { %v3730_v40 = vadd.f32 %v3729_v36, %v3728_v37  ;;  %v3710_v44 = vsel %vm3690_vm1, %v2609_v43, 0.0  ;;  %4334 = vmatprep.mubr.bf16.mxu0 %v4578_v41  ;;  %v4579_v45 = vld [vmem:[%s5554_s28 + $0x100] sm:$0xff]   ;;  %v3712_v46 = vsel %vm3690_vm1, %v2610_v39, 0.0  ;;  %v5616_v49 = vld [vmem:[%s5556_s26 + $0x98] sm:$0xff]  ;;  %v5619_v50 = vld [vmem:[%s5556_s26 + $0x90] sm:$0xff]  ;;  %p4239_p4 = scmp.ne.s32.totalorder %s5000_s20, 1 }
  0xb1   : > { %4321 = vmatpush3.bf16.msra.mxu0 %v4571_v10  ;;  %4471 = vmatpush3.bf16.msra.mxu1 %v4571_v10  ;;  %v3699_v21 = vadd.f32 %v3698_v17, %v3697_v18  ;;  %v2611_v48 = vld [vmem:[%s5556_s26 + $0x60] sm:$0xff]  ;;  %v3733_v52 = vsel %vm3690_vm1, %v5616_v49, 0.0  ;;  %v3731_v53 = vsel %vm3690_vm1, %v5619_v50, 0.0  ;;  %v2612_v56 = vld [vmem:[%s5556_s26 + $0x68] sm:$0xff]  ;;  %v2613_v3 = vld [vmem:[%s5556_s26 + $0x70] sm:$0xff] }
  0xb2   : > { %4322 = vmatprep.subr.bf16.mxu0 %v4572_v13  ;;  %4464 = vmatprep.subr.bf16.mxu1 %v4572_v13  ;;  %v4576_v51 = vld [vmem:[%s6808_s2 + $0x30] sm:$0xff]   ;;  %v3714_v57 = vsel %vm3690_vm1, %v2611_v48, 0.0  ;;  %v3732_v58 = vadd.f32 %v3731_v53, %v3730_v40  ;;  %v5636_v61 = vld [vmem:[%s5556_s26 + $0xa8] sm:$0xff]  ;;  %v3716_v63 = vsel %vm3690_vm1, %v2612_v56, 0.0  ;;  %v5646_v5 = vld [vmem:[%s5556_s26 + $0xb0] sm:$0xff]  ;;  %v3718_v7 = vsel %vm3690_vm1, %v2613_v3, 0.0 }
  0xb3   : > { %2755 = vperm.xlu1 %4569, %v2604_v16   ;;  %2750 = vperm.xlu0 %4568, %v2603_v15   ;;  %v3701_v25 = vadd.f32 %v3700_v19, %v3699_v21  ;;  %v5629_v54 = vld [vmem:[%s5556_s26 + $0xa0] sm:$0xff]  ;;  %v4577_v0 = vld [vmem:[%s6808_s2 + $0x38] sm:$0xff]   ;;  %v3737_v1 = vsel %vm3690_vm1, %v5636_v61, 0.0  ;;  %v2614_v6 = vld [vmem:[%s5556_s26 + $0x78] sm:$0xff]  ;;  %v3739_v9 = vsel %vm3690_vm1, %v5646_v5, 0.0 }
  0xb4   : > { %v3735_v59 = vsel %vm3690_vm1, %v5629_v54, 0.0  ;;  %4398 = vmatprep.mubr.bf16.mxu1 %v4579_v45  ;;  %v3734_v62 = vadd.f32 %v3733_v52, %v3732_v58  ;;  %v5651_v8 = vld [vmem:[%s5556_s26 + $0xb8] sm:$0xff]  ;;  %v3720_v12 = vsel %vm3690_vm1, %v2614_v6, 0.0  ;;  %v5659_v16 = vld [vmem:[%s5556_s26 + $0xc0] sm:$0xff]  ;;  %v4580_v17 = vld [vmem:[%s5554_s28 + $0x8] sm:$0xff]  }
  0xb5   : > { %4323 = vmatpush3.bf16.msra.mxu0 %v4572_v13  ;;  %4472 = vmatpush3.bf16.msra.mxu1 %v4572_v13  ;;  %v3703_v29 = vadd.f32 %v3702_v24, %v3701_v25  ;;  %v3741_v13 = vsel %vm3690_vm1, %v5651_v8, 0.0  ;;  %v4581_v18 = vld [vmem:[%s5554_s28 + $0x108] sm:$0xff]   ;;  %v4582_v19 = vld [vmem:[%s5554_s28 + $0x10] sm:$0xff]   ;;  %v4586_v36 = vld [vmem:[%s5554_s28 + $0x20] sm:$0xff]  }
  0xb6   : > { %4324 = vmatprep.subr.bf16.mxu0 %v4573_v20  ;;  %4465 = vmatprep.subr.bf16.mxu1 %v4573_v20  ;;  %v3736_v4 = vadd.f32 %v3735_v59, %v3734_v62  ;;  %v4587_v37 = vld [vmem:[%s5554_s28 + $0x120] sm:$0xff]   ;;  %v5719_v52 = vld [vmem:[%s5556_s26 + $0x110] sm:$0xff]  ;;  %v5722_v53 = vld [vmem:[%s5556_s26 + $0xf8] sm:$0xff] }
  0xb7   : > { %2765 = vperm.xlu1 %4569, %v2606_v23   ;;  %2760 = vperm.xlu0 %4568, %v2605_v22   ;;  %v3705_v35 = vadd.f32 %v3704_v26, %v3703_v29  ;;  %v4583_v22 = vld [vmem:[%s5554_s28 + $0x110] sm:$0xff]   ;;  %v5668_v23 = vld [vmem:[%s5556_s26 + $0xc8] sm:$0xff]  ;;  %v5680_v29 = vld [vmem:[%s5556_s26 + $0xd8] sm:$0xff] }
  0xb8   : > { %v3738_v11 = vadd.f32 %v3737_v1, %v3736_v4  ;;  %v3745_v25 = vsel %vm3690_vm1, %v5668_v23, 0.0  ;;  %v5673_v26 = vld [vmem:[%s5556_s26 + $0xd0] sm:$0xff]  ;;  %v5697_v40 = vld [vmem:[%s5556_s26 + $0xe0] sm:$0xff] }
  0xb9   : > { %4325 = vmatpush3.bf16.msra.mxu0 %v4573_v20  ;;  %4473 = vmatpush3.bf16.msra.mxu1 %v4573_v20  ;;  %v3707_v42 = vadd.f32 %v3706_v31, %v3705_v35  ;;  %v3743_v20 = vsel %vm3690_vm1, %v5659_v16, 0.0  ;;  %v4584_v31 = vld [vmem:[%s5554_s28 + $0x18] sm:$0xff]   ;;  %v5731_v59 = vld [vmem:[%s5556_s26 + $0x120] sm:$0xff] }
  0xba   : > { %4326 = vmatprep.subr.bf16.mxu0 %v4574_v28  ;;  %4466 = vmatprep.subr.bf16.mxu1 %v4574_v28  ;;  %v3740_v15 = vadd.f32 %v3739_v9, %v3738_v11  ;;  %v5749_v11 = vld [vmem:[%s5556_s26 + $0x130] sm:$0xff] }
  0xbb   : > { %2775 = vperm.xlu1 %4569, %v2608_v27   ;;  %2770 = vperm.xlu0 %4568, %v2607_v30   ;;  %v3709_v47 = vadd.f32 %v3708_v38, %v3707_v42  ;;  %v5702_v42 = vld [vmem:[%s5556_s26 + $0x100] sm:$0xff] }
  0xbc   : > { %v3742_v24 = vadd.f32 %v3741_v13, %v3740_v15 }
  0xbd   : > { %4327 = vmatpush3.bf16.msra.mxu0 %v4574_v28  ;;  %4474 = vmatpush3.bf16.msra.mxu1 %v4574_v28  ;;  %v3711_v55 = vadd.f32 %v3710_v44, %v3709_v47  ;;  %v3747_v28 = vsel %vm3690_vm1, %v5673_v26, 0.0  ;;  %v3765_v44 = vsel %vm3690_vm1, %v5702_v42, 0.0 }
  0xbe   : > { %4328 = vmatprep.subr.bf16.mxu0 %v4575_v32  ;;  %4467 = vmatprep.subr.bf16.mxu1 %v4575_v32  ;;  %v3744_v27 = vadd.f32 %v3743_v20, %v3742_v24  ;;  %v4592_v20 = vld [vmem:[%s5554_s28 + $0x38] sm:$0xff]   ;;  %v4594_v24 = vld [vmem:[%s5554_s28 + $0x40] sm:$0xff]  }
  0xbf   : > { %2785 = vperm.xlu1 %4569, %v2610_v39   ;;  %2780 = vperm.xlu0 %4568, %v2609_v43   ;;  %v3713_v60 = vadd.f32 %v3712_v46, %v3711_v55  ;;  %v5694_v39 = vld [vmem:[%s5556_s26 + $0xe8] sm:$0xff]  ;;  %v3751_v43 = vsel %vm3690_vm1, %v5697_v40, 0.0 }
  0xc0   : > { %v3746_v30 = vadd.f32 %v3745_v25, %v3744_v27  ;;  %v3753_v47 = vsel %vm3690_vm1, %v5694_v39, 0.0  ;;  %v5771_v25 = vld [vmem:[%s5556_s26 + $0x148] sm:$0xff] }
  0xc1   : > { %4329 = vmatpush3.bf16.msra.mxu0 %v4575_v32  ;;  %4475 = vmatpush3.bf16.msra.mxu1 %v4575_v32  ;;  %v3715_v2 = vadd.f32 %v3714_v57, %v3713_v60  ;;  %v4585_v32 = vld [vmem:[%s5554_s28 + $0x118] sm:$0xff]   ;;  %v3757_v60 = vsel %vm3690_vm1, %v5722_v53, 0.0 }
  0xc2   : > { %4330 = vmatprep.subr.bf16.mxu0 %v4576_v51  ;;  %4468 = vmatprep.subr.bf16.mxu1 %v4576_v51  ;;  %v3748_v38 = vadd.f32 %v3747_v28, %v3746_v30  ;;  %v4595_v28 = vld [vmem:[%s5554_s28 + $0x140] sm:$0xff]   ;;  %v3782_v30 = vsel %vm3690_vm1, %v5771_v25, 0.0 }
  0xc3   : > { %2795 = vperm.xlu1 %4569, %v2612_v56   ;;  %2790 = vperm.xlu0 %4568, %v2611_v48   ;;  %v3717_v10 = vadd.f32 %v3716_v63, %v3715_v2  ;;  %v4588_v2 = vld [vmem:[%s5554_s28 + $0x28] sm:$0xff]  }
  0xc5   : > { %4331 = vmatpush3.bf16.msra.mxu0 %v4576_v51  ;;  %4476 = vmatpush3.bf16.msra.mxu1 %v4576_v51  ;;  %v3719_v14 = vadd.f32 %v3718_v7, %v3717_v10  ;;  %v5716_v51 = vld [vmem:[%s5556_s26 + $0x118] sm:$0xff]  ;;  %v4591_v7 = vld [vmem:[%s5554_s28 + $0x130] sm:$0xff]  }
  0xc6   : > { %4332 = vmatprep.subr.bf16.mxu0 %v4577_v0  ;;  %4469 = vmatprep.subr.bf16.mxu1 %v4577_v0  ;;  %v3770_v56 = vsel %vm3690_vm1, %v5716_v51, 0.0 }
  0xc7   : > { %2805 = vperm.xlu1 %4569, %v2614_v6   ;;  %2800 = vperm.xlu0 %4568, %v2613_v3   ;;  %v3721_v21 = vadd.f32 %v3720_v12, %v3719_v14  ;;  %v4589_v3 = vld [vmem:[%s5554_s28 + $0x128] sm:$0xff]   ;;  %v4590_v6 = vld [vmem:[%s5554_s28 + $0x30] sm:$0xff]  }
  0xc9   : > { %4333 = vmatpush3.bf16.msra.mxu0 %v4577_v0  ;;  %4477 = vmatpush3.bf16.msra.mxu1 %v4577_v0  ;;  %v3722_v35 = vrot.slane %v3721_v21, 4  ;;  %v5740_v0 = vld [vmem:[%s5556_s26 + $0x128] sm:$0xff] }
  0xca   : > { %v3774_v4 = vsel %vm3690_vm1, %v5740_v0, 0.0 }
  0xcb   : > { %2815 = vperm.xlu1 %4569, %v5598_v33   ;;  %2810 = vperm.xlu0 %4568, %v5601_v34   ;;  %v3749_v33 = vsel %vm3690_vm1, %v5680_v29, 0.0  ;;  %v5687_v34 = vld [vmem:[%s5556_s26 + $0x108] sm:$0xff]  ;;  %v3723_v48 = vadd.f32 %v3722_v35, %v3721_v21 }
  0xcc   : > { %4335 = vmatmul.mubr.bf16.vlgmr.msra.gmra.mrb[0].mxu0 %v4580_v17  ;;  %4399 = vmatmul.mubr.bf16.vlgmr.msra.gmra.mrb[0].mxu1 %v4581_v18  ;;  %v3766_v41 = vsel %vm3690_vm1, %v5687_v34, 0.0  ;;  %v3750_v45 = vadd.f32 %v3749_v33, %v3748_v38  ;;  %v5777_v33 = vld [vmem:[%s5556_s26 + $0x150] sm:$0xff] }
  0xcd   : > { %4338 = vmatprep.mubr.bf16.mxu0 %v4582_v19  ;;  %4402 = vmatprep.mubr.bf16.mxu1 %v4583_v22  ;;  %v3767_v46 = vadd.f32 %v3766_v41, %v3765_v44  ;;  %v3724_v62 = vrot.slane %v3723_v48, 2  ;;  %v5761_v19 = vld [vmem:[%s5556_s26 + $0x140] sm:$0xff]  ;;  %v4593_v22 = vld [vmem:[%s5554_s28 + $0x138] sm:$0xff]   ;;  %v5794_v44 = vld [vmem:[%s5556_s26 + $0x188] sm:$0xff] }
  0xce   : > { %v5789_v41 = vld [vmem:[%s5556_s26 + $0x160] sm:$0xff] }
  0xcf   : > { %2825 = vperm.xlu1 %4569, %v5616_v49   ;;  %2820 = vperm.xlu0 %4568, %v5619_v50   ;;  %v3752_v49 = vadd.f32 %v3751_v43, %v3750_v45  ;;  %v5713_v50 = vld [vmem:[%s5556_s26 + $0xf0] sm:$0xff]  ;;  %v3725_v12 = vadd.f32 %v3724_v62, %v3723_v48  ;;  %v5797_v45 = vld [vmem:[%s5556_s26 + $0x180] sm:$0xff]  ;;  %v3803_v48 = vsel %vm3690_vm1, %v5794_v44, 0.0 }
  0xd0   : > { %v3755_v55 = vsel %vm3690_vm1, %v5713_v50, 0.0 }
  0xd1   : > { %v3754_v57 = vadd.f32 %v3753_v47, %v3752_v49  ;;  %v3726_v21 = vrot.slane %v3725_v12, 1  ;;  %v4597_v47 = vld [vmem:[%s5554_s28 + $0x148] sm:$0xff]   ;;  %v3802_v49 = vsel %vm3690_vm1, %v5797_v45, 0.0 }
  0xd3   : > { %2835 = vperm.xlu1 %4569, %v5636_v61   ;;  %2830 = vperm.xlu0 %4568, %v5629_v54   ;;  %v3768_v54 = vsel %vm3690_vm1, %v5719_v52, 0.0  ;;  %v3772_v61 = vsel %vm3690_vm1, %v5731_v59, 0.0  ;;  %v3756_v63 = vadd.f32 %v3755_v55, %v3754_v57  ;;  %v3804_v57 = vadd.f32 %v3803_v48, %v3802_v49  ;;  %v5889_v48 = vld [vmem:[%s5556_s26 + $0x1d8] sm:$0xff] }
  0xd4   : > { %4339 = vmatmul.mubr.bf16.gmra.mrb[4].mxu0 %v4584_v31  ;;  %4403 = vmatmul.mubr.bf16.gmra.mrb[4].mxu1 %v4585_v32  ;;  %v3769_v58 = vadd.f32 %v3768_v54, %v3767_v46  ;;  %v4596_v46 = vld [vmem:[%s5554_s28 + $0x48] sm:$0xff]   ;;  %v3823_v49 = vsel %vm3690_vm1, %v5889_v48, 0.0 }
  0xd5   : > { %4342 = vmatprep.mubr.bf16.mxu0 %v4586_v36  ;;  %4406 = vmatprep.mubr.bf16.mxu1 %v4587_v37  ;;  %v3758_v9 = vadd.f32 %v3757_v60, %v3756_v63  ;;  %v5784_v36 = vld [vmem:[%s5556_s26 + $0x158] sm:$0xff]  ;;  %v5818_v63 = vld [vmem:[%s5556_s26 + $0x170] sm:$0xff] }
  0xd6   : > { %v3771_v1 = vadd.f32 %v3770_v56, %v3769_v58  ;;  %v3786_v38 = vsel %vm3690_vm1, %v5784_v36, 0.0  ;;  %v5811_v56 = vld [vmem:[%s5556_s26 + $0x168] sm:$0xff]  ;;  %v4598_v58 = vld [vmem:[%s5554_s28 + $0x50] sm:$0xff]  }
  0xd7   : > { %2845 = vperm.xlu1 %4569, %v5651_v8   ;;  %2840 = vperm.xlu0 %4568, %v5646_v5   ;;  %v5752_v8 = vld [vmem:[%s5556_s26 + $0x138] sm:$0xff]  ;;  %v3776_v5 = vsel %vm3690_vm1, %v5749_v11, 0.0  ;;  %v3759_v13 = vrot.slane %v3758_v9, 4  ;;  %v3790_v60 = vsel %vm3690_vm1, %v5811_v56, 0.0 }
  0xd8   : > { %v3773_v10 = vadd.f32 %v3772_v61, %v3771_v1  ;;  %v3778_v14 = vsel %vm3690_vm1, %v5752_v8, 0.0  ;;  %v4599_v61 = vld [vmem:[%s5554_s28 + $0x150] sm:$0xff]   ;;  %v5821_v1 = vld [vmem:[%s5556_s26 + $0x178] sm:$0xff] }
  0xd9   : > { %v3760_v17 = vadd.f32 %v3759_v13, %v3758_v9  ;;  %v5840_v9 = vld [vmem:[%s5556_s26 + $0x1a0] sm:$0xff]  ;;  %v4600_v13 = vld [vmem:[%s5554_s28 + $0x58] sm:$0xff]  }
  0xda   : > { %v3775_v15 = vadd.f32 %v3774_v4, %v3773_v10  ;;  %v3809_v10 = vsel %vm3690_vm1, %v5840_v9, 0.0 }
  0xdb   : > { %2855 = vperm.xlu1 %4569, %v5668_v23   ;;  %2850 = vperm.xlu0 %4568, %v5659_v16   ;;  %v3780_v16 = vsel %vm3690_vm1, %v5761_v19, 0.0  ;;  %v3761_v23 = vrot.slane %v3760_v17, 2 }
  0xdc   : > { %4343 = vmatmul.mubr.bf16.gmra.mrb[8].mxu0 %v4588_v2  ;;  %4407 = vmatmul.mubr.bf16.gmra.mrb[8].mxu1 %v4589_v3  ;;  %v3777_v18 = vadd.f32 %v3776_v5, %v3775_v15  ;;  %v5829_v2 = vld [vmem:[%s5556_s26 + $0x190] sm:$0xff]  ;;  %v3794_v3 = vsel %vm3690_vm1, %v5821_v1, 0.0  ;;  %v5845_v5 = vld [vmem:[%s5556_s26 + $0x1a8] sm:$0xff] }
  0xdd   : > { %4346 = vmatprep.mubr.bf16.mxu0 %v4590_v6  ;;  %4410 = vmatprep.mubr.bf16.mxu1 %v4591_v7  ;;  %v3762_v31 = vadd.f32 %v3761_v23, %v3760_v17  ;;  %v3805_v7 = vsel %vm3690_vm1, %v5829_v2, 0.0  ;;  %v3811_v15 = vsel %vm3690_vm1, %v5845_v5, 0.0  ;;  %v4601_v17 = vld [vmem:[%s5554_s28 + $0x158] sm:$0xff]  }
  0xde   : > { %v3779_v27 = vadd.f32 %v3778_v14, %v3777_v18 }
  0xdf   : > { %2865 = vperm.xlu1 %4569, %v5680_v29   ;;  %2860 = vperm.xlu0 %4568, %v5673_v26   ;;  %v3784_v29 = vsel %vm3690_vm1, %v5777_v33, 0.0  ;;  %v3727_v26 = vadd.f32 %v3726_v21, %v3725_v12  ;;  %v3763_v35 = vrot.slane %v3762_v31, 1  ;;  %v4603_v21 = vld [vmem:[%s5554_s28 + $0x160] sm:$0xff]  }
  0xe0   : > { %v3781_v32 = vadd.f32 %v3780_v16, %v3779_v27  ;;  %v4602_v16 = vld [vmem:[%s5554_s28 + $0x60] sm:$0xff]  }
  0xe1   : > { %v3764_v43 = vadd.f32 %v3763_v35, %v3762_v31  ;;  %v4606_v35 = vld [vmem:[%s5554_s28 + $0x70] sm:$0xff]  }
  0xe2   : > { %v3783_v37 = vadd.f32 %v3782_v30, %v3781_v32  ;;  %v5868_v30 = vld [vmem:[%s5556_s26 + $0x1c0] sm:$0xff]  ;;  %v4605_v32 = vld [vmem:[%s5554_s28 + $0x168] sm:$0xff]  }
  0xe3   : > { %2875 = vperm.xlu1 %4569, %v5694_v39   ;;  %2870 = vperm.xlu0 %4568, %v5697_v40   ;;  %v3788_v40 = vsel %vm3690_vm1, %v5789_v41, 0.0  ;;  %v5808_v55 = vsel %vm3672_vm2, %v3764_v43, %v3727_v26 }
  0xe4   : > { %4347 = vmatmul.mubr.bf16.gmra.mrb[12].mxu0 %v4592_v20  ;;  %4411 = vmatmul.mubr.bf16.gmra.mrb[12].mxu1 %v4593_v22  ;;  %v3785_v39 = vadd.f32 %v3784_v29, %v3783_v37  ;;  %v5854_v20 = vld [vmem:[%s5556_s26 + $0x1b0] sm:$0xff]  ;;  %v5875_v29 = vld [vmem:[%s5556_s26 + $0x1c8] sm:$0xff] }
  0xe5   : > { %4350 = vmatprep.mubr.bf16.mxu0 %v4594_v24  ;;  %4414 = vmatprep.mubr.bf16.mxu1 %v4595_v28  ;;  %v3813_v23 = vsel %vm3690_vm1, %v5854_v20, 0.0  ;;  %v4607_v37 = vld [vmem:[%s5554_s28 + $0x170] sm:$0xff]   ;;  %v3819_v43 = vsel %vm3690_vm1, %v5875_v29, 0.0 }
  0xe6   : > { %v3787_v54 = vadd.f32 %v3786_v38, %v3785_v39 }
  0xe7   : > { %2885 = vperm.xlu1 %4569, %v5722_v53   ;;  %2880 = vperm.xlu0 %4568, %v5713_v50   ;;  %v3792_v50 = vsel %vm3690_vm1, %v5818_v63, 0.0  ;;  %v5826_v53 = vld [vmem:[%s5556_s26 + $0x198] sm:$0xff] }
  0xe8   : > { %v3789_v62 = vadd.f32 %v3788_v40, %v3787_v54  ;;  %v3807_v6 = vsel %vm3690_vm1, %v5826_v53, 0.0  ;;  %v5884_v40 = vld [vmem:[%s5556_s26 + $0x1d0] sm:$0xff]  ;;  %v5896_v54 = vld [vmem:[%s5556_s26 + $0x1e0] sm:$0xff] }
  0xea   : > { %v3791_v4 = vadd.f32 %v3790_v60, %v3789_v62 }
  0xeb   : > { %2895 = vperm.xlu1 %4569, %v5687_v34   ;;  %2890 = vperm.xlu0 %4568, %v5702_v42   ;;  %v3806_v34 = vadd.f32 %v3805_v7, %v3804_v57  ;;  %v5899_v57 = vld [vmem:[%s5556_s26 + $0x208] sm:$0xff] }
  0xec   : > { %4351 = vmatmul.mubr.bf16.gmra.mrb[16].mxu0 %v4596_v46  ;;  %4415 = vmatmul.mubr.bf16.gmra.mrb[16].mxu1 %v4597_v47  ;;  %v3793_v42 = vadd.f32 %v3792_v50, %v3791_v4  ;;  %v3821_v47 = vsel %vm3690_vm1, %v5884_v40, 0.0  ;;  %v3840_v60 = vsel %vm3690_vm1, %v5899_v57, 0.0  ;;  %v4609_v4 = vld [vmem:[%s5554_s28 + $0x178] sm:$0xff]  }
  0xed   : > { %4354 = vmatprep.mubr.bf16.mxu0 %v4598_v58  ;;  %4418 = vmatprep.mubr.bf16.mxu1 %v4599_v61  ;;  %v3808_v12 = vadd.f32 %v3807_v6, %v3806_v34  ;;  %v5902_v58 = vld [vmem:[%s5556_s26 + $0x200] sm:$0xff]  ;;  %v5917_v6 = vld [vmem:[%s5556_s26 + $0x1e8] sm:$0xff] }
  0xee   : > { %v3795_v14 = vadd.f32 %v3794_v3, %v3793_v42  ;;  %v3839_v61 = vsel %vm3690_vm1, %v5902_v58, 0.0  ;;  %v4608_v3 = vld [vmem:[%s5554_s28 + $0x78] sm:$0xff]   ;;  %v4610_v34 = vld [vmem:[%s5554_s28 + $0x80] sm:$0xff]  }
  0xef   : > { %2905 = vperm.xlu1 %4569, %v5716_v51   ;;  %2900 = vperm.xlu0 %4568, %v5719_v52   ;;  %v3810_v18 = vadd.f32 %v3809_v10, %v3808_v12  ;;  %v5861_v51 = vld [vmem:[%s5556_s26 + $0x1b8] sm:$0xff]  ;;  %v3841_v50 = vadd.f32 %v3840_v60, %v3839_v61  ;;  %v4611_v42 = vld [vmem:[%s5554_s28 + $0x180] sm:$0xff]   ;;  %v3827_v10 = vsel %vm3690_vm1, %v5917_v6, 0.0  ;;  %v5987_v60 = vld [vmem:[%s5556_s26 + $0x250] sm:$0xff] }
  0xf0   : > { %v3796_v22 = vrot.slane %v3795_v14, 4  ;;  %v3815_v27 = vsel %vm3690_vm1, %v5861_v51, 0.0  ;;  %v5926_v12 = vld [vmem:[%s5556_s26 + $0x1f8] sm:$0xff] }
  0xf1   : > { %v3812_v52 = vadd.f32 %v3811_v15, %v3810_v18  ;;  %v5935_v15 = vld [vmem:[%s5556_s26 + $0x210] sm:$0xff]  ;;  %v5944_v18 = vld [vmem:[%s5556_s26 + $0x220] sm:$0xff]  ;;  %v4617_v61 = vld [vmem:[%s5554_s28 + $0x198] sm:$0xff]  }
  0xf2   : > { %v3797_v24 = vadd.f32 %v3796_v22, %v3795_v14  ;;  %v5932_v14 = vld [vmem:[%s5556_s26 + $0x218] sm:$0xff] }
  0xf3   : > { %2915 = vperm.xlu1 %4569, %v5740_v0   ;;  %2910 = vperm.xlu0 %4568, %v5731_v59   ;;  %v3814_v28 = vadd.f32 %v3813_v23, %v3812_v52  ;;  %v3817_v0 = vsel %vm3690_vm1, %v5868_v30, 0.0  ;;  %v4604_v59 = vld [vmem:[%s5554_s28 + $0x68] sm:$0xff]   ;;  %v3846_v23 = vsel %vm3690_vm1, %v5944_v18, 0.0 }
  0xf4   : > { %4355 = vmatmul.mubr.bf16.gmra.mrb[20].mxu0 %v4600_v13  ;;  %4419 = vmatmul.mubr.bf16.gmra.mrb[20].mxu1 %v4601_v17  ;;  %v3798_v31 = vrot.slane %v3797_v24, 2  ;;  %v5929_v13 = vld [vmem:[%s5556_s26 + $0x1f0] sm:$0xff]  ;;  %v3842_v17 = vsel %vm3690_vm1, %v5935_v15, 0.0 }
  0xf5   : > { %4358 = vmatprep.mubr.bf16.mxu0 %v4602_v16  ;;  %4422 = vmatprep.mubr.bf16.mxu1 %v4603_v21  ;;  %v3816_v26 = vadd.f32 %v3815_v27, %v3814_v28  ;;  %v3831_v16 = vsel %vm3690_vm1, %v5926_v12, 0.0  ;;  %v3843_v22 = vadd.f32 %v3842_v17, %v3841_v50  ;;  %v3858_v50 = vsel %vm3690_vm1, %v5987_v60, 0.0  ;;  %v6011_v17 = vld [vmem:[%s5556_s26 + $0x290] sm:$0xff] }
  0xf6   : > { %v3799_v38 = vadd.f32 %v3798_v31, %v3797_v24  ;;  %v5953_v24 = vld [vmem:[%s5556_s26 + $0x228] sm:$0xff] }
  0xf7   : > { %2925 = vperm.xlu1 %4569, %v5752_v8   ;;  %2920 = vperm.xlu0 %4568, %v5749_v11   ;;  %v3818_v39 = vadd.f32 %v3817_v0, %v3816_v26  ;;  %v3848_v28 = vsel %vm3690_vm1, %v5953_v24, 0.0  ;;  %v4612_v31 = vld [vmem:[%s5554_s28 + $0x88] sm:$0xff]   ;;  %v4615_v26 = vld [vmem:[%s5554_s28 + $0x190] sm:$0xff]  }
  0xf8   : > { %v3800_v46 = vrot.slane %v3799_v38, 1  ;;  %v4613_v0 = vld [vmem:[%s5554_s28 + $0x188] sm:$0xff]  }
  0xf9   : > { %v3820_v8 = vadd.f32 %v3819_v43, %v3818_v39 }
  0xfa   : > { %v3801_v11 = vadd.f32 %v3800_v46, %v3799_v38 }
  0xfb   : > { %2935 = vperm.xlu1 %4569, %v5771_v25   ;;  %2930 = vperm.xlu0 %4568, %v5761_v19   ;;  %v3822_v25 = vadd.f32 %v3821_v47, %v3820_v8  ;;  %v3825_v19 = vsel %vm3690_vm1, %v5896_v54, 0.0 }
  0xfc   : > { %4359 = vmatmul.mubr.bf16.gmra.mrb[24].mxu0 %v4604_v59  ;;  %4423 = vmatmul.mubr.bf16.gmra.mrb[24].mxu1 %v4605_v32  ;;  %v5912_v62 = vsel %vm3674_vm3, %v3801_v11, %v5808_v55  ;;  %v4614_v32 = vld [vmem:[%s5554_s28 + $0x90] sm:$0xff]   ;;  %v5981_v11 = vld [vmem:[%s5556_s26 + $0x248] sm:$0xff] }
  0xfd   : > { %4362 = vmatprep.mubr.bf16.mxu0 %v4606_v35  ;;  %4426 = vmatprep.mubr.bf16.mxu1 %v4607_v37  ;;  %v3824_v7 = vadd.f32 %v3823_v49, %v3822_v25  ;;  %v5967_v35 = vld [vmem:[%s5556_s26 + $0x238] sm:$0xff] }
  0xfe   : > { %v3852_v43 = vsel %vm3690_vm1, %v5967_v35, 0.0 }
  0xff   : > { %2945 = vperm.xlu1 %4569, %v5784_v36   ;;  %2940 = vperm.xlu0 %4568, %v5777_v33   ;;  %v3826_v55 = vadd.f32 %v3825_v19, %v3824_v7  ;;  %v3829_v36 = vsel %vm3690_vm1, %v5929_v13, 0.0  ;;  %v3844_v33 = vsel %vm3690_vm1, %v5932_v14, 0.0 }
 0x100   : > { %v3845_v27 = vadd.f32 %v3844_v33, %v3843_v22  ;;  %v6008_v33 = vld [vmem:[%s5556_s26 + $0x280] sm:$0xff] }
 0x101   : > { %v3828_v21 = vadd.f32 %v3827_v10, %v3826_v55  ;;  %v6002_v55 = vld [vmem:[%s5556_s26 + $0x260] sm:$0xff]  ;;  %v3876_v22 = vsel %vm3690_vm1, %v6008_v33, 0.0 }
 0x102   : > { %v3847_v59 = vadd.f32 %v3846_v23, %v3845_v27  ;;  %v3879_v23 = vsel %vm3690_vm1, %v6011_v17, 0.0 }
 0x103   : > { %2955 = vperm.xlu1 %4569, %v5811_v56   ;;  %2950 = vperm.xlu0 %4568, %v5789_v41   ;;  %v3830_v52 = vadd.f32 %v3829_v36, %v3828_v21  ;;  %v5960_v41 = vld [vmem:[%s5556_s26 + $0x230] sm:$0xff] }
 0x104   : > { %4363 = vmatmul.mubr.bf16.gmra.mrb[28].mxu0 %v4608_v3  ;;  %4427 = vmatmul.mubr.bf16.gmra.mrb[28].mxu1 %v4609_v4  ;;  %v3850_v37 = vsel %vm3690_vm1, %v5960_v41, 0.0  ;;  %v3849_v39 = vadd.f32 %v3848_v28, %v3847_v59  ;;  %v5995_v4 = vld [vmem:[%s5556_s26 + $0x258] sm:$0xff] }
 0x105   : > { %4366 = vmatprep.mubr.bf16.mxu0 %v4610_v34  ;;  %4430 = vmatprep.mubr.bf16.mxu1 %v4611_v42  ;;  %v3832_v56 = vadd.f32 %v3831_v16, %v3830_v52  ;;  %v4618_v34 = vld [vmem:[%s5554_s28 + $0xa0] sm:$0xff]   ;;  %v3860_v10 = vsel %vm3690_vm1, %v5995_v4, 0.0  ;;  %v3862_v16 = vsel %vm3690_vm1, %v6002_v55, 0.0  ;;  %v6031_v28 = vld [vmem:[%s5556_s26 + $0x298] sm:$0xff] }
 0x106   : > { %v3851_v47 = vadd.f32 %v3850_v37, %v3849_v39  ;;  %v4619_v42 = vld [vmem:[%s5554_s28 + $0x1a0] sm:$0xff]   ;;  %v6052_v39 = vld [vmem:[%s5556_s26 + $0x278] sm:$0xff] }
 0x107   : > { %2965 = vperm.xlu1 %4569, %v5821_v1   ;;  %2960 = vperm.xlu0 %4568, %v5818_v63   ;;  %v3833_v38 = vrot.slane %v3832_v56, 4  ;;  %v5974_v1 = vld [vmem:[%s5556_s26 + $0x240] sm:$0xff] }
 0x108   : > { %v3854_v63 = vsel %vm3690_vm1, %v5974_v1, 0.0  ;;  %v3853_v49 = vadd.f32 %v3852_v43, %v3851_v47  ;;  %v4621_v43 = vld [vmem:[%s5554_s28 + $0x1a8] sm:$0xff]  }
 0x109   : > { %v3834_v46 = vadd.f32 %v3833_v38, %v3832_v56  ;;  %v6038_v56 = vld [vmem:[%s5556_s26 + $0x270] sm:$0xff]  ;;  %v6055_v47 = vld [vmem:[%s5556_s26 + $0x2a8] sm:$0xff] }
 0x10a   : > { %v3855_v19 = vadd.f32 %v3854_v63, %v3853_v49  ;;  %v3866_v37 = vsel %vm3690_vm1, %v6038_v56, 0.0  ;;  %v3885_v49 = vsel %vm3690_vm1, %v6055_v47, 0.0 }
 0x10b   : > { %2975 = vperm.xlu1 %4569, %v5794_v44   ;;  %2970 = vperm.xlu0 %4568, %v5797_v45   ;;  %v3835_v8 = vrot.slane %v3834_v46, 2  ;;  %v3856_v44 = vsel %vm3690_vm1, %v5981_v11, 0.0  ;;  %v4616_v45 = vld [vmem:[%s5554_s28 + $0x98] sm:$0xff]  }
 0x10c   : > { %4367 = vmatmul.mubr.bf16.gmra.mrb[32].mxu0 %v4612_v31  ;;  %4431 = vmatmul.mubr.bf16.gmra.mrb[32].mxu1 %v4613_v0  ;;  %v3857_v7 = vadd.f32 %v3856_v44, %v3855_v19  ;;  %v3881_v0 = vsel %vm3690_vm1, %v6031_v28, 0.0 }
 0x10d   : > { %4370 = vmatprep.mubr.bf16.mxu0 %v4614_v32  ;;  %4434 = vmatprep.mubr.bf16.mxu1 %v4615_v26  ;;  %v3836_v25 = vadd.f32 %v3835_v8, %v3834_v46  ;;  %v6041_v32 = vld [vmem:[%s5556_s26 + $0x2a0] sm:$0xff]  ;;  %v4620_v26 = vld [vmem:[%s5554_s28 + $0xa8] sm:$0xff]   ;;  %v4622_v8 = vld [vmem:[%s5554_s28 + $0xb0] sm:$0xff]  }
 0x10e   : > { %v3859_v36 = vadd.f32 %v3858_v50, %v3857_v7  ;;  %v3883_v38 = vsel %vm3690_vm1, %v6041_v32, 0.0  ;;  %v6071_v50 = vld [vmem:[%s5556_s26 + $0x2b8] sm:$0xff] }
 0x10f   : > { %2985 = vperm.xlu1 %4569, %v5826_v53   ;;  %2980 = vperm.xlu0 %4568, %v5829_v2   ;;  %v3837_v3 = vrot.slane %v3836_v25, 1  ;;  %v6005_v2 = vld [vmem:[%s5556_s26 + $0x288] sm:$0xff] }
 0x110   : > { %v3877_v21 = vsel %vm3690_vm1, %v6005_v2, 0.0  ;;  %v3861_v52 = vadd.f32 %v3860_v10, %v3859_v36  ;;  %v4624_v10 = vld [vmem:[%s5554_s28 + $0xb8] sm:$0xff]  }
 0x111   : > { %v3838_v53 = vadd.f32 %v3837_v3, %v3836_v25  ;;  %v3878_v27 = vadd.f32 %v3877_v21, %v3876_v22  ;;  %v6064_v25 = vld [vmem:[%s5556_s26 + $0x2b0] sm:$0xff]  ;;  %v4626_v22 = vld [vmem:[%s5554_s28 + $0xc0] sm:$0xff]  }
 0x112   : > { %v3887_v19 = vsel %vm3690_vm1, %v6064_v25, 0.0 }
 0x113   : > { %2995 = vperm.xlu1 %4569, %v5845_v5   ;;  %2990 = vperm.xlu0 %4568, %v5840_v9   ;;  %v6025_v9 = vsel %vm3676_vm4, %v3838_v53, %v5912_v62  ;;  %v6028_v5 = vld [vmem:[%s5556_s26 + $0x268] sm:$0xff]  ;;  %v3863_v62 = vadd.f32 %v3862_v16, %v3861_v52  ;;  %v3880_v59 = vadd.f32 %v3879_v23, %v3878_v27  ;;  %v4625_v53 = vld [vmem:[%s5554_s28 + $0x1b8] sm:$0xff]   ;;  %v4627_v23 = vld [vmem:[%s5554_s28 + $0x1c0] sm:$0xff]  }
 0x114   : > { %4371 = vmatmul.mubr.bf16.gmra.mrb[36].mxu0 %v4616_v45  ;;  %4435 = vmatmul.mubr.bf16.gmra.mrb[36].mxu1 %v4617_v61  ;;  %v3864_v31 = vsel %vm3690_vm1, %v6028_v5, 0.0  ;;  %v6085_v16 = vld [vmem:[%s5556_s26 + $0x2c8] sm:$0xff] }
 0x115   : > { %4374 = vmatprep.mubr.bf16.mxu0 %v4618_v34  ;;  %4438 = vmatprep.mubr.bf16.mxu1 %v4619_v42  ;;  %v3865_v46 = vadd.f32 %v3864_v31, %v3863_v62  ;;  %v3882_v63 = vadd.f32 %v3881_v0, %v3880_v59  ;;  %v6076_v34 = vld [vmem:[%s5556_s26 + $0x2c0] sm:$0xff]  ;;  %v3893_v52 = vsel %vm3690_vm1, %v6085_v16, 0.0  ;;  %v6092_v31 = vld [vmem:[%s5556_s26 + $0x2d0] sm:$0xff]  ;;  %v6099_v62 = vld [vmem:[%s5556_s26 + $0x2d8] sm:$0xff] }
 0x116   : > { %v3891_v42 = vsel %vm3690_vm1, %v6076_v34, 0.0 }
 0x117   : > { %3005 = vperm.xlu1 %4569, %v5861_v51   ;;  %3000 = vperm.xlu0 %4568, %v5854_v20   ;;  %v4623_v51 = vld [vmem:[%s5554_s28 + $0x1b0] sm:$0xff]   ;;  %v3868_v20 = vsel %vm3690_vm1, %v6052_v39, 0.0  ;;  %v3867_v44 = vadd.f32 %v3866_v37, %v3865_v46  ;;  %v3884_v45 = vadd.f32 %v3883_v38, %v3882_v63  ;;  %v6104_v37 = vld [vmem:[%s5556_s26 + $0x2e0] sm:$0xff]  ;;  %v4629_v46 = vld [vmem:[%s5554_s28 + $0x1c8] sm:$0xff]  }
 0x118   : > { %v3899_v38 = vsel %vm3690_vm1, %v6104_v37, 0.0 }
 0x119   : > { %v3869_v61 = vadd.f32 %v3868_v20, %v3867_v44  ;;  %v3886_v3 = vadd.f32 %v3885_v49, %v3884_v45  ;;  %v4630_v20 = vld [vmem:[%s5554_s28 + $0xd0] sm:$0xff]  }
 0x11a   : > { %v4631_v49 = vld [vmem:[%s5554_s28 + $0x1d0] sm:$0xff]  }
 0x11b   : > { %3015 = vperm.xlu1 %4569, %v5875_v29   ;;  %3010 = vperm.xlu0 %4568, %v5868_v30   ;;  %v3889_v29 = vsel %vm3690_vm1, %v6071_v50, 0.0  ;;  %v3870_v30 = vrot.slane %v3869_v61, 4  ;;  %v3888_v7 = vadd.f32 %v3887_v19, %v3886_v3 }
 0x11c   : > { %4375 = vmatmul.mubr.bf16.gmra.mrb[40].mxu0 %v4620_v26  ;;  %4439 = vmatmul.mubr.bf16.gmra.mrb[40].mxu1 %v4621_v43  ;;  %v4628_v43 = vld [vmem:[%s5554_s28 + $0xc8] sm:$0xff]  }
 0x11d   : > { %4378 = vmatprep.mubr.bf16.mxu0 %v4622_v8  ;;  %4442 = vmatprep.mubr.bf16.mxu1 %v4623_v51  ;;  %v3871_v36 = vadd.f32 %v3870_v30, %v3869_v61  ;;  %v3890_v21 = vadd.f32 %v3889_v29, %v3888_v7  ;;  %v6113_v8 = vld [vmem:[%s5556_s26 + $0x2e8] sm:$0xff]  ;;  %v6126_v61 = vld [vmem:[%s5556_s26 + $0x2f0] sm:$0xff]  ;;  %v6133_v29 = vld [vmem:[%s5556_s26 + $0x2f8] sm:$0xff] }
 0x11e   : > { %v3901_v44 = vsel %vm3690_vm1, %v6113_v8, 0.0  ;;  %v3903_v3 = vsel %vm3690_vm1, %v6126_v61, 0.0 }
 0x11f   : > { %3025 = vperm.xlu1 %4569, %v5889_v48   ;;  %3020 = vperm.xlu0 %4568, %v5884_v40   ;;  %v3872_v27 = vrot.slane %v3871_v36, 2  ;;  %v3892_v48 = vadd.f32 %v3891_v42, %v3890_v21  ;;  %v3895_v40 = vsel %vm3690_vm1, %v6092_v31, 0.0  ;;  %v4632_v42 = vld [vmem:[%s5554_s28 + $0xd8] sm:$0xff]   ;;  %v4635_v21 = vld [vmem:[%s5554_s28 + $0x1e0] sm:$0xff]  }
 0x121   : > { %v3873_v0 = vadd.f32 %v3872_v27, %v3871_v36  ;;  %v3894_v59 = vadd.f32 %v3893_v52, %v3892_v48  ;;  %v4634_v36 = vld [vmem:[%s5554_s28 + $0xe0] sm:$0xff]  }
 0x123   : > { %3035 = vperm.xlu1 %4569, %v5917_v6   ;;  %3030 = vperm.xlu0 %4568, %v5896_v54   ;;  %v3897_v6 = vsel %vm3690_vm1, %v6099_v62, 0.0  ;;  %v3874_v54 = vrot.slane %v3873_v0, 1  ;;  %v3896_v26 = vadd.f32 %v3895_v40, %v3894_v59  ;;  %v4636_v40 = vld [vmem:[%s5554_s28 + $0xe8] sm:$0xff]   ;;  %v4638_v59 = vld [vmem:[%s5554_s28 + $0xf0] sm:$0xff]  }
 0x124   : > { %4379 = vmatmul.mubr.bf16.gmra.mrb[44].mxu0 %v4624_v10  ;;  %4443 = vmatmul.mubr.bf16.gmra.mrb[44].mxu1 %v4625_v53  ;;  %v4633_v10 = vld [vmem:[%s5554_s28 + $0x1d8] sm:$0xff]  }
 0x125   : > { %4382 = vmatprep.mubr.bf16.mxu0 %v4626_v22  ;;  %4446 = vmatprep.mubr.bf16.mxu1 %v4627_v23  ;;  %v3875_v63 = vadd.f32 %v3874_v54, %v3873_v0  ;;  %v3898_v51 = vadd.f32 %v3897_v6, %v3896_v26  ;;  %v4637_v0 = vld [vmem:[%s5554_s28 + $0x1e8] sm:$0xff]   ;;  %v4639_v6 = vld [vmem:[%s5554_s28 + $0x1f0] sm:$0xff]  }
 0x127   : > { %3045 = vperm.xlu1 %4569, %v5926_v12   ;;  %3040 = vperm.xlu0 %4568, %v5929_v13   ;;  %v3998_v13 = vsel %vm3678_vm5, %v3875_v63, %v6025_v9  ;;  %v3900_v19 = vadd.f32 %v3899_v38, %v3898_v51  ;;  %v3905_v9 = vsel %vm3690_vm1, %v6133_v29, 0.0 }
 0x129   : > { %v3902_v30 = vadd.f32 %v3901_v44, %v3900_v19 }
 0x12a   : > { %v6119_v12 = vpop.permute.xlu1 %2740  ;;  %v6121_v45 = vpop.permute.xlu0 %2730 }
 0x12b   : > { %3055 = vperm.xlu1 %4569, %v5899_v57   ;;  %3050 = vperm.xlu0 %4568, %v5902_v58   ;;  %v3904_v58 = vadd.f32 %v3903_v3, %v3902_v30  ;;  %v2712_v3 = vld [vmem:[%s5556_s26 + $0x388] sm:$0xff] }
 0x12c   : > { %4383 = vmatmul.mubr.bf16.gmra.mrb[48].mxu0 %v4628_v43  ;;  %4447 = vmatmul.mubr.bf16.gmra.mrb[48].mxu1 %v4629_v46  ;;  %v4641_v46 = vld [vmem:[%s5554_s28 + $0x1f8] sm:$0xff]  }
 0x12d   : > { %4386 = vmatprep.mubr.bf16.mxu0 %v4630_v20  ;;  %4450 = vmatprep.mubr.bf16.mxu1 %v4631_v49  ;;  %v3906_v53 = vadd.f32 %v3905_v9, %v3904_v58  ;;  %v3951_v9 = vsel %vm3690_vm1, %v2712_v3, 0.0 }
 0x12e   : > { %v6137_v7 = vpop.permute.xlu1 %2745  ;;  %v6139_v57 = vpop.permute.xlu0 %2735 }
 0x12f   : > { %3065 = vperm.xlu1 %4569, %v5932_v14   ;;  %3060 = vperm.xlu0 %4568, %v5935_v15   ;;  %v3907_v52 = vrot.slane %v3906_v53, 4 }
 0x131   : > { %v3908_v14 = vadd.f32 %v3907_v52, %v3906_v53  ;;  %v2714_v53 = vld [vmem:[%s5556_s26 + $0x398] sm:$0xff] }
 0x132   : > { %v6147_v22 = vpop.permute.xlu1 %2755  ;;  %v6149_v23 = vpop.permute.xlu0 %2750 }
 0x133   : > { %3075 = vperm.xlu1 %4569, %v5953_v24   ;;  %3070 = vperm.xlu0 %4568, %v5944_v18   ;;  %v3909_v48 = vrot.slane %v3908_v14, 2 }
 0x134   : > { %4387 = vmatmul.mubr.bf16.gmra.mrb[52].mxu0 %v4632_v42  ;;  %4451 = vmatmul.mubr.bf16.gmra.mrb[52].mxu1 %v4633_v10 }
 0x135   : > { %4390 = vmatprep.mubr.bf16.mxu0 %v4634_v36  ;;  %4454 = vmatprep.mubr.bf16.mxu1 %v4635_v21  ;;  %v3910_v24 = vadd.f32 %v3909_v48, %v3908_v14  ;;  %v2713_v36 = vld [vmem:[%s5556_s26 + $0x390] sm:$0xff] }
 0x136   : > { %v6153_v15 = vpop.permute.xlu1 %2765  ;;  %v6155_v27 = vpop.permute.xlu0 %2760 }
 0x137   : > { %3085 = vperm.xlu1 %4569, %v5967_v35   ;;  %3080 = vperm.xlu0 %4568, %v5960_v41   ;;  %v3911_v26 = vrot.slane %v3910_v24, 1 }
 0x139   : > { %v3912_v41 = vadd.f32 %v3911_v26, %v3910_v24  ;;  %v2715_v24 = vld [vmem:[%s5556_s26 + $0x3a0] sm:$0xff] }
 0x13a   : > { %v6163_v18 = vpop.permute.xlu1 %2775  ;;  %v6165_v54 = vpop.permute.xlu0 %2770 }
 0x13b   : > { %3095 = vperm.xlu1 %4569, %v5981_v11   ;;  %3090 = vperm.xlu0 %4568, %v5974_v1   ;;  %v6174_v43 = vsel %vm3680_vm6, %v3912_v41, %v3998_v13  ;;  %v4640_v11 = vld [vmem:[%s5554_s28 + $0xf8] sm:$0xff]  }
 0x13c   : > { %4391 = vmatmul.mubr.bf16.gmra.mrb[56].mxu0 %v4636_v40  ;;  %4455 = vmatmul.mubr.bf16.gmra.mrb[56].mxu1 %v4637_v0  ;;  %6818 = vst [vmem:[#allocation10_spill] sm:$0xff] %v6174_v43  ;;  %v3953_v40 = vsel %vm3690_vm1, %v2713_v36, 0.0 }
 0x13d   : > { %4394 = vmatprep.mubr.bf16.mxu0 %v4638_v59  ;;  %4458 = vmatprep.mubr.bf16.mxu1 %v4639_v6  ;;  %v2699_v59 = vld [vmem:[%s5556_s26 + $0x320] sm:$0xff] }
 0x13e   : > { %v6169_v35 = vpop.permute.xlu1 %2785  ;;  %v6171_v38 = vpop.permute.xlu0 %2780 }
 0x13f   : > { %3105 = vperm.xlu1 %4569, %v5995_v4   ;;  %3100 = vperm.xlu0 %4568, %v5987_v60  }
 0x142   : > { %v6180_v1 = vpop.permute.xlu1 %2795  ;;  %v6182_v63 = vpop.permute.xlu0 %2790 }
 0x143   : > { %3115 = vperm.xlu1 %4569, %v6028_v5   ;;  %3110 = vperm.xlu0 %4568, %v6002_v55  }
 0x144   : > { %4395 = vmatmul.mubr.bf16.gmra.mrb[60].mxu0 %v4640_v11  ;;  %4459 = vmatmul.mubr.bf16.gmra.mrb[60].mxu1 %v4641_v46  ;;  %v3955_v46 = vsel %vm3690_vm1, %v2714_v53, 0.0 }
 0x146   : > { %v6186_v51 = vpop.permute.xlu1 %2805  ;;  %v6188_v20 = vpop.permute.xlu0 %2800 }
 0x147   : > { %3125 = vperm.xlu1 %4569, %v6052_v39   ;;  %3120 = vperm.xlu0 %4568, %v6038_v56  }
 0x14a   : > { %v6192_v60 = vpop.permute.xlu1 %2815  ;;  %v6194_v4 = vpop.permute.xlu0 %2810 }
 0x14b   : > { %3135 = vperm.xlu1 %4569, %v6005_v2   ;;  %3130 = vperm.xlu0 %4568, %v6008_v33  }
 0x14e   : > { %v6198_v5 = vpop.permute.xlu1 %2825  ;;  %v6200_v55 = vpop.permute.xlu0 %2820 }
 0x14f   : > { %3145 = vperm.xlu1 %4569, %v6031_v28   ;;  %3140 = vperm.xlu0 %4568, %v6011_v17  }
 0x152   : > { %v6204_v49 = vpop.permute.xlu1 %2835  ;;  %v6206_v39 = vpop.permute.xlu0 %2830 }
 0x153   : > { %3155 = vperm.xlu1 %4569, %v6055_v47   ;;  %3150 = vperm.xlu0 %4568, %v6041_v32  }
 0x156   : > { %v6210_v56 = vpop.permute.xlu1 %2845  ;;  %v6212_v2 = vpop.permute.xlu0 %2840 }
 0x157   : > { %3165 = vperm.xlu1 %4569, %v6071_v50   ;;  %3160 = vperm.xlu0 %4568, %v6064_v25  }
 0x15a   : > { %v6216_v33 = vpop.permute.xlu1 %2855  ;;  %v6218_v17 = vpop.permute.xlu0 %2850 }
 0x15b   : > { %3175 = vperm.xlu1 %4569, %v6085_v16   ;;  %3170 = vperm.xlu0 %4568, %v6076_v34   ;;  %v2696_v16 = vld [vmem:[%s5556_s26 + $0x308] sm:$0xff] }
 0x15c   : > { %v3914_v42 = vsel %vm3690_vm1, %v2696_v16, 0.0 }
 0x15e   : > { %v6222_v28 = vpop.permute.xlu1 %2865  ;;  %v6224_v32 = vpop.permute.xlu0 %2860 }
 0x15f   : > { %3185 = vperm.xlu1 %4569, %v6099_v62   ;;  %3180 = vperm.xlu0 %4568, %v6092_v31   ;;  %v2695_v31 = vld [vmem:[%s5556_s26 + $0x300] sm:$0xff] }
 0x160   : > { %v3913_v10 = vsel %vm3690_vm1, %v2695_v31, 0.0 }
 0x161   : > { %v3915_v48 = vadd.f32 %v3914_v42, %v3913_v10  ;;  %v3920_v10 = vsel %vm3690_vm1, %v2699_v59, 0.0 }
 0x162   : > { %v6228_v47 = vpop.permute.xlu1 %2875  ;;  %v6230_v25 = vpop.permute.xlu0 %2870 }
 0x163   : > { %3195 = vperm.xlu1 %4569, %v6113_v8   ;;  %3190 = vperm.xlu0 %4568, %v6104_v37   ;;  %v2698_v8 = vld [vmem:[%s5556_s26 + $0x318] sm:$0xff]  ;;  %v2697_v37 = vld [vmem:[%s5556_s26 + $0x310] sm:$0xff] }
 0x164   : > { %v3916_v0 = vsel %vm3690_vm1, %v2697_v37, 0.0 }
 0x165   : > { %v3917_v11 = vadd.f32 %v3916_v0, %v3915_v48 }
 0x166   : > { %v6234_v50 = vpop.permute.xlu1 %2885  ;;  %v6236_v34 = vpop.permute.xlu0 %2880 }
 0x167   : > { %3205 = vperm.xlu1 %4569, %v6133_v29   ;;  %3200 = vperm.xlu0 %4568, %v6126_v61   ;;  %v2711_v61 = vld [vmem:[%s5556_s26 + $0x380] sm:$0xff] }
 0x168   : > { %v3950_v58 = vsel %vm3690_vm1, %v2711_v61, 0.0 }
 0x169   : > { %v3952_v21 = vadd.f32 %v3951_v9, %v3950_v58  ;;  %v3957_v58 = vsel %vm3690_vm1, %v2715_v24, 0.0 }
 0x16a   : > { %v6242_v62 = vpop.permute.xlu1 %2895  ;;  %v6244_v44 = vpop.permute.xlu0 %2890 }
 0x16b   : > { %6819 = vst [vmem:[#allocation11_spill] sm:$0xff] %v6242_v62  ;;  %6820 = vst [vmem:[#allocation12_spill] sm:$0xff] %v6244_v44  ;;  %3215 = vperm.xlu1 %4569, %v2696_v16   ;;  %3210 = vperm.xlu0 %4568, %v2695_v31   ;;  %v3954_v6 = vadd.f32 %v3953_v40, %v3952_v21  ;;  %v3918_v16 = vsel %vm3690_vm1, %v2698_v8, 0.0  ;;  %v2716_v31 = vld [vmem:[%s5556_s26 + $0x3a8] sm:$0xff] }
 0x16c   : > { %v3919_v42 = vadd.f32 %v3918_v16, %v3917_v11  ;;  %v3959_v0 = vsel %vm3690_vm1, %v2716_v31, 0.0  ;;  %v2702_v11 = vld [vmem:[%s5556_s26 + $0x338] sm:$0xff] }
 0x16e   : > { %v6248_v13 = vpop.permute.xlu1 %2905  ;;  %v6250_v19 = vpop.permute.xlu0 %2900  ;;  %v3921_v40 = vadd.f32 %v3920_v10, %v3919_v42  ;;  %v2719_v42 = vld [vmem:[%s5556_s26 + $0x3c0] sm:$0xff] }
 0x16f   : > { %6821 = vst [vmem:[#allocation13_spill] sm:$0xff] %v6248_v13  ;;  %6822 = vst [vmem:[#allocation14_spill] sm:$0xff] %v6250_v19  ;;  %3225 = vperm.xlu1 %4569, %v2698_v8   ;;  %3220 = vperm.xlu0 %4568, %v2697_v37   ;;  %v2703_v10 = vld [vmem:[%s5556_s26 + $0x340] sm:$0xff] }
 0x172   : > { %v6254_v29 = vpop.permute.xlu1 %2915  ;;  %v6256_v30 = vpop.permute.xlu0 %2910 }
 0x173   : > { %6823 = vst [vmem:[#allocation15_spill] sm:$0xff] %v6254_v29  ;;  %6824 = vst [vmem:[#allocation16_spill] sm:$0xff] %v6256_v30  ;;  %3295 = vperm.xlu1 %4569, %v2712_v3   ;;  %3290 = vperm.xlu0 %4568, %v2711_v61   ;;  %v2700_v3 = vld [vmem:[%s5556_s26 + $0x328] sm:$0xff]  ;;  %v3956_v61 = vadd.f32 %v3955_v46, %v3954_v6  ;;  %v2718_v6 = vld [vmem:[%s5556_s26 + $0x3b8] sm:$0xff] }
 0x175   : > { %v3958_v21 = vadd.f32 %v3957_v58, %v3956_v61 }
 0x176   : > { %v6264_v52 = vpop.permute.xlu1 %2925  ;;  %v6266_v14 = vpop.permute.xlu0 %2920 }
 0x177   : > { %6825 = vst [vmem:[#allocation17_spill] sm:$0xff] %v6264_v52  ;;  %6826 = vst [vmem:[#allocation18_spill] sm:$0xff] %v6266_v14  ;;  %3305 = vperm.xlu1 %4569, %v2714_v53   ;;  %3300 = vperm.xlu0 %4568, %v2713_v36   ;;  %v2717_v53 = vld [vmem:[%s5556_s26 + $0x3b0] sm:$0xff]  ;;  %v3960_v46 = vadd.f32 %v3959_v0, %v3958_v21  ;;  %v3963_v0 = vsel %vm3690_vm1, %v2718_v6, 0.0 }
 0x178   : > { %v2701_v36 = vld [vmem:[%s5556_s26 + $0x330] sm:$0xff]  ;;  %v3961_v58 = vsel %vm3690_vm1, %v2717_v53, 0.0 }
 0x17a   : > { %v6272_v26 = vpop.permute.xlu1 %2935  ;;  %v6274_v41 = vpop.permute.xlu0 %2930 }
 0x17b   : > { %6827 = vst [vmem:[#allocation19_spill] sm:$0xff] %v6272_v26  ;;  %6828 = vst [vmem:[#allocation20_spill] sm:$0xff] %v6274_v41  ;;  %3310 = vperm.xlu1 %4569, %v2715_v24   ;;  %3230 = vperm.xlu0 %4568, %v2699_v59   ;;  %v3922_v24 = vsel %vm3690_vm1, %v2700_v3, 0.0 }
 0x17c   : > { %v3923_v61 = vadd.f32 %v3922_v24, %v3921_v40  ;;  %v2720_v40 = vld [vmem:[%s5556_s26 + $0x3c8] sm:$0xff] }
 0x17d   : > { %v2704_v24 = vld [vmem:[%s5556_s26 + $0x348] sm:$0xff] }
 0x17e   : > { %v6280_v37 = vpop.permute.xlu1 %2945  ;;  %v6282_v9 = vpop.permute.xlu0 %2940 }
 0x17f   : > { %6829 = vst [vmem:[#allocation21_spill] sm:$0xff] %v6280_v37  ;;  %6830 = vst [vmem:[#allocation22_spill] sm:$0xff] %v6282_v9  ;;  %3315 = vperm.xlu1 %4569, %v2716_v31   ;;  %3235 = vperm.xlu0 %4568, %v2700_v3   ;;  %v3924_v31 = vsel %vm3690_vm1, %v2701_v36, 0.0 }
 0x180   : > { %v3925_v21 = vadd.f32 %v3924_v31, %v3923_v61  ;;  %v2721_v61 = vld [vmem:[%s5556_s26 + $0x3d0] sm:$0xff] }
 0x181   : > { %v2705_v31 = vld [vmem:[%s5556_s26 + $0x350] sm:$0xff] }
 0x182   : > { %v6288_v8 = vpop.permute.xlu1 %2955  ;;  %v6290_v48 = vpop.permute.xlu0 %2950 }
 0x183   : > { %6831 = vst [vmem:[#allocation23_spill] sm:$0xff] %v6288_v8  ;;  %6832 = vst [vmem:[#allocation24_spill] sm:$0xff] %v6290_v48  ;;  %3320 = vperm.xlu1 %4569, %v2717_v53   ;;  %3240 = vperm.xlu0 %4568, %v2701_v36   ;;  %v3962_v8 = vadd.f32 %v3961_v58, %v3960_v46  ;;  %v3926_v53 = vsel %vm3690_vm1, %v2702_v11, 0.0  ;;  %v3965_v58 = vsel %vm3690_vm1, %v2719_v42, 0.0 }
 0x184   : > { %v3927_v46 = vadd.f32 %v3926_v53, %v3925_v21  ;;  %v2722_v21 = vld [vmem:[%s5556_s26 + $0x3d8] sm:$0xff] }
 0x185   : > { %v2706_v53 = vld [vmem:[%s5556_s26 + $0x358] sm:$0xff] }
 0x186   : > { %v6296_v59 = vpop.permute.xlu1 %2965  ;;  %v6298_v16 = vpop.permute.xlu0 %2960 }
 0x187   : > { %6833 = vst [vmem:[#allocation25_spill] sm:$0xff] %v6296_v59  ;;  %6834 = vst [vmem:[#allocation26_spill] sm:$0xff] %v6298_v16  ;;  %3325 = vperm.xlu1 %4569, %v2718_v6   ;;  %3245 = vperm.xlu0 %4568, %v2702_v11   ;;  %v3964_v59 = vadd.f32 %v3963_v0, %v3962_v8  ;;  %v3928_v6 = vsel %vm3690_vm1, %v2703_v10, 0.0  ;;  %v3967_v0 = vsel %vm3690_vm1, %v2720_v40, 0.0 }
 0x188   : > { %v3929_v8 = vadd.f32 %v3928_v6, %v3927_v46  ;;  %v2723_v46 = vld [vmem:[%s5556_s26 + $0x3e0] sm:$0xff] }
 0x189   : > { %v2707_v6 = vld [vmem:[%s5556_s26 + $0x360] sm:$0xff] }
 0x18a   : > { %v6304_v3 = vpop.permute.xlu1 %2975  ;;  %v6306_v48 = vpop.permute.xlu0 %2970 }
 0x18b   : > { %6835 = vst [vmem:[#allocation27_spill] sm:$0xff] %v6304_v3  ;;  %6836 = vst [vmem:[#allocation28_spill] sm:$0xff] %v6306_v48  ;;  %3330 = vperm.xlu1 %4569, %v2719_v42   ;;  %3250 = vperm.xlu0 %4568, %v2703_v10   ;;  %v3966_v3 = vadd.f32 %v3965_v58, %v3964_v59  ;;  %v3930_v42 = vsel %vm3690_vm1, %v2704_v24, 0.0  ;;  %v3969_v58 = vsel %vm3690_vm1, %v2721_v61, 0.0 }
 0x18c   : > { %v3931_v59 = vadd.f32 %v3930_v42, %v3929_v8  ;;  %v3934_v8 = vsel %vm3690_vm1, %v2706_v53, 0.0  ;;  %v2724_v42 = vld [vmem:[%s5556_s26 + $0x3e8] sm:$0xff] }
 0x18d   : > { %v3975_v41 = vsel %vm3690_vm1, %v2724_v42, 0.0 }
 0x18e   : > { %v6312_v36 = vpop.permute.xlu1 %2985  ;;  %v6314_v16 = vpop.permute.xlu0 %2980 }
 0x18f   : > { %6837 = vst [vmem:[#allocation29_spill] sm:$0xff] %v6312_v36  ;;  %6838 = vst [vmem:[#allocation30_spill] sm:$0xff] %v6314_v16  ;;  %3335 = vperm.xlu1 %4569, %v2720_v40   ;;  %3255 = vperm.xlu0 %4568, %v2704_v24   ;;  %v3968_v36 = vadd.f32 %v3967_v0, %v3966_v3  ;;  %v3932_v40 = vsel %vm3690_vm1, %v2705_v31, 0.0  ;;  %v3971_v0 = vsel %vm3690_vm1, %v2722_v21, 0.0 }
 0x190   : > { %v3933_v3 = vadd.f32 %v3932_v40, %v3931_v59 }
 0x192   : > { %v6320_v11 = vpop.permute.xlu1 %2995  ;;  %v6322_v48 = vpop.permute.xlu0 %2990  ;;  %v3935_v59 = vadd.f32 %v3934_v8, %v3933_v3 }
 0x193   : > { %6839 = vst [vmem:[#allocation31_spill] sm:$0xff] %v6320_v11  ;;  %6840 = vst [vmem:[#allocation32_spill] sm:$0xff] %v6322_v48  ;;  %3340 = vperm.xlu1 %4569, %v2721_v61   ;;  %3260 = vperm.xlu0 %4568, %v2705_v31   ;;  %v3970_v11 = vadd.f32 %v3969_v58, %v3968_v36  ;;  %v2708_v61 = vld [vmem:[%s5556_s26 + $0x368] sm:$0xff]  ;;  %v6347_v31 = vld [vmem:[%s6809_s3] ss:$0 sm:$0xff] }
 0x195   : > { %v3972_v36 = vadd.f32 %v3971_v0, %v3970_v11  ;;  %v2725_v11 = vld [vmem:[%s5556_s26 + $0x3f0] sm:$0xff] }
 0x196   : > { %v6328_v10 = vpop.permute.xlu1 %3005  ;;  %v6330_v16 = vpop.permute.xlu0 %3000  ;;  %v2709_v0 = vld [vmem:[%s5556_s26 + $0x370] sm:$0xff] }
 0x197   : > { %6841 = vst [vmem:[#allocation33_spill] sm:$0xff] %v6328_v10  ;;  %6842 = vst [vmem:[#allocation34_spill] sm:$0xff] %v6330_v16  ;;  %3345 = vperm.xlu1 %4569, %v2722_v21   ;;  %3265 = vperm.xlu0 %4568, %v2706_v53   ;;  %v3973_v21 = vsel %vm3690_vm1, %v2723_v46, 0.0 }
 0x19a   : > { %v6336_v24 = vpop.permute.xlu1 %3015  ;;  %v6338_v48 = vpop.permute.xlu0 %3010 }
 0x19b   : > { %6843 = vst [vmem:[#allocation35_spill] sm:$0xff] %v6336_v24  ;;  %6844 = vst [vmem:[#allocation36_spill] sm:$0xff] %v6338_v48  ;;  %3350 = vperm.xlu1 %4569, %v2723_v46   ;;  %3270 = vperm.xlu0 %4568, %v2707_v6   ;;  %v3936_v48 = vsel %vm3690_vm1, %v2707_v6, 0.0 }
 0x19e   : > { %v6349_v58 = vpop.permute.xlu1 %3025  ;;  %v6351_v24 = vpop.permute.xlu0 %3020 }
 0x19f   : > { %6845 = vst [vmem:[#allocation37_spill] sm:$0xff] %v6349_v58  ;;  %6846 = vst [vmem:[#allocation38_spill] sm:$0xff] %v6351_v24  ;;  %3355 = vperm.xlu1 %4569, %v2724_v42   ;;  %3275 = vperm.xlu0 %4568, %v2708_v61   ;;  %v4336_v53 = vpop.f32.mrb[0].mxu0  ;;  %v4400_v40 = vpop.f32.mrb[0].mxu1  ;;  %v3974_v24 = vadd.f32 %v3973_v21, %v3972_v36  ;;  %v3938_v36 = vsel %vm3690_vm1, %v2708_v61, 0.0  ;;  %v2726_v21 = vld [vmem:[%s5556_s26 + $0x3f8] sm:$0xff] }
 0x1a0   : > { %v1969_v10 = vadd.f32 %v4336_v53, %v6347_v31  ;;  %v2225_v16 = vadd.f32 %v4400_v40, %v6347_v31  ;;  %v1960_v37 = vpop.f32.mrb[1].mxu0  ;;  %v2216_v9 = vpop.f32.mrb[1].mxu1  ;;  %v3937_v40 = vadd.f32 %v3936_v48, %v3935_v59 }
 0x1a1   : > { %v1961_v58 = vadd.f32 %v6347_v31, %v1960_v37  ;;  %v2217_v3 = vadd.f32 %v6347_v31, %v2216_v9  ;;  %v4337_v8 = vpop.f32.mrb[2].mxu0  ;;  %v4401_v46 = vpop.f32.mrb[2].mxu1  ;;  %v3976_v48 = vadd.f32 %v3975_v41, %v3974_v24 }
 0x1a2   : > { %4642 = vtanh.f32 %v1969_v10  ;;  %v1972_v6 = vadd.f32 %v4337_v8, %v6347_v31  ;;  %v6362_v26 = vpop.permute.xlu1 %3035  ;;  %v6364_v53 = vpop.permute.xlu0 %3030  ;;  %v2228_v37 = vadd.f32 %v4401_v46, %v6347_v31  ;;  %v2710_v8 = vld [vmem:[%s5556_s26 + $0x378] sm:$0xff]  ;;  %v3939_v59 = vadd.f32 %v3938_v36, %v3937_v40 }
 0x1a3   : > { %6847 = vst [vmem:[#allocation39_spill] sm:$0xff] %v6362_v26  ;;  %6848 = vst [vmem:[#allocation40_spill] sm:$0xff] %v6364_v53  ;;  %4644 = vtanh.f32 %v2225_v16  ;;  %v1963_v52 = vpop.f32.mrb[3].mxu0  ;;  %v2219_v9 = vpop.f32.mrb[3].mxu1  ;;  %3360 = vperm.xlu1 %4569, %v2725_v11   ;;  %3280 = vperm.xlu0 %4568, %v2709_v0   ;;  %v3977_v46 = vsel %vm3690_vm1, %v2725_v11, 0.0 }
 0x1a4   : > { %4646 = vtanh.f32 %v1961_v58  ;;  %v1964_v10 = vadd.f32 %v6347_v31, %v1963_v52  ;;  %v2220_v26 = vadd.f32 %v6347_v31, %v2219_v9  ;;  %v3940_v52 = vsel %vm3690_vm1, %v2709_v0, 0.0 }
 0x1a5   : > { %4648 = vtanh.f32 %v2217_v3  ;;  %v3978_v36 = vadd.f32 %v3977_v46, %v3976_v48  ;;  %v3941_v0 = vadd.f32 %v3940_v52, %v3939_v59 }
 0x1a6   : > { %4650 = vtanh.f32 %v1972_v6  ;;  %v6373_v42 = vpop.permute.xlu1 %3045  ;;  %v6375_v16 = vpop.permute.xlu0 %3040 }
 0x1a7   : > { %6849 = vst [vmem:[#allocation41_spill] sm:$0xff] %v6373_v42  ;;  %6850 = vst [vmem:[#allocation42_spill] sm:$0xff] %v6375_v16  ;;  %4652 = vtanh.f32 %v2228_v37  ;;  %3365 = vperm.xlu1 %4569, %v2726_v21   ;;  %3285 = vperm.xlu0 %4568, %v2710_v8   ;;  %v4340_v61 = vpop.f32.mrb[4].mxu0  ;;  %v4404_v58 = vpop.f32.mrb[4].mxu1 }
 0x1a8   : > { %4654 = vtanh.f32 %v1964_v10  ;;  %v1985_v3 = vadd.f32 %v4340_v61, %v6347_v31  ;;  %v2241_v41 = vadd.f32 %v4404_v58, %v6347_v31  ;;  %v1976_v24 = vpop.f32.mrb[5].mxu0  ;;  %v2232_v6 = vpop.f32.mrb[5].mxu1  ;;  %v3979_v61 = vsel %vm3690_vm1, %v2726_v21, 0.0 }
 0x1a9   : > { %4656 = vtanh.f32 %v2220_v26  ;;  %v1977_v9 = vadd.f32 %v6347_v31, %v1976_v24  ;;  %v2233_v40 = vadd.f32 %v6347_v31, %v2232_v6  ;;  %v4341_v37 = vpop.f32.mrb[6].mxu0  ;;  %v4405_v11 = vpop.f32.mrb[6].mxu1  ;;  %v3942_v24 = vsel %vm3690_vm1, %v2710_v8, 0.0 }
 0x1aa   : > { %4658 = vtanh.f32 %v1985_v3  ;;  %v1988_v42 = vadd.f32 %v4341_v37, %v6347_v31  ;;  %v3056_v10 = vpop.permute.xlu1 %3055  ;;  %v3051_v16 = vpop.permute.xlu0 %3050  ;;  %v2244_v58 = vadd.f32 %v4405_v11, %v6347_v31  ;;  %v3980_v37 = vadd.f32 %v3979_v61, %v3978_v36 }
 0x1ab   : > { %4660 = vtanh.f32 %v2241_v41  ;;  %v1979_v53 = vpop.f32.mrb[7].mxu0  ;;  %v2235_v26 = vpop.f32.mrb[7].mxu1  ;;  %v6389_v41 = vadd.f32 %v3942_v24, %v3941_v0 }
 0x1ac   : > { %v4643_v14 = vpop.eup %4642  ;;  %4662 = vtanh.f32 %v1977_v9  ;;  %v1980_v6 = vadd.f32 %v6347_v31, %v1979_v53  ;;  %v2236_v46 = vadd.f32 %v6347_v31, %v2235_v26 }
 0x1ad   : > { %v4645_v48 = vpop.eup %4644  ;;  %4664 = vtanh.f32 %v2233_v40 }
 0x1ae   : > { %v4647_v3 = vpop.eup %4646  ;;  %4666 = vtanh.f32 %v1988_v42  ;;  %v3066_v59 = vpop.permute.xlu1 %3065 }
 0x1af   : > { %v3061_v21 = vpop.permute.xlu0 %3060  ;;  %v4649_v52 = vpop.eup %4648  ;;  %4668 = vtanh.f32 %v2244_v58 }
 0x1b0   : > { %v3434_v11 = vmul.f32 %v4645_v48, %v3061_v21  ;;  %v4344_v29 = vpop.f32.mrb[8].mxu0  ;;  %v4408_v30 = vpop.f32.mrb[8].mxu1  ;;  %v3432_v9 = vmul.f32 %v4649_v52, %v3051_v16  ;;  %4670 = vtanh.f32 %v1980_v6  ;;  %v3981_v48 = vrot.slane %v3980_v37, 4 }
 0x1b1   : > { %v4651_v8 = vpop.eup %4650  ;;  %v2001_v53 = vadd.f32 %v4344_v29, %v6347_v31  ;;  %v2257_v40 = vadd.f32 %v4408_v30, %v6347_v31  ;;  %v1992_v26 = vpop.f32.mrb[9].mxu0  ;;  %4672 = vtanh.f32 %v2236_v46  ;;  %v3368_v30 = vmul.f32 %v4647_v3, %v6121_v45 }
 0x1b2   : > { %v2248_v13 = vpop.f32.mrb[9].mxu1  ;;  %v4653_v36 = vpop.eup %4652  ;;  %v1993_v42 = vadd.f32 %v6347_v31, %v1992_v26  ;;  %v3371_v3 = vmul.f32 %v4651_v8, %v6137_v7 }
 0x1b3   : > { %v2249_v0 = vadd.f32 %v6347_v31, %v2248_v13  ;;  %v4345_v61 = vpop.f32.mrb[10].mxu0  ;;  %v4409_v58 = vpop.f32.mrb[10].mxu1  ;;  %v3435_v21 = vmul.f32 %v4653_v36, %v3066_v59  ;;  %4674 = vtanh.f32 %v2001_v53  ;;  %v3370_v36 = vmul.f32 %v4643_v14, %v6119_v12 }
 0x1b4   : > { %v4655_v24 = vpop.eup %4654  ;;  %v2004_v16 = vadd.f32 %v4345_v61, %v6347_v31  ;;  %v3076_v6 = vpop.permute.xlu1 %3075  ;;  %4676 = vtanh.f32 %v2257_v40  ;;  %v2260_v46 = vadd.f32 %v4409_v58, %v6347_v31  ;;  %v6404_v40 = vadd.f32 %v3981_v48, %v3980_v37 }
 0x1b5   : > { %v3071_v29 = vpop.permute.xlu0 %3070  ;;  %v4657_v52 = vpop.eup %4656  ;;  %v3369_v62 = vmul.f32 %v4655_v24, %v6139_v57  ;;  %4678 = vtanh.f32 %v1993_v42 }
 0x1b6   : > { %v1995_v26 = vpop.f32.mrb[11].mxu0  ;;  %v2251_v13 = vpop.f32.mrb[11].mxu1  ;;  %v3433_v43 = vmul.f32 %v4657_v52, %v3056_v10  ;;  %4680 = vtanh.f32 %v2249_v0 }
 0x1b7   : > { %v4659_v44 = vpop.eup %4658  ;;  %v1996_v59 = vadd.f32 %v6347_v31, %v1995_v26  ;;  %v3496_v61 = vadd.f32 %v3369_v62, %v3368_v30  ;;  %v2252_v45 = vadd.f32 %v6347_v31, %v2251_v13  ;;  %4682 = vtanh.f32 %v2004_v16  ;;  %v4348_v12 = vpop.f32.mrb[12].mxu0 }
 0x1b8   : > { %v4661_v53 = vpop.eup %4660  ;;  %v3580_v58 = vadd.f32 %v3433_v43, %v3432_v9  ;;  %v3086_v24 = vpop.permute.xlu1 %3085  ;;  %4684 = vtanh.f32 %v2260_v46  ;;  %v2017_v7 = vadd.f32 %v4348_v12, %v6347_v31  ;;  %v3374_v9 = vmul.f32 %v4659_v44, %v6155_v27 }
 0x1b9   : > { %v4663_v57 = vpop.eup %4662  ;;  %v3081_v19 = vpop.permute.xlu0 %3080  ;;  %v3497_v42 = vadd.f32 %v3496_v61, %v3370_v36  ;;  %4686 = vtanh.f32 %v1996_v59 }
 0x1ba   : > { %v4665_v10 = vpop.eup %4664  ;;  %v3372_v52 = vmul.f32 %v4663_v57, %v6149_v23  ;;  %v3438_v26 = vmul.f32 %v4661_v53, %v3081_v19  ;;  %v4412_v62 = vpop.f32.mrb[12].mxu1  ;;  %v3581_v0 = vadd.f32 %v3580_v58, %v3434_v11  ;;  %4688 = vtanh.f32 %v2252_v45 }
 0x1bb   : > { %v4667_v14 = vpop.eup %4666  ;;  %v3436_v30 = vmul.f32 %v4665_v10, %v3071_v29  ;;  %v2008_v37 = vpop.f32.mrb[13].mxu0  ;;  %v3498_v48 = vadd.f32 %v3497_v42, %v3371_v3  ;;  %v2273_v16 = vadd.f32 %v4412_v62, %v6347_v31  ;;  %4690 = vtanh.f32 %v2017_v7 }
 0x1bc   : > { %v2264_v8 = vpop.f32.mrb[13].mxu1  ;;  %v4669_v43 = vpop.eup %4668  ;;  %v3582_v13 = vadd.f32 %v3581_v0, %v3435_v21  ;;  %v2009_v11 = vadd.f32 %v6347_v31, %v2008_v37  ;;  %v3375_v42 = vmul.f32 %v4667_v14, %v6153_v15 }
 0x1bd   : > { %v4349_v23 = vpop.f32.mrb[14].mxu0  ;;  %v4413_v46 = vpop.f32.mrb[14].mxu1  ;;  %v3439_v53 = vmul.f32 %v4669_v43, %v3086_v24  ;;  %v3499_v61 = vadd.f32 %v3498_v48, %v3372_v52  ;;  %4692 = vtanh.f32 %v2273_v16  ;;  %v2265_v27 = vadd.f32 %v6347_v31, %v2264_v8 }
 0x1be   : > { %v4671_v19 = vpop.eup %4670  ;;  %v3096_v29 = vpop.permute.xlu1 %3095  ;;  %v3583_v10 = vadd.f32 %v3582_v13, %v3436_v30  ;;  %4694 = vtanh.f32 %v2009_v11  ;;  %v2020_v21 = vadd.f32 %v4349_v23, %v6347_v31  ;;  %v2276_v52 = vadd.f32 %v4413_v46, %v6347_v31 }
 0x1bf   : > { %v3091_v59 = vpop.permute.xlu0 %3090  ;;  %v4673_v36 = vpop.eup %4672  ;;  %v3373_v57 = vmul.f32 %v4671_v19, %v6147_v22  ;;  %4696 = vtanh.f32 %v2265_v27 }
 0x1c0   : > { %v2011_v44 = vpop.f32.mrb[15].mxu0  ;;  %v2267_v45 = vpop.f32.mrb[15].mxu1  ;;  %v3437_v58 = vmul.f32 %v4673_v36, %v3076_v6  ;;  %4698 = vtanh.f32 %v2020_v21 }
 0x1c1   : > { %v4675_v3 = vpop.eup %4674  ;;  %v3500_v12 = vadd.f32 %v3499_v61, %v3373_v57  ;;  %v2012_v0 = vadd.f32 %v6347_v31, %v2011_v44  ;;  %v2268_v7 = vadd.f32 %v6347_v31, %v2267_v45  ;;  %4700 = vtanh.f32 %v2276_v52  ;;  %v4352_v15 = vpop.f32.mrb[16].mxu0 }
 0x1c2   : > { %v4677_v24 = vpop.eup %4676  ;;  %v3584_v22 = vadd.f32 %v3583_v10, %v3437_v58  ;;  %v3106_v37 = vpop.permute.xlu1 %3105  ;;  %v2033_v19 = vadd.f32 %v4352_v15, %v6347_v31  ;;  %v3378_v61 = vmul.f32 %v4675_v3, %v6171_v38 }
 0x1c3   : > { %v4679_v62 = vpop.eup %4678  ;;  %v3101_v6 = vpop.permute.xlu0 %3100  ;;  %v3501_v8 = vadd.f32 %v3500_v12, %v3374_v9  ;;  %4702 = vtanh.f32 %v2012_v0 }
 0x1c4   : > { %v4681_v30 = vpop.eup %4680  ;;  %v3376_v43 = vmul.f32 %v4679_v62, %v6165_v54  ;;  %v3442_v48 = vmul.f32 %v4677_v24, %v3101_v6  ;;  %v4416_v14 = vpop.f32.mrb[16].mxu1  ;;  %v3585_v23 = vadd.f32 %v3584_v22, %v3438_v26  ;;  %4704 = vtanh.f32 %v2268_v7 }
 0x1c5   : > { %v4683_v16 = vpop.eup %4682  ;;  %v3440_v46 = vmul.f32 %v4681_v30, %v3091_v59  ;;  %v2024_v13 = vpop.f32.mrb[17].mxu0  ;;  %v3502_v57 = vadd.f32 %v3501_v8, %v3375_v42  ;;  %v2289_v9 = vadd.f32 %v4416_v14, %v6347_v31  ;;  %4706 = vtanh.f32 %v2033_v19 }
 0x1c6   : > { %v2280_v11 = vpop.f32.mrb[17].mxu1  ;;  %v4685_v36 = vpop.eup %4684  ;;  %v3586_v45 = vadd.f32 %v3585_v23, %v3439_v53  ;;  %v2025_v26 = vadd.f32 %v6347_v31, %v2024_v13  ;;  %v3379_v7 = vmul.f32 %v4683_v16, %v6169_v35 }
 0x1c7   : > { %v4353_v54 = vpop.f32.mrb[18].mxu0  ;;  %v4417_v27 = vpop.f32.mrb[18].mxu1  ;;  %v3443_v58 = vmul.f32 %v4685_v36, %v3106_v37  ;;  %v3503_v24 = vadd.f32 %v3502_v57, %v3376_v43  ;;  %4708 = vtanh.f32 %v2289_v9  ;;  %v2281_v38 = vadd.f32 %v6347_v31, %v2280_v11 }
 0x1c8   : > { %v4687_v44 = vpop.eup %4686  ;;  %v3116_v59 = vpop.permute.xlu1 %3115  ;;  %v3587_v22 = vadd.f32 %v3586_v45, %v3440_v46  ;;  %4710 = vtanh.f32 %v2025_v26  ;;  %v2036_v53 = vadd.f32 %v4353_v54, %v6347_v31  ;;  %v2292_v6 = vadd.f32 %v4417_v27, %v6347_v31 }
 0x1c9   : > { %v3111_v10 = vpop.permute.xlu0 %3110  ;;  %v4689_v21 = vpop.eup %4688  ;;  %v3377_v12 = vmul.f32 %v4687_v44, %v6163_v18  ;;  %4712 = vtanh.f32 %v2281_v38  ;;  %v6851_v44 = vrot.slane %v6389_v41, 4 }
 0x1ca   : > { %v2027_v3 = vpop.f32.mrb[19].mxu0  ;;  %v2283_v42 = vpop.f32.mrb[19].mxu1  ;;  %v3441_v62 = vmul.f32 %v4689_v21, %v3096_v29  ;;  %4714 = vtanh.f32 %v2036_v53 }
 0x1cb   : > { %v4691_v52 = vpop.eup %4690  ;;  %v3504_v37 = vadd.f32 %v3503_v24, %v3377_v12  ;;  %v2028_v8 = vadd.f32 %v6347_v31, %v2027_v3  ;;  %v2284_v43 = vadd.f32 %v6347_v31, %v2283_v42  ;;  %4716 = vtanh.f32 %v2292_v6  ;;  %v4356_v35 = vpop.f32.mrb[20].mxu0 }
 0x1cc   : > { %v4693_v0 = vpop.eup %4692  ;;  %v3588_v18 = vadd.f32 %v3587_v22, %v3441_v62  ;;  %v3126_v15 = vpop.permute.xlu1 %3125  ;;  %v2049_v57 = vadd.f32 %v4356_v35, %v6347_v31  ;;  %v6435_v45 = vadd.f32 %v6851_v44, %v6389_v41 }
 0x1cd   : > { %v4695_v30 = vpop.eup %4694  ;;  %v3121_v29 = vpop.permute.xlu0 %3120  ;;  %v3505_v23 = vadd.f32 %v3504_v37, %v3378_v61  ;;  %4718 = vtanh.f32 %v2028_v8 }
 0x1ce   : > { %v4697_v14 = vpop.eup %4696  ;;  %v3380_v46 = vmul.f32 %v4695_v30, %v6182_v63  ;;  %v3446_v19 = vmul.f32 %v4693_v0, %v3121_v29  ;;  %v4420_v16 = vpop.f32.mrb[20].mxu1  ;;  %v3589_v11 = vadd.f32 %v3588_v18, %v3442_v48  ;;  %4720 = vtanh.f32 %v2284_v43 }
 0x1cf   : > { %v4699_v13 = vpop.eup %4698  ;;  %v3444_v36 = vmul.f32 %v4697_v14, %v3111_v10  ;;  %v2040_v9 = vpop.f32.mrb[21].mxu0  ;;  %v3506_v61 = vadd.f32 %v3505_v23, %v3379_v7  ;;  %v2305_v63 = vadd.f32 %v4420_v16, %v6347_v31  ;;  %4722 = vtanh.f32 %v2049_v57 }
 0x1d0   : > { %v2296_v54 = vpop.f32.mrb[21].mxu1  ;;  %v4701_v27 = vpop.eup %4700  ;;  %v3590_v48 = vadd.f32 %v3589_v11, %v3443_v58  ;;  %v2041_v12 = vadd.f32 %v6347_v31, %v2040_v9  ;;  %v3382_v18 = vmul.f32 %v4691_v52, %v6188_v20  ;;  %v3383_v35 = vmul.f32 %v4699_v13, %v6186_v51 }
 0x1d1   : > { %v4357_v26 = vpop.f32.mrb[22].mxu0  ;;  %v4421_v21 = vpop.f32.mrb[22].mxu1  ;;  %v3447_v10 = vmul.f32 %v4701_v27, %v3126_v15  ;;  %v3507_v62 = vadd.f32 %v3506_v61, %v3380_v46  ;;  %4724 = vtanh.f32 %v2305_v63  ;;  %v2297_v41 = vadd.f32 %v6347_v31, %v2296_v54 }
 0x1d2   : > { %v4703_v24 = vpop.eup %4702  ;;  %v3136_v38 = vpop.permute.xlu1 %3135  ;;  %v3591_v6 = vadd.f32 %v3590_v48, %v3444_v36  ;;  %4726 = vtanh.f32 %v2041_v12  ;;  %v2052_v58 = vadd.f32 %v4357_v26, %v6347_v31  ;;  %v2308_v43 = vadd.f32 %v4421_v21, %v6347_v31 }
 0x1d3   : > { %v3131_v3 = vpop.permute.xlu0 %3130  ;;  %v4705_v42 = vpop.eup %4704  ;;  %v3381_v22 = vmul.f32 %v4703_v24, %v6180_v1  ;;  %4728 = vtanh.f32 %v2297_v41  ;;  %v3983_v27 = vrot.slane %v6404_v40, 2  ;;  %v3946_v44 = vrot.slane %v6435_v45, 2 }
 0x1d4   : > { %v2043_v53 = vpop.f32.mrb[23].mxu0  ;;  %v2299_v0 = vpop.f32.mrb[23].mxu1  ;;  %v3445_v37 = vmul.f32 %v4705_v42, %v3116_v59  ;;  %4730 = vtanh.f32 %v2052_v58 }
 0x1d5   : > { %v4707_v7 = vpop.eup %4706  ;;  %v3508_v8 = vadd.f32 %v3507_v62, %v3381_v22  ;;  %v2044_v29 = vadd.f32 %v6347_v31, %v2043_v53  ;;  %v2300_v14 = vadd.f32 %v6347_v31, %v2299_v0  ;;  %4732 = vtanh.f32 %v2308_v43  ;;  %v4360_v11 = vpop.f32.mrb[24].mxu0 }
 0x1d6   : > { %v4709_v30 = vpop.eup %4708  ;;  %v3592_v1 = vadd.f32 %v3591_v6, %v3445_v37  ;;  %v3146_v23 = vpop.permute.xlu1 %3145  ;;  %v3386_v51 = vmul.f32 %v4707_v7, %v6200_v55  ;;  %v2065_v24 = vadd.f32 %v4360_v11, %v6347_v31 }
 0x1d7   : > { %v4711_v15 = vpop.eup %4710  ;;  %v3141_v59 = vpop.permute.xlu0 %3140  ;;  %v3509_v16 = vadd.f32 %v3508_v8, %v3382_v18  ;;  %4734 = vtanh.f32 %v2044_v29 }
 0x1d8   : > { %v4713_v46 = vpop.eup %4712  ;;  %v4424_v20 = vpop.f32.mrb[24].mxu1  ;;  %v3593_v36 = vadd.f32 %v3592_v1, %v3446_v19  ;;  %4736 = vtanh.f32 %v2300_v14  ;;  %v3384_v62 = vmul.f32 %v4711_v15, %v6194_v4  ;;  %v3450_v43 = vmul.f32 %v4709_v30, %v3141_v59 }
 0x1d9   : > { %v4715_v52 = vpop.eup %4714  ;;  %v2056_v57 = vpop.f32.mrb[25].mxu0  ;;  %v3510_v61 = vadd.f32 %v3509_v16, %v3383_v35  ;;  %v3448_v41 = vmul.f32 %v4713_v46, %v3131_v3  ;;  %v2321_v7 = vadd.f32 %v4424_v20, %v6347_v31 }
 0x1da   : > { %v2312_v9 = vpop.f32.mrb[25].mxu1  ;;  %v4717_v54 = vpop.eup %4716  ;;  %v6450_v13 = vadd.f32 %v3593_v36, %v3447_v10  ;;  %v2057_v19 = vadd.f32 %v6347_v31, %v2056_v57  ;;  %v3387_v18 = vmul.f32 %v4715_v52, %v6198_v5 }
 0x1db   : > { %v4361_v63 = vpop.f32.mrb[26].mxu0  ;;  %v4425_v26 = vpop.f32.mrb[26].mxu1  ;;  %v2313_v53 = vadd.f32 %v6347_v31, %v2312_v9  ;;  %v3511_v55 = vrot.slane %v3510_v61, 4  ;;  %v6466_v9 = vadd.f32 %v3983_v27, %v6404_v40 }
 0x1dc   : > { %v4719_v21 = vpop.eup %4718  ;;  %v3156_v48 = vpop.permute.xlu1 %3155  ;;  %4738 = vtanh.f32 %v2057_v19  ;;  %v2068_v3 = vadd.f32 %v4361_v63, %v6347_v31  ;;  %v2324_v35 = vadd.f32 %v4425_v26, %v6347_v31 }
 0x1dd   : > { %v3151_v12 = vpop.permute.xlu0 %3150  ;;  %v4721_v42 = vpop.eup %4720  ;;  %v3385_v22 = vmul.f32 %v4719_v21, %v6192_v60  ;;  %4740 = vtanh.f32 %v2313_v53  ;;  %v3451_v60 = vmul.f32 %v4717_v54, %v3146_v23  ;;  %v6463_v59 = vadd.f32 %v3511_v55, %v3510_v61 }
 0x1de   : > { %v2059_v0 = vpop.f32.mrb[27].mxu0  ;;  %v2315_v37 = vpop.f32.mrb[27].mxu1  ;;  %v3449_v10 = vmul.f32 %v4721_v42, %v3136_v38  ;;  %4742 = vtanh.f32 %v2065_v24  ;;  %v6469_v21 = vadd.f32 %v3946_v44, %v6435_v45 }
 0x1df   : > { %v4723_v6 = vpop.eup %4722  ;;  %v3517_v8 = vadd.f32 %v3385_v22, %v3384_v62  ;;  %v2060_v16 = vadd.f32 %v6347_v31, %v2059_v0  ;;  %v4364_v5 = vpop.f32.mrb[28].mxu0  ;;  %4744 = vtanh.f32 %v2321_v7 }
 0x1e0   : > { %v4725_v58 = vpop.eup %4724  ;;  %v3601_v15 = vadd.f32 %v3449_v10, %v3448_v41  ;;  %v3166_v1 = vpop.permute.xlu1 %3165  ;;  %v3390_v42 = vmul.f32 %v4723_v6, %v6212_v2  ;;  %v3513_v41 = vrot.slane %v6463_v59, 2  ;;  %v2081_v55 = vadd.f32 %v4364_v5, %v6347_v31 }
 0x1e1   : > { %v4727_v4 = vpop.eup %4726  ;;  %v3161_v29 = vpop.permute.xlu0 %3160  ;;  %v3518_v46 = vadd.f32 %v3517_v8, %v3386_v51  ;;  %4746 = vtanh.f32 %v2060_v16  ;;  %v2316_v51 = vadd.f32 %v6347_v31, %v2315_v37 }
 0x1e2   : > { %v4729_v14 = vpop.eup %4728  ;;  %v3388_v38 = vmul.f32 %v4727_v4, %v6206_v39  ;;  %v4428_v11 = vpop.f32.mrb[28].mxu1  ;;  %v3602_v20 = vadd.f32 %v3601_v15, %v3450_v43  ;;  %4748 = vtanh.f32 %v2068_v3  ;;  %v3454_v7 = vmul.f32 %v4725_v58, %v3161_v29 }
 0x1e3   : > { %v4731_v30 = vpop.eup %4730  ;;  %v3452_v23 = vmul.f32 %v4729_v14, %v3151_v12  ;;  %v2072_v52 = vpop.f32.mrb[29].mxu0  ;;  %v3519_v54 = vadd.f32 %v3518_v46, %v3387_v18  ;;  %4750 = vtanh.f32 %v2324_v35  ;;  %v2337_v6 = vadd.f32 %v4428_v11, %v6347_v31 }
 0x1e4   : > { %v2328_v36 = vpop.f32.mrb[29].mxu1  ;;  %v4733_v57 = vpop.eup %4732  ;;  %v3603_v61 = vadd.f32 %v3602_v20, %v3451_v60  ;;  %4752 = vtanh.f32 %v2316_v51  ;;  %v3391_v53 = vmul.f32 %v4731_v30, %v6210_v56 }
 0x1e5   : > { %v4365_v39 = vpop.f32.mrb[30].mxu0  ;;  %v4429_v63 = vpop.f32.mrb[30].mxu1  ;;  %v3520_v40 = vadd.f32 %v3519_v54, %v3388_v38  ;;  %v3455_v37 = vmul.f32 %v4733_v57, %v3166_v1  ;;  %4754 = vtanh.f32 %v2081_v55  ;;  %v2329_v56 = vadd.f32 %v6347_v31, %v2328_v36 }
 0x1e6   : > { %v4735_v26 = vpop.eup %4734  ;;  %v6472_v24 = vpop.permute.xlu1 %3175  ;;  %v3604_v44 = vadd.f32 %v3603_v61, %v3452_v23  ;;  %4756 = vtanh.f32 %v2337_v6  ;;  %v2084_v1 = vadd.f32 %v4365_v39, %v6347_v31  ;;  %v2340_v29 = vadd.f32 %v4429_v63, %v6347_v31 }
 0x1e7   : > { %v3171_v19 = vpop.permute.xlu0 %3170  ;;  %v4737_v12 = vpop.eup %4736  ;;  %v3389_v27 = vmul.f32 %v4735_v26, %v6204_v49  ;;  %v2073_v49 = vadd.f32 %v6347_v31, %v2072_v52  ;;  %v3985_v38 = vrot.slane %v6466_v9, 1  ;;  %v3948_v54 = vrot.slane %v6469_v21, 1 }
 0x1e8   : > { %v2075_v62 = vpop.f32.mrb[31].mxu0  ;;  %v2331_v22 = vpop.f32.mrb[31].mxu1  ;;  %v3453_v45 = vmul.f32 %v4737_v12, %v3156_v48  ;;  %v6498_v39 = vadd.f32 %v3513_v41, %v6463_v59 }
 0x1e9   : > { %v3521_v0 = vadd.f32 %v3520_v40, %v3389_v27  ;;  %v4739_v10 = vpop.eup %4738  ;;  %v4368_v15 = vpop.f32.mrb[32].mxu0  ;;  %4758 = vtanh.f32 %v2073_v49  ;;  %v2076_v20 = vadd.f32 %v6347_v31, %v2075_v62  ;;  %v2332_v23 = vadd.f32 %v6347_v31, %v2331_v22 }
 0x1ea   : > { %v3605_v2 = vadd.f32 %v3604_v44, %v3453_v45  ;;  %v6481_v18 = vpop.permute.xlu1 %3185  ;;  %v4741_v48 = vpop.eup %4740  ;;  %v3392_v4 = vmul.f32 %v4739_v10, %v6218_v17  ;;  %4760 = vtanh.f32 %v2329_v56  ;;  %v6503_v27 = vadd.f32 %v3985_v38, %v6466_v9 }
 0x1eb   : > { %v6483_v8 = vpop.permute.xlu0 %3180  ;;  %v3522_v43 = vadd.f32 %v3521_v0, %v3390_v42  ;;  %v4432_v60 = vpop.f32.mrb[32].mxu1  ;;  %v3456_v16 = vmul.f32 %v4741_v48, %v3171_v19  ;;  %4762 = vtanh.f32 %v2084_v1  ;;  %v2097_v42 = vadd.f32 %v4368_v15, %v6347_v31 }
 0x1ec   : > { %v4743_v3 = vpop.eup %4742  ;;  %v3606_v58 = vadd.f32 %v3605_v2, %v3454_v7  ;;  %v2088_v14 = vpop.f32.mrb[33].mxu0  ;;  %4764 = vtanh.f32 %v2340_v29  ;;  %v2353_v62 = vadd.f32 %v4432_v60, %v6347_v31  ;;  %v3515_v0 = vrot.slane %v6498_v39, 1 }
 0x1ed   : > { %v2344_v46 = vpop.f32.mrb[33].mxu1  ;;  %v3523_v35 = vadd.f32 %v3522_v43, %v3391_v53  ;;  %v4369_v17 = vpop.f32.mrb[34].mxu0  ;;  %4766 = vtanh.f32 %v2076_v20  ;;  %v3394_v22 = vmul.f32 %v4743_v3, %v6224_v32  ;;  %v2089_v45 = vadd.f32 %v6347_v31, %v2088_v14 }
 0x1ee   : > { %v4433_v5 = vpop.f32.mrb[34].mxu1  ;;  %v4745_v11 = vpop.eup %4744  ;;  %v3607_v30 = vadd.f32 %v3606_v58, %v3455_v37  ;;  %4768 = vtanh.f32 %v2332_v23  ;;  %v6511_v53 = vadd.f32 %v3948_v54, %v6469_v21  ;;  %v2345_v37 = vadd.f32 %v6347_v31, %v2344_v46 }
 0x1ef   : > { %v6492_v52 = vpop.permute.xlu1 %3195  ;;  %v6494_v36 = vpop.permute.xlu0 %3190  ;;  %v3524_v63 = vadd.f32 %v3523_v35, %v3392_v4  ;;  %4770 = vtanh.f32 %v2097_v42  ;;  %v2100_v2 = vadd.f32 %v4369_v17, %v6347_v31  ;;  %v3458_v21 = vmul.f32 %v4745_v11, %v6483_v8 }
 0x1f0   : > { %v4747_v57 = vpop.eup %4746  ;;  %v2091_v26 = vpop.f32.mrb[35].mxu0  ;;  %v3608_v12 = vadd.f32 %v3607_v30, %v3456_v16  ;;  %4772 = vtanh.f32 %v2353_v62  ;;  %v2356_v8 = vadd.f32 %v4433_v5, %v6347_v31 }
 0x1f1   : > { %v2347_v61 = vpop.f32.mrb[35].mxu1  ;;  %v4749_v51 = vpop.eup %4748  ;;  %v3393_v19 = vmul.f32 %v4747_v57, %v6216_v33  ;;  %v2092_v4 = vadd.f32 %v6347_v31, %v2091_v26  ;;  %4774 = vtanh.f32 %v2089_v45 }
 0x1f2   : > { %v4751_v40 = vpop.eup %4750  ;;  %v4372_v55 = vpop.f32.mrb[36].mxu0  ;;  %v3395_v32 = vmul.f32 %v4749_v51, %v6222_v28  ;;  %v2348_v28 = vadd.f32 %v6347_v31, %v2347_v61  ;;  %4776 = vtanh.f32 %v2345_v37 }
 0x1f3   : > { %v4753_v59 = vpop.eup %4752  ;;  %v3525_v41 = vadd.f32 %v3524_v63, %v3393_v19  ;;  %v6508_v44 = vpop.permute.xlu1 %3205  ;;  %v3459_v3 = vmul.f32 %v4751_v40, %v6481_v18  ;;  %v2113_v46 = vadd.f32 %v4372_v55, %v6347_v31  ;;  %4778 = vtanh.f32 %v2100_v2 }
 0x1f4   : > { %v3201_v33 = vpop.permute.xlu0 %3200  ;;  %v3457_v9 = vmul.f32 %v4753_v59, %v6472_v24  ;;  %v4436_v10 = vpop.f32.mrb[36].mxu1  ;;  %4780 = vtanh.f32 %v2092_v4 }
 0x1f5   : > { %v3526_v7 = vadd.f32 %v3525_v41, %v3394_v22  ;;  %v2104_v6 = vpop.f32.mrb[37].mxu0  ;;  %v2360_v49 = vpop.f32.mrb[37].mxu1  ;;  %v2369_v11 = vadd.f32 %v4436_v10, %v6347_v31  ;;  %4782 = vtanh.f32 %v2348_v28 }
 0x1f6   : > { %v4755_v48 = vpop.eup %4754  ;;  %v3609_v43 = vadd.f32 %v3608_v12, %v3457_v9  ;;  %v4373_v24 = vpop.f32.mrb[38].mxu0  ;;  %v2105_v18 = vadd.f32 %v6347_v31, %v2104_v6  ;;  %v2361_v57 = vadd.f32 %v6347_v31, %v2360_v49  ;;  %4784 = vtanh.f32 %v2356_v8 }
 0x1f7   : > { %v4437_v56 = vpop.f32.mrb[38].mxu1  ;;  %v4757_v15 = vpop.eup %4756  ;;  %v3527_v60 = vadd.f32 %v3526_v7, %v3395_v32  ;;  %v3398_v54 = vmul.f32 %v4755_v48, %v6236_v34  ;;  %v2116_v26 = vadd.f32 %v4373_v24, %v6347_v31 }
 0x1f8   : > { %v6522_v58 = vpop.permute.xlu1 %3215  ;;  %v6524_v1 = vpop.permute.xlu0 %3210  ;;  %v3610_v14 = vadd.f32 %v3609_v43, %v3458_v21  ;;  %v3462_v12 = vmul.f32 %v4757_v15, %v3201_v33  ;;  %4786 = vtanh.f32 %v2105_v18  ;;  %v3689_v15 = vld [vmem:[#allocation3] sm:$0xff]  ;;  %v6854_v18 = vld [vmem:[#allocation12_spill] sm:$0xff] }
 0x1f9   : > { %v4759_v29 = vpop.eup %4758  ;;  %v2107_v38 = vpop.f32.mrb[39].mxu0  ;;  %4788 = vtanh.f32 %v2113_v46 }
 0x1fa   : > { %v2363_v35 = vpop.f32.mrb[39].mxu1  ;;  %v4761_v16 = vpop.eup %4760  ;;  %v3396_v17 = vmul.f32 %v4759_v29, %v6230_v25  ;;  %v3611_v23 = vadd.f32 %v3610_v14, %v3459_v3  ;;  %v2108_v34 = vadd.f32 %v6347_v31, %v2107_v38  ;;  %4790 = vtanh.f32 %v2369_v11  ;;  %v6853_v3 = vld [vmem:[#allocation14_spill] sm:$0xff] }
 0x1fb   : > { %v4763_v30 = vpop.eup %4762  ;;  %v3460_v20 = vmul.f32 %v4761_v16, %v6494_v36  ;;  %v2372_v36 = vadd.f32 %v4437_v56, %v6347_v31  ;;  %v4376_v42 = vpop.f32.mrb[40].mxu0  ;;  %v2364_v33 = vadd.f32 %v6347_v31, %v2363_v35  ;;  %4792 = vtanh.f32 %v2116_v26 }
 0x1fc   : > { %v4765_v5 = vpop.eup %4764  ;;  %v3528_v63 = vadd.f32 %v3527_v60, %v3396_v17  ;;  %v6535_v25 = vpop.permute.xlu1 %3225  ;;  %v3399_v45 = vmul.f32 %v4763_v30, %v6234_v50  ;;  %v6553_v50 = vld [vmem:[%s6809_s3] ss:$0 sm:$0xff]  ;;  %4794 = vtanh.f32 %v2108_v34 }
 0x1fd   : > { %v6537_v61 = vpop.permute.xlu0 %3220  ;;  %v4767_v51 = vpop.eup %4766  ;;  %v3612_v19 = vadd.f32 %v3611_v23, %v3460_v20  ;;  %v3463_v7 = vmul.f32 %v4765_v5, %v6508_v44  ;;  %v2129_v31 = vadd.f32 %v6553_v50, %v4376_v42  ;;  %v6852_v44 = vld [vmem:[#allocation10_spill] sm:$0xff]  ;;  %4796 = vtanh.f32 %v2361_v57 }
 0x1fe   : > { %v4440_v40 = vpop.f32.mrb[40].mxu1  ;;  %v4769_v62 = vpop.eup %4768  ;;  %v3397_v59 = vmul.f32 %v4767_v51, %v6228_v47  ;;  %v4000_v21 = vsel %vm3682_vm7, %v6511_v53, %v6852_v44  ;;  %4798 = vtanh.f32 %v2372_v36 }
 0x1ff   : > { %v2120_v22 = vpop.f32.mrb[41].mxu0  ;;  %v2376_v41 = vpop.f32.mrb[41].mxu1  ;;  %v3461_v9 = vmul.f32 %v4769_v62, %v6492_v52  ;;  %v2385_v56 = vadd.f32 %v6553_v50, %v4440_v40  ;;  %v4001_v16 = vsel %vm3684_vm8, %v6503_v27, %v4000_v21  ;;  %4800 = vtanh.f32 %v2364_v33 }
 0x200   : > { %v4377_v37 = vpop.f32.mrb[42].mxu0  ;;  %v4441_v55 = vpop.f32.mrb[42].mxu1  ;;  %v3529_v32 = vadd.f32 %v3528_v63, %v3397_v59  ;;  %v2121_v24 = vadd.f32 %v6553_v50, %v2120_v22  ;;  %v2377_v14 = vadd.f32 %v6553_v50, %v2376_v41  ;;  %v4003_v57 = vadd.f32 %v4001_v16, %v3689_v15  ;;  %v6855_v63 = vld [vmem:[#allocation11_spill] sm:$0xff] }
 0x201   : > { %v4771_v10 = vpop.eup %4770  ;;  %v6546_v47 = vpop.permute.xlu1 %3295  ;;  %v3613_v49 = vadd.f32 %v3612_v19, %v3461_v9  ;;  %v2132_v53 = vadd.f32 %v6553_v50, %v4377_v37  ;;  %v6856_v37 = vld [vmem:[#allocation13_spill] sm:$0xff] }
 0x202   : > { %v6548_v2 = vpop.permute.xlu0 %3290  ;;  %v4773_v6 = vpop.eup %4772  ;;  %v3530_v4 = vadd.f32 %v3529_v32, %v3398_v54  ;;  %v3402_v28 = vmul.f32 %v4771_v10, %v6853_v3  ;;  %4802 = vtanh.f32 %v2121_v24  ;;  %4004 = vst.msk [vmem:[#allocation3] sm:$0xff] %vm3690_vm1, %v4003_v57 }
 0x203   : > { %v2123_v52 = vpop.f32.mrb[43].mxu0  ;;  %v6556_v48 = vpop.f32.mrb[43].mxu1  ;;  %v3614_v29 = vadd.f32 %v3613_v49, %v3462_v12  ;;  %v3466_v40 = vmul.f32 %v4773_v6, %v6537_v61  ;;  %4804 = vtanh.f32 %v2129_v31  ;;  %v6857_v31 = vld [vmem:[#allocation16_spill] sm:$0xff] }
 0x204   : > { %v4775_v43 = vpop.eup %4774  ;;  %v3531_v46 = vadd.f32 %v3530_v4, %v3399_v45  ;;  %v4380_v20 = vpop.f32.mrb[44].mxu0  ;;  %v2124_v51 = vadd.f32 %v6553_v50, %v2123_v52  ;;  %4806 = vtanh.f32 %v2385_v56  ;;  %v2388_v45 = vadd.f32 %v6553_v50, %v4441_v55 }
 0x205   : > { %v4777_v60 = vpop.eup %4776  ;;  %v6566_v38 = vpop.permute.xlu1 %3305  ;;  %v3400_v11 = vmul.f32 %v4775_v43, %v6854_v18  ;;  %v6573_v30 = vadd.f32 %v3614_v29, %v3463_v7  ;;  %4808 = vtanh.f32 %v2132_v53  ;;  %v2145_v61 = vadd.f32 %v6553_v50, %v4380_v20  ;;  %v6858_v29 = vld [vmem:[#allocation15_spill] sm:$0xff] }
 0x206   : > { %v4779_v8 = vpop.eup %4778  ;;  %v6568_v35 = vpop.permute.xlu0 %3300  ;;  %v3532_v54 = vrot.slane %v3531_v46, 4  ;;  %v3464_v42 = vmul.f32 %v4777_v60, %v6524_v1  ;;  %4810 = vtanh.f32 %v2124_v51  ;;  %v2380_v43 = vadd.f32 %v6553_v50, %v6556_v48 }
 0x207   : > { %v4781_v17 = vpop.eup %4780  ;;  %v4444_v23 = vpop.f32.mrb[44].mxu1  ;;  %v3403_v1 = vmul.f32 %v4779_v8, %v6856_v37  ;;  %4812 = vtanh.f32 %v2377_v14 }
 0x208   : > { %v4783_v5 = vpop.eup %4782  ;;  %v3401_v26 = vmul.f32 %v4781_v17, %v6855_v63  ;;  %v2136_v19 = vpop.f32.mrb[45].mxu0  ;;  %v3533_v22 = vadd.f32 %v3532_v54, %v3531_v46  ;;  %4814 = vtanh.f32 %v2388_v45  ;;  %v2401_v15 = vadd.f32 %v6553_v50, %v4444_v23 }
 0x209   : > { %v2392_v12 = vpop.f32.mrb[45].mxu1  ;;  %v4785_v36 = vpop.eup %4784  ;;  %v3465_v27 = vmul.f32 %v4783_v5, %v6522_v58  ;;  %v2137_v55 = vadd.f32 %v6553_v50, %v2136_v19  ;;  %4816 = vtanh.f32 %v2145_v61  ;;  %v6605_v17 = vadd.f32 %v3515_v0, %v6498_v39 }
 0x20a   : > { %v4381_v62 = vpop.f32.mrb[46].mxu0  ;;  %v6580_v59 = vpop.f32.mrb[46].mxu1  ;;  %v3538_v41 = vadd.f32 %v3401_v26, %v3400_v11  ;;  %v3534_v24 = vrot.slane %v3533_v22, 2  ;;  %v3467_v46 = vmul.f32 %v4785_v36, %v6535_v25  ;;  %v2393_v25 = vadd.f32 %v6553_v50, %v2392_v12  ;;  %v6859_v36 = vld [vmem:[#allocation18_spill] sm:$0xff] }
 0x20b   : > { %v4787_v34 = vpop.eup %4786  ;;  %v6584_v9 = vpop.permute.xlu1 %3310  ;;  %v3622_v10 = vadd.f32 %v3465_v27, %v3464_v42  ;;  %v2148_v14 = vadd.f32 %v6553_v50, %v4381_v62  ;;  %4818 = vtanh.f32 %v2137_v55  ;;  %v6860_v62 = vld [vmem:[#allocation17_spill] sm:$0xff] }
 0x20c   : > { %v3231_v33 = vpop.permute.xlu0 %3230  ;;  %v4789_v58 = vpop.eup %4788  ;;  %v3539_v49 = vadd.f32 %v3538_v41, %v3402_v28  ;;  %v3404_v52 = vmul.f32 %v4787_v34, %v6857_v31  ;;  %4820 = vtanh.f32 %v2380_v43  ;;  %v6609_v19 = vadd.f32 %v3534_v24, %v3533_v22  ;;  %v6861_v41 = vld [vmem:[#allocation20_spill] sm:$0xff]  ;;  %v6862_v24 = vld [vmem:[#allocation19_spill] sm:$0xff] }
 0x20d   : > { %v2139_v32 = vpop.f32.mrb[47].mxu0  ;;  %v2395_v7 = vpop.f32.mrb[47].mxu1  ;;  %v3623_v21 = vadd.f32 %v3622_v10, %v3466_v40  ;;  %v3406_v39 = vmul.f32 %v4789_v58, %v6859_v36  ;;  %v2404_v58 = vadd.f32 %v6553_v50, %v6580_v59 }
 0x20e   : > { %v6588_v6 = vpop.eup %4790  ;;  %v3540_v56 = vadd.f32 %v3539_v49, %v3403_v1  ;;  %v4384_v53 = vpop.f32.mrb[48].mxu0  ;;  %v2140_v54 = vadd.f32 %v6553_v50, %v2139_v32  ;;  %4822 = vtanh.f32 %v2401_v15  ;;  %v2396_v10 = vadd.f32 %v6553_v50, %v2395_v7 }
 0x20f   : > { %v4793_v44 = vpop.eup %4792  ;;  %v6595_v60 = vpop.permute.xlu1 %3315  ;;  %v3624_v5 = vadd.f32 %v3623_v21, %v3467_v46  ;;  %4824 = vtanh.f32 %v2148_v14  ;;  %v2161_v49 = vadd.f32 %v6553_v50, %v4384_v53  ;;  %v3536_v55 = vrot.slane %v6609_v19, 1 }
 0x210   : > { %v4795_v4 = vpop.eup %4794  ;;  %v3236_v3 = vpop.permute.xlu0 %3235  ;;  %v3541_v18 = vadd.f32 %v3540_v56, %v3404_v52  ;;  %v3407_v34 = vmul.f32 %v4793_v44, %v6860_v62  ;;  %4826 = vtanh.f32 %v2140_v54 }
 0x211   : > { %v4797_v28 = vpop.eup %4796  ;;  %v3405_v8 = vmul.f32 %v4795_v4, %v6858_v29  ;;  %v4448_v16 = vpop.f32.mrb[48].mxu1  ;;  %4828 = vtanh.f32 %v2393_v25 }
 0x212   : > { %v6600_v48 = vpop.eup %4798  ;;  %v3468_v11 = vmul.f32 %v4797_v28, %v3231_v33  ;;  %v2152_v20 = vpop.f32.mrb[49].mxu0  ;;  %v2417_v31 = vadd.f32 %v6553_v50, %v4448_v16  ;;  %4830 = vtanh.f32 %v2404_v58 }
 0x213   : > { %v2408_v23 = vpop.f32.mrb[49].mxu1  ;;  %v4801_v57 = vpop.eup %4800  ;;  %v3542_v0 = vadd.f32 %v3541_v18, %v3405_v8  ;;  %v2153_v21 = vadd.f32 %v6553_v50, %v2152_v20  ;;  %4832 = vtanh.f32 %v2396_v10  ;;  %v6646_v10 = vadd.f32 %v3536_v55, %v6609_v19 }
 0x214   : > { %v4385_v63 = vpop.f32.mrb[50].mxu0  ;;  %v4449_v26 = vpop.f32.mrb[50].mxu1  ;;  %v3625_v45 = vadd.f32 %v3624_v5, %v3468_v11  ;;  %v3469_v32 = vmul.f32 %v4801_v57, %v3236_v3  ;;  %v2409_v15 = vadd.f32 %v6553_v50, %v2408_v23  ;;  %v6863_v11 = vld [vmem:[#allocation22_spill] sm:$0xff] }
 0x215   : > { %v4803_v51 = vpop.eup %4802  ;;  %v6612_v27 = vpop.permute.xlu1 %3320  ;;  %v3543_v22 = vadd.f32 %v3542_v0, %v3406_v39  ;;  %4834 = vtanh.f32 %v2161_v49  ;;  %v2164_v46 = vadd.f32 %v6553_v50, %v4385_v63  ;;  %v2420_v57 = vadd.f32 %v6553_v50, %v4449_v26 }
 0x216   : > { %v3241_v42 = vpop.permute.xlu0 %3240  ;;  %v4805_v40 = vpop.eup %4804  ;;  %v3408_v12 = vmul.f32 %v4803_v51, %v6861_v41  ;;  %v3626_v56 = vadd.f32 %v3625_v45, %v3469_v32  ;;  %4836 = vtanh.f32 %v2417_v31  ;;  %v6866_v32 = vld [vmem:[#allocation26_spill] sm:$0xff] }
 0x217   : > { %v2155_v33 = vpop.f32.mrb[51].mxu0  ;;  %v2411_v37 = vpop.f32.mrb[51].mxu1  ;;  %v3544_v44 = vadd.f32 %v3543_v22, %v3407_v34  ;;  %v3470_v14 = vmul.f32 %v6588_v6, %v3241_v42  ;;  %v3410_v20 = vmul.f32 %v4805_v40, %v6863_v11  ;;  %v6864_v42 = vld [vmem:[#allocation21_spill] sm:$0xff]  ;;  %v6865_v40 = vld [vmem:[#allocation24_spill] sm:$0xff] }
 0x218   : > { %v6616_v1 = vpop.eup %4806  ;;  %v4388_v3 = vpop.f32.mrb[52].mxu0  ;;  %4838 = vtanh.f32 %v2153_v21  ;;  %v2156_v63 = vadd.f32 %v6553_v50, %v2155_v33  ;;  %v2412_v26 = vadd.f32 %v6553_v50, %v2411_v37  ;;  %v6868_v11 = vld [vmem:[#allocation25_spill] sm:$0xff] }
 0x219   : > { %v4809_v61 = vpop.eup %4808  ;;  %v6625_v43 = vpop.permute.xlu1 %3325  ;;  %v3545_v8 = vadd.f32 %v3544_v44, %v3408_v12  ;;  %v3627_v36 = vadd.f32 %v3626_v56, %v3470_v14  ;;  %4840 = vtanh.f32 %v2409_v15  ;;  %v2177_v33 = vadd.f32 %v6553_v50, %v4388_v3 }
 0x21a   : > { %v4811_v52 = vpop.eup %4810  ;;  %v3246_v4 = vpop.permute.xlu0 %3245  ;;  %v3411_v62 = vmul.f32 %v4809_v61, %v6864_v42  ;;  %4842 = vtanh.f32 %v2164_v46 }
 0x21b   : > { %v4813_v59 = vpop.eup %4812  ;;  %v3409_v7 = vmul.f32 %v4811_v52, %v6862_v24  ;;  %v4452_v28 = vpop.f32.mrb[52].mxu1  ;;  %v3471_v23 = vmul.f32 %v6600_v48, %v3246_v4  ;;  %4844 = vtanh.f32 %v2420_v57 }
 0x21c   : > { %v6629_v29 = vpop.eup %4814  ;;  %v2168_v53 = vpop.f32.mrb[53].mxu0  ;;  %v2433_v49 = vadd.f32 %v6553_v50, %v4452_v28  ;;  %4846 = vtanh.f32 %v2156_v63 }
 0x21d   : > { %v2424_v16 = vpop.f32.mrb[53].mxu1  ;;  %v4817_v18 = vpop.eup %4816  ;;  %v3546_v51 = vadd.f32 %v3545_v8, %v3409_v7  ;;  %v3628_v22 = vadd.f32 %v3627_v36, %v3471_v23  ;;  %v2169_v52 = vadd.f32 %v6553_v50, %v2168_v53  ;;  %v6867_v7 = vld [vmem:[#allocation23_spill] sm:$0xff]  ;;  %4848 = vtanh.f32 %v2412_v26 }
 0x21e   : > { %v4389_v25 = vpop.f32.mrb[54].mxu0  ;;  %v4453_v5 = vpop.f32.mrb[54].mxu1  ;;  %v3414_v61 = vmul.f32 %v4817_v18, %v6866_v32  ;;  %v2425_v19 = vadd.f32 %v6553_v50, %v2424_v16 }
 0x21f   : > { %v4819_v54 = vpop.eup %4818  ;;  %v6637_v39 = vpop.permute.xlu1 %3330  ;;  %v3547_v45 = vadd.f32 %v3546_v51, %v3410_v20  ;;  %v2180_v55 = vadd.f32 %v6553_v50, %v4389_v25  ;;  %4850 = vtanh.f32 %v2177_v33  ;;  %v2436_v57 = vadd.f32 %v6553_v50, %v4453_v5 }
 0x220   : > { %v3251_v6 = vpop.permute.xlu0 %3250  ;;  %v4821_v0 = vpop.eup %4820  ;;  %v3412_v34 = vmul.f32 %v4819_v54, %v6865_v40  ;;  %4852 = vtanh.f32 %v2433_v49 }
 0x221   : > { %v2171_v48 = vpop.f32.mrb[55].mxu0  ;;  %v2427_v41 = vpop.f32.mrb[55].mxu1  ;;  %v3548_v37 = vadd.f32 %v3547_v45, %v3411_v62  ;;  %v3472_v44 = vmul.f32 %v4813_v59, %v3251_v6 }
 0x222   : > { %v6642_v12 = vpop.eup %4822  ;;  %v4392_v15 = vpop.f32.mrb[56].mxu0  ;;  %v2172_v16 = vadd.f32 %v6553_v50, %v2171_v48  ;;  %4854 = vtanh.f32 %v2169_v52  ;;  %v2428_v36 = vadd.f32 %v6553_v50, %v2427_v41 }
 0x223   : > { %v4825_v58 = vpop.eup %4824  ;;  %v6651_v21 = vpop.permute.xlu1 %3335  ;;  %v3549_v8 = vadd.f32 %v3548_v37, %v3412_v34  ;;  %v3629_v46 = vadd.f32 %v3628_v22, %v3472_v44  ;;  %4856 = vtanh.f32 %v2425_v19  ;;  %v2193_v42 = vadd.f32 %v6553_v50, %v4392_v15 }
 0x224   : > { %v4827_v31 = vpop.eup %4826  ;;  %v3256_v4 = vpop.permute.xlu0 %3255  ;;  %v3415_v20 = vmul.f32 %v4825_v58, %v6868_v11  ;;  %4858 = vtanh.f32 %v2180_v55  ;;  %v6869_v58 = vld [vmem:[#allocation30_spill] sm:$0xff] }
 0x225   : > { %v6653_v24 = vpop.eup %4828  ;;  %v3413_v56 = vmul.f32 %v4827_v31, %v6867_v7  ;;  %v4456_v3 = vpop.f32.mrb[56].mxu1  ;;  %v3473_v59 = vmul.f32 %v4821_v0, %v3256_v4  ;;  %4860 = vtanh.f32 %v2436_v57 }
 0x226   : > { %v6658_v28 = vpop.eup %4830  ;;  %v2184_v14 = vpop.f32.mrb[57].mxu0  ;;  %v2449_v62 = vadd.f32 %v6553_v50, %v4456_v3  ;;  %4862 = vtanh.f32 %v2172_v16  ;;  %v6684_v3 = vsel %vm3672_vm2, %v6646_v10, %v6605_v17 }
 0x227   : > { %v2440_v53 = vpop.f32.mrb[57].mxu1  ;;  %v6660_v18 = vpop.eup %4832  ;;  %v3550_v51 = vadd.f32 %v3549_v8, %v3413_v56  ;;  %v3630_v63 = vadd.f32 %v3629_v46, %v3473_v59  ;;  %v2185_v40 = vadd.f32 %v6553_v50, %v2184_v14  ;;  %v6870_v56 = vld [vmem:[#allocation28_spill] sm:$0xff]  ;;  %4864 = vtanh.f32 %v2428_v36 }
 0x228   : > { %v4393_v23 = vpop.f32.mrb[58].mxu0  ;;  %v4457_v25 = vpop.f32.mrb[58].mxu1  ;;  %v2441_v45 = vadd.f32 %v6553_v50, %v2440_v53 }
 0x229   : > { %v4835_v54 = vpop.eup %4834  ;;  %v3261_v6 = vpop.permute.xlu0 %3260  ;;  %v3551_v48 = vadd.f32 %v3550_v51, %v3414_v61  ;;  %v2196_v49 = vadd.f32 %v6553_v50, %v4393_v23  ;;  %v6676_v31 = vadd.f32 %v6553_v50, %v4457_v25  ;;  %4866 = vtanh.f32 %v2193_v42 }
 0x22a   : > { %v4837_v0 = vpop.eup %4836  ;;  %v2187_v5 = vpop.f32.mrb[59].mxu0  ;;  %v3474_v41 = vmul.f32 %v6616_v1, %v3261_v6  ;;  %v3418_v32 = vmul.f32 %v4835_v54, %v6869_v58  ;;  %4868 = vtanh.f32 %v2449_v62  ;;  %v6872_v54 = vld [vmem:[#allocation29_spill] sm:$0xff] }
 0x22b   : > { %v2443_v34 = vpop.f32.mrb[59].mxu1  ;;  %v4839_v26 = vpop.eup %4838  ;;  %v3552_v52 = vadd.f32 %v3551_v48, %v3415_v20  ;;  %v3482_v61 = vmul.f32 %v4837_v0, %v6568_v35  ;;  %v2188_v35 = vadd.f32 %v6553_v50, %v2187_v5  ;;  %4870 = vtanh.f32 %v2185_v40 }
 0x22c   : > { %v6670_v22 = vpop.permute.xlu1 %3340  ;;  %v4841_v33 = vpop.eup %4840  ;;  %v3631_v44 = vadd.f32 %v3630_v63, %v3474_v41  ;;  %v3416_v19 = vmul.f32 %v4839_v26, %v6870_v56  ;;  %v2444_v59 = vadd.f32 %v6553_v50, %v2443_v34  ;;  %4872 = vtanh.f32 %v2441_v45 }
 0x22d   : > { %v4843_v37 = vpop.eup %4842  ;;  %v3266_v4 = vpop.permute.xlu0 %3265  ;;  %v3553_v46 = vrot.slane %v3552_v52, 4  ;;  %v3480_v20 = vmul.f32 %v4841_v33, %v6548_v2  ;;  %4874 = vtanh.f32 %v2196_v49 }
 0x22e   : > { %v4845_v7 = vpop.eup %4844  ;;  %v3475_v1 = vmul.f32 %v6629_v29, %v3266_v4  ;;  %v4396_v55 = vpop.f32.mrb[60].mxu0  ;;  %v6871_v29 = vld [vmem:[#allocation27_spill] sm:$0xff]  ;;  %v3419_v51 = vmul.f32 %v4843_v37, %v6872_v54  ;;  %v6873_v37 = vld [vmem:[#allocation34_spill] sm:$0xff]  ;;  %4876 = vtanh.f32 %v2188_v35 }
 0x22f   : > { %v4460_v15 = vpop.f32.mrb[60].mxu1  ;;  %v4847_v8 = vpop.eup %4846  ;;  %v3554_v10 = vadd.f32 %v3553_v46, %v3552_v52  ;;  %v3483_v42 = vmul.f32 %v4845_v7, %v6566_v38  ;;  %v2209_v62 = vadd.f32 %v6553_v50, %v4396_v55  ;;  %4878 = vtanh.f32 %v2444_v59  ;;  %v6876_v59 = vld [vmem:[#allocation33_spill] sm:$0xff] }
 0x230   : > { %v2200_v14 = vpop.f32.mrb[61].mxu0  ;;  %v2456_v53 = vpop.f32.mrb[61].mxu1  ;;  %v3417_v57 = vmul.f32 %v4847_v8, %v6871_v29  ;;  %v3632_v16 = vadd.f32 %v3631_v44, %v3475_v1  ;;  %v2465_v33 = vadd.f32 %v6553_v50, %v4460_v15  ;;  %v6874_v44 = vld [vmem:[#allocation32_spill] sm:$0xff] }
 0x231   : > { %v4849_v11 = vpop.eup %4848  ;;  %v4397_v23 = vpop.f32.mrb[62].mxu0  ;;  %v3555_v48 = vrot.slane %v3554_v10, 2  ;;  %v2457_v8 = vadd.f32 %v6553_v50, %v2456_v53  ;;  %4880 = vtanh.f32 %v6676_v31 }
 0x232   : > { %v4461_v25 = vpop.f32.mrb[62].mxu1  ;;  %v4851_v17 = vpop.eup %4850  ;;  %v3481_v36 = vmul.f32 %v4849_v11, %v6546_v47  ;;  %v3559_v2 = vadd.f32 %v3417_v57, %v3416_v19  ;;  %v2201_v47 = vadd.f32 %v6553_v50, %v2200_v14  ;;  %v2212_v49 = vadd.f32 %v6553_v50, %v4397_v23 }
 0x233   : > { %v6692_v63 = vpop.permute.xlu1 %3345  ;;  %v3271_v6 = vpop.permute.xlu0 %3270  ;;  %v3422_v52 = vmul.f32 %v4851_v17, %v6873_v37  ;;  %v3556_v45 = vadd.f32 %v3555_v48, %v3554_v10  ;;  %4882 = vtanh.f32 %v2209_v62  ;;  %v2468_v23 = vadd.f32 %v6553_v50, %v4461_v25 }
 0x234   : > { %v4853_v0 = vpop.eup %4852  ;;  %v2203_v5 = vpop.f32.mrb[63].mxu0  ;;  %v3643_v41 = vadd.f32 %v3481_v36, %v3480_v20  ;;  %v3560_v58 = vadd.f32 %v3559_v2, %v3418_v32  ;;  %v6875_v20 = vld [vmem:[#allocation31_spill] sm:$0xff]  ;;  %v3476_v29 = vmul.f32 %v6653_v24, %v3271_v6  ;;  %4884 = vtanh.f32 %v2201_v47 }
 0x235   : > { %v2459_v34 = vpop.f32.mrb[63].mxu1  ;;  %v4855_v26 = vpop.eup %4854  ;;  %v3486_v55 = vmul.f32 %v4853_v0, %v6612_v27  ;;  %v3557_v46 = vrot.slane %v3556_v45, 1  ;;  %4886 = vtanh.f32 %v2457_v8  ;;  %v2204_v24 = vadd.f32 %v6553_v50, %v2203_v5 }
 0x236   : > { %v4857_v40 = vpop.eup %4856  ;;  %v3420_v4 = vmul.f32 %v4855_v26, %v6874_v44  ;;  %v3644_v7 = vadd.f32 %v3643_v41, %v3482_v61  ;;  %v3561_v15 = vadd.f32 %v3560_v58, %v3419_v51  ;;  %v3633_v51 = vadd.f32 %v3632_v16, %v3476_v29  ;;  %v6877_v26 = vld [vmem:[#allocation36_spill] sm:$0xff] }
 0x237   : > { %v4859_v38 = vpop.eup %4858  ;;  %v3484_v56 = vmul.f32 %v4857_v40, %v6584_v9  ;;  %v3276_v19 = vpop.permute.xlu0 %3275  ;;  %4888 = vtanh.f32 %v2465_v33  ;;  %v3558_v2 = vadd.f32 %v3557_v46, %v3556_v45  ;;  %v2460_v48 = vadd.f32 %v6553_v50, %v2459_v34 }
 0x238   : > { %v4861_v1 = vpop.eup %4860  ;;  %v3645_v14 = vadd.f32 %v3644_v7, %v3483_v42  ;;  %v3562_v61 = vadd.f32 %v3561_v15, %v3420_v4  ;;  %v3351_v35 = vpop.permute.xlu1 %3350  ;;  %v3423_v17 = vmul.f32 %v4859_v38, %v6876_v59  ;;  %4890 = vtanh.f32 %v2204_v24 }
 0x239   : > { %v4863_v32 = vpop.eup %4862  ;;  %v3487_v0 = vmul.f32 %v4861_v1, %v6625_v43  ;;  %v3477_v16 = vmul.f32 %v6660_v18, %v3276_v19  ;;  %4892 = vtanh.f32 %v2460_v48  ;;  %v6721_v18 = vsel %vm3674_vm3, %v3558_v2, %v6684_v3  ;;  %v6879_v19 = vld [vmem:[#allocation38_spill] sm:$0xff]  ;;  %v6881_v3 = vld [vmem:[#allocation40_spill] sm:$0xff] }
 0x23a   : > { %v4865_v11 = vpop.eup %4864  ;;  %v3421_v9 = vmul.f32 %v4863_v32, %v6875_v20  ;;  %v3646_v57 = vadd.f32 %v3645_v14, %v3484_v56  ;;  %4894 = vtanh.f32 %v2212_v49  ;;  %v6880_v14 = vld [vmem:[#allocation37_spill] sm:$0xff] }
 0x23b   : > { %v4867_v27 = vpop.eup %4866  ;;  %v3485_v53 = vmul.f32 %v4865_v11, %v6595_v60  ;;  %v3281_v10 = vpop.permute.xlu0 %3280  ;;  %4896 = vtanh.f32 %v2468_v23 }
 0x23c   : > { %v4869_v54 = vpop.eup %4868  ;;  %v3563_v31 = vadd.f32 %v3562_v61, %v3421_v9  ;;  %v3356_v33 = vpop.permute.xlu1 %3355  ;;  %v3478_v5 = vmul.f32 %v6642_v12, %v3281_v10  ;;  %v3426_v1 = vmul.f32 %v4867_v27, %v6879_v19  ;;  %v3616_v10 = vrot.slane %v6573_v30, 4 }
 0x23d   : > { %v4871_v36 = vpop.eup %4870  ;;  %v3647_v42 = vadd.f32 %v3646_v57, %v3485_v53 }
 0x23e   : > { %v4873_v6 = vpop.eup %4872  ;;  %v3564_v62 = vadd.f32 %v3563_v31, %v3422_v52  ;;  %v3424_v60 = vmul.f32 %v4871_v36, %v6877_v26  ;;  %v3634_v52 = vadd.f32 %v3633_v51, %v3477_v16  ;;  %v6882_v31 = vld [vmem:[#allocation39_spill] sm:$0xff]  ;;  %v3617_v48 = vadd.f32 %v3616_v10, %v6573_v30 }
 0x23f   : > { %v3488_v41 = vmul.f32 %v4873_v6, %v6637_v39  ;;  %v3648_v47 = vadd.f32 %v3647_v42, %v3486_v55  ;;  %v3286_v25 = vpop.permute.xlu0 %3285  ;;  %v4875_v40 = vpop.eup %4874  ;;  %v6878_v39 = vld [vmem:[#allocation35_spill] sm:$0xff]  ;;  %v6883_v6 = vld [vmem:[#allocation42_spill] sm:$0xff] }
 0x240   : > { %v3565_v43 = vadd.f32 %v3564_v62, %v3423_v17  ;;  %v4877_v58 = vpop.eup %4876  ;;  %v3479_v44 = vmul.f32 %v6658_v28, %v3286_v25  ;;  %v3635_v12 = vadd.f32 %v3634_v52, %v3478_v5  ;;  %v3490_v28 = vmul.f32 %v4869_v54, %v6670_v22  ;;  %v3361_v20 = vpop.permute.xlu1 %3360 }
 0x241   : > { %v3649_v37 = vadd.f32 %v3648_v47, %v3487_v0  ;;  %v4879_v50 = vpop.eup %4878  ;;  %v3425_v4 = vmul.f32 %v4877_v58, %v6878_v39  ;;  %v3427_v49 = vmul.f32 %v4875_v40, %v6880_v14  ;;  %v3595_v17 = vrot.slane %v6450_v13, 4 }
 0x242   : > { %v3566_v34 = vadd.f32 %v3565_v43, %v3424_v60  ;;  %v4881_v38 = vpop.eup %4880  ;;  %v3489_v45 = vmul.f32 %v4879_v50, %v6651_v21  ;;  %v3636_v32 = vadd.f32 %v3635_v12, %v3479_v44 }
 0x243   : > { %v3650_v7 = vadd.f32 %v3649_v37, %v3488_v41  ;;  %v4883_v56 = vpop.eup %4882  ;;  %v3491_v21 = vmul.f32 %v4881_v38, %v6692_v63  ;;  %v3596_v62 = vadd.f32 %v3595_v17, %v6450_v13  ;;  %v6884_v41 = vld [vmem:[#allocation41_spill] sm:$0xff]  ;;  %v3618_v37 = vrot.slane %v3617_v48, 2 }
 0x244   : > { %v3567_v55 = vadd.f32 %v3566_v34, %v3425_v4  ;;  %v4885_v15 = vpop.eup %4884  ;;  %v3637_v42 = vrot.slane %v3636_v32, 4  ;;  %v3430_v63 = vmul.f32 %v4883_v56, %v6883_v6 }
 0x245   : > { %v3651_v8 = vadd.f32 %v3650_v7, %v3489_v45  ;;  %v4887_v46 = vpop.eup %4886  ;;  %v3428_v61 = vmul.f32 %v4885_v15, %v6881_v3  ;;  %v3619_v4 = vadd.f32 %v3618_v37, %v3617_v48  ;;  %v2727_v3 = vld [vmem:[#allocation2] sm:$0xff] }
 0x246   : > { %v3568_v11 = vadd.f32 %v3567_v55, %v3426_v1  ;;  %v4889_v9 = vpop.eup %4888  ;;  %v3492_v57 = vmul.f32 %v4887_v46, %v3351_v35  ;;  %v3366_v35 = vpop.permute.xlu1 %3365  ;;  %v3638_v43 = vadd.f32 %v3637_v42, %v3636_v32 }
 0x247   : > { %v3652_v29 = vadd.f32 %v3651_v8, %v3490_v28  ;;  %v4891_v27 = vpop.eup %4890  ;;  %v3494_v60 = vmul.f32 %v4889_v9, %v3361_v20  ;;  %v3620_v19 = vrot.slane %v3619_v4, 1 }
 0x248   : > { %v3569_v59 = vadd.f32 %v3568_v11, %v3427_v49  ;;  %v4893_v22 = vpop.eup %4892  ;;  %v3429_v23 = vmul.f32 %v4891_v27, %v6882_v31  ;;  %v3639_v50 = vrot.slane %v3638_v43, 2 }
 0x249   : > { %v3653_v53 = vadd.f32 %v3652_v29, %v3491_v21  ;;  %v4895_v51 = vpop.eup %4894  ;;  %v3493_v0 = vmul.f32 %v4893_v22, %v3356_v33  ;;  %v3597_v33 = vrot.slane %v3596_v62, 2  ;;  %v3621_v32 = vadd.f32 %v3620_v19, %v3619_v4  ;;  %v4010_v29 = vld [vmem:[#allocation3] sm:$0xff] (!%p4239_p4) }
 0x24a   : > { %v3570_v54 = vadd.f32 %v3569_v59, %v3428_v61  ;;  %v4897_v24 = vpop.eup %4896  ;;  %v3431_v47 = vmul.f32 %v4895_v51, %v6884_v41  ;;  %v3640_v30 = vadd.f32 %v3639_v50, %v3638_v43 }
 0x24b   : > { %v3654_v36 = vadd.f32 %v3653_v53, %v3492_v57  ;;  %v3495_v40 = vmul.f32 %v4897_v24, %v3366_v35  ;;  %v3598_v39 = vadd.f32 %v3597_v33, %v3596_v62  ;;  %v5020_v57 = vmov (!%p4239_p4), 0  }
 0x24c   : > { %v3571_v2 = vadd.f32 %v3570_v54, %v3429_v23  ;;  %v3641_v55 = vrot.slane %v3640_v30, 1  ;;  %4899 = vset.pattern.permute.xlu0 (!%p4239_p4), %v5020_v57 }
 0x24d   : > { %v3655_v26 = vadd.f32 %v3654_v36, %v3493_v0  ;;  %v3599_v12 = vrot.slane %v3598_v39, 1 }
 0x24e   : > { %v3572_v16 = vadd.f32 %v3571_v2, %v3430_v63  ;;  %v3642_v14 = vadd.f32 %v3641_v55, %v3640_v30 }
 0x24f   : > { %v3656_v25 = vadd.f32 %v3655_v26, %v3494_v60  ;;  %v3600_v8 = vadd.f32 %v3599_v12, %v3598_v39 }
 0x250   : > { %v3573_v5 = vadd.f32 %v3572_v16, %v3431_v47 }
 0x251   : > { %v3657_v58 = vadd.f32 %v3656_v25, %v3495_v40 }
 0x252   : > { %v3574_v52 = vrot.slane %v3573_v5, 4 }
 0x253   : > { %v3658_v44 = vrot.slane %v3657_v58, 4 }
 0x254   : > { %v3575_v34 = vadd.f32 %v3574_v52, %v3573_v5 }
 0x255   : > { %v3659_v13 = vadd.f32 %v3658_v44, %v3657_v58 }
 0x256   : > { %v3576_v38 = vrot.slane %v3575_v34, 2 }
 0x257   : > { %v3660_v45 = vrot.slane %v3659_v13, 2 }
 0x258   : > { %v3577_v7 = vadd.f32 %v3576_v38, %v3575_v34 }
 0x259   : > { %v3661_v56 = vadd.f32 %v3660_v45, %v3659_v13 }
 0x25a   : > { %v3578_v1 = vrot.slane %v3577_v7, 1 }
 0x25b   : > { %v3662_v28 = vrot.slane %v3661_v56, 1 }
 0x25c   : > { %v3579_v15 = vadd.f32 %v3578_v1, %v3577_v7 }
 0x25d   : > { %v3663_v11 = vadd.f32 %v3662_v28, %v3661_v56 }
 0x25e   : > { %v3677_v46 = vsel %vm3676_vm4, %v3579_v15, %v6721_v18  ;;  %v4011_v18 = vmax.f32 (!%p4239_p4), %v4010_v29, 1e-09 }
 0x25f   : > { %v3679_v49 = vsel %vm3678_vm5, %v3600_v8, %v3677_v46  ;;  %4008 = sbr.rel (%p4239_p4) target bundleno = 924 (0x39c), region = 123 }
 0x260   : > { %v3681_v61 = vsel %vm3680_vm6, %v3621_v32, %v3679_v49  ;;  %4014 = vperm.xlu0 (!%p4239_p4), %4899, %v4011_v18  }
 0x261   : > { %v3683_v20 = vsel %vm3682_vm7, %v3642_v14, %v3681_v61 }
 0x262   : > { %v3685_v9 = vsel %vm3684_vm8, %v3663_v11, %v3683_v20 }
 0x263   : > { %v3687_v21 = vadd.f32 %v3685_v9, %v2727_v3 }
 0x265   : > { %3688 = vst [vmem:[#allocation2] sm:$0xff] %v3687_v21 }
 0x26c   : > { %v4009_v27 = vld [vmem:[#allocation2] sm:$0xff] }
 0x2df   : > { %v4015_v59 = vpop.permute.xlu0 %4014 }
 0x2e0   : > { %4900 = vrcp.f32 %v4015_v59 }
 0x2ea   : > { %v4901_v17 = vpop.eup %4900 }
 0x2eb   : > { %v4018_v53 = vmul.f32 %v4901_v17, %v4009_v27 }
 0x2ed   : > { %v4019_v22 = vmul.f32 %v4018_v53, %v4018_v53 }
 0x2ef   : > { %4020 = vadd.xlane.f32.xlu0 %v4019_v22 }
 0x37c   : > { %v4021_v10 = vpop.xlane.xlu0 %4020 }
 0x37d   : > { %4902 = vrsqrt.f32 %v4021_v10  ;;  %vm4024_vm9 = vcmp.eq.f32.partialorder %v4021_v10, inf  ;;  %v4027_v23 = vand.u32 2147483648, %v4021_v10  ;;  %vm4026_vm10 = vcmp.eq.f32.partialorder %v4021_v10, 0.0 }
 0x387   : > { %v4903_v54 = vpop.eup %4902 }
 0x388   : > { %v4023_v31 = vmul.f32 %v4903_v54, %v4021_v10 }
 0x38a   : > { %v4025_v51 = vsel %vm4024_vm9, %v4021_v10, %v4023_v31 }
 0x38b   : > { %v4028_v36 = vsel %vm4026_vm10, %v4027_v23, %v4025_v51 }
 0x38c   : > { %v4029_v0 = vmax.f32 %v4028_v36, 1e-12 }
 0x38e   : > { %4904 = vrcp.f32 %v4029_v0 }
 0x398   : > { %v4905_v42 = vpop.eup %4904 }
 0x399   : > { %v4031_v24 = vmul.f32 %v4905_v42, %v4018_v53 }
 0x39b   : > { %4032 = vst [vmem:[%s1330_s30] sm:$0xff] %v4031_v24 }
 0x39c PF: > { %s4241_s20 = sshll.u32 %s5004_s21, 7  ;;  %s4047_s0 = sshll.u32 %s1330_s30, 4  ;;  %s4048_s0 = int_to_ptr.vmem [resolvable:$true] %s4047_s0 }
 0x39d   : > { %s6749_s5 = scalar_lea.hbm %s6810_s4, %s4241_s20  ;;  %s4034_s13 = scalar_lea.sflag [#allocation7], %s1328_s29 }
 0x39e   : > { %s4906_s14 = scalar_lea.vmem %s4048_s0, 128  ;;  %s5021_s28 = smov [#allocation6]  }
 0x39f   : > { %p4907_p5 = scmp.ne.s32.totalorder %s4048_s0, %s4906_s14  ;;  %s4910_s18 = sshll.u32 %s5021_s28, 4  ;;  %s4911_s18 = int_to_ptr.vmem [resolvable:$false] %s4910_s18 }
 0x3a0   : > { %s4912_s26 = scalar_lea.vmem %s4911_s18, 256  ;;  %p4913_p9 = scmp.lt.s32.totalorder %s4048_s0, %s4911_s18 }
 0x3a1   : > { %p4908_p6 = pnand %p4907_p5, %p5119_p7  ;;  %p4914_p10 = scmp.lt.s32.totalorder %s4912_s26, %s4906_s14 }
 0x3a3   : > { %p4909_p8 = pneg %p4908_p6  ;;  %p4915_p11 = por %p4914_p10, %p4913_p9 }
 0x3a5   : > { %p4916_p13 = pnand %p4915_p11, %p4909_p8 }
 0x3a7   : > { %4919 = shalt.err (!%p4916_p13)
}
 0x3a8   : > { %s4920_s21 = scalar_lea.hbm %s6749_s5, 128  ;;  %s4924_s30 = scalar_lea.hbm %s6810_s4, 256 }
 0x3a9   : > { %p4921_p0 = scmp.ne.s32.totalorder %s6749_s5, %s4920_s21  ;;  %p4925_p3 = scmp.lt.u32.totalorder %s6749_s5, %s6810_s4 }
 0x3aa   : > { %p4926_p4 = scmp.lt.u32.totalorder %s4924_s30, %s4920_s21  ;;  %p4928_p6 = scmp.lt.u32.totalorder %s4920_s21, %s6749_s5 }
 0x3ab   : > { %p4922_p1 = pnand %p4921_p0, %p5119_p7 }
 0x3ac   : > { %p4927_p5 = por %p4926_p4, %p4925_p3 }
 0x3ad   : > { %p4923_p2 = pneg %p4922_p1 }
 0x3ae   : > { %p4929_p8 = por %p4928_p6, %p4927_p5 }
 0x3b0   : > { %p4930_p9 = pnand %p4929_p8, %p4923_p2 }
 0x3b2   : > { %4933 = shalt.err (!%p4930_p9)
}
 0x3b3   : > { %4478 = dma.vmem_to_hbm [thread:$0]  (%p5119_p7), %s4048_s0, 128, %s6749_s5, %s4034_s13  }
 0x3b4 PF: > { %p4484_p10 = scmp.ge.s32.totalorder %s5016_s24, 2  ;;  %s4059_s9 = sand.u32 1, %s4980_s15  }
 0x3b5   : > { %s4060_s6 = scalar_lea.sflag [#allocation7], %s4059_s9 }
 0x3b6   : > { %p4481_p11 = pnand %p4484_p10, %p5127_p12 }
 0x3b8   : > { %4975 = dma.done.wait (!%p4481_p11), %s4060_s6, 128  }
 0x3b9   : > { %4977 = vsyncadd (!%p4481_p11), %s4060_s6, 4294967168  ;;  %s17_s24 = sadd.s32 1, %s5016_s24   ;;  %s6885_s7 = sld [smem:[#allocation9_spill]] }
 0x3ba   : > { %p14_p13 = scmp.ge.s32.totalorder %s17_s24, 6   ;;  %s6886_s15 = smov %s4984_s16 }
 0x3bb   : > { %s6887_s16 = smov %s4988_s17  ;;  %s6888_s17 = smov %s5132_s11 }
 0x3bc   : > { %s6889_s18 = smov %s4996_s19  ;;  %s6890_s19 = smov %s5135_s12 }
 0x3bd   : > { %s6891_s20 = smov %s5008_s22  ;;  %s6892_s21 = smov %s5012_s23 }
 0x3be   : > { %s6893_s22 = smov %s6896_s27  ;;  %16 = sbr.rel (!%p14_p13) target bundleno = 8 (0x8), region = 171 }
 0x3bf   : > { %s6894_s23 = smov %s6885_s7 }
 0x3c5   :  { %4065 = vsyncpa [#allocation7], 1 }
 0x3c6   :  { %4067 = vsyncpa [#allocation7 + $0x1], 1 }

</bundles_post_ra>
